<compile_context>
chip_gen: v5e
topology: v5e:2x2
jax: 0.10.0
libtpu: 0.0.40
codegen_flags: <defaults>
</compile_context>

<pallas_src>
import functools

import jax
import jax.numpy as jnp
import numpy as np
from jax.experimental import pallas as pl
from jax.experimental.pallas import tpu as pltpu

EPS = 1e-5
LANE = 128

# MXU / DMA input dtype and activation-store dtype.  bf16 halves all HBM
# traffic and doubles MXU rate; accumulation is always f32.
COMPUTE_DTYPE = jnp.bfloat16
STORE_DTYPE = jnp.bfloat16


def _round_up(x, m):
    return ((x + m - 1) // m) * m


def _vmem_limit_bytes():
    # ~half of physical VMEM: 64 MiB on v5e/v6e (128 MiB), 32 MiB on v7x (64 MiB).
    try:
        phys_mib = pltpu.get_tpu_info().vmem_capacity_bytes // (1024 * 1024)
    except Exception:  # pragma: no cover - conservative fallback
        phys_mib = 64
    return int(min(96, max(32, phys_mib // 2))) * 1024 * 1024


_VMEM_LIMIT = _vmem_limit_bytes()


def _apply_act(x, activation):
    if activation == "relu":
        return jnp.maximum(x, 0.0)
    return x


# ----------------------------- Pallas kernels ------------------------------

def _conv_kernel(x_ref, w_ref, b_ref, o_ref, *, k, s, Ho, Wo, activation):
    # Direct conv: k*k shifted (Ho*Wo, Cin)@(Cin, tn) MXU matmuls, f32 acc,
    # fused bias + activation, bf16 store.  x_ref holds the s*s space-to-depth
    # phases of one padded image, so every tap is a contiguous static slice.
    Cin = x_ref.shape[-1]
    tn = w_ref.shape[-1]
    acc = jnp.zeros((Ho * Wo, tn), jnp.float32)
    for ky in range(k):
        py, qy = ky % s, ky // s
        for kx in range(k):
            px, qx = kx % s, kx // s
            tap = x_ref[py * s + px, qy:qy + Ho, qx:qx + Wo, :]
            tap = tap.reshape(Ho * Wo, Cin)
            acc += jnp.dot(tap, w_ref[ky * k + kx],
                           preferred_element_type=jnp.float32)
    acc = acc + b_ref[...]
    o_ref[0] = _apply_act(acc, activation).astype(o_ref.dtype)


def _depthwise_kernel(x_ref, w_ref, b_ref, o_ref, *, k, s, Ho, WoC, C,
                      activation):
    # Unrolled k*k-tap VPU multiply-accumulate in a merged lane-dense (H, W*C)
    # layout (no im2col, no masked stores even for C < 128).  bf16 in, f32 acc.
    acc = jnp.zeros((Ho, WoC), jnp.float32)
    for ky in range(k):
        py, qy = ky % s, ky // s
        for kx in range(k):
            px, qx = kx % s, kx // s
            tap = x_ref[py * s + px, qy:qy + Ho, qx * C:qx * C + WoC]
            wv = w_ref[ky * k + kx:ky * k + kx + 1, :]          # (1, WoC)
            acc += tap.astype(jnp.float32) * wv
    acc = acc + b_ref[...]
    o_ref[0] = _apply_act(acc, activation).astype(o_ref.dtype)


def _se_gate_relu_kernel(y_ref, w1_ref, b1_ref, w2_ref, b2_ref, o_ref):
    # Fused SE: avg-pool -> FC1 + ReLU -> FC2 + sigmoid -> y * gate -> ReLU.
    y = y_ref[0].astype(jnp.float32)                            # (HW, C)
    pooled = jnp.mean(y, axis=0, keepdims=True)                 # (1, C)
    h = jnp.dot(pooled, w1_ref[...],
                preferred_element_type=jnp.float32) + b1_ref[...]
    h = jnp.maximum(h, 0.0)                                     # (1, mid)
    g = jnp.dot(h, w2_ref[...],
                preferred_element_type=jnp.float32) + b2_ref[...]
    g = 1.0 / (1.0 + jnp.exp(-g))                               # (1, C)
    o_ref[0] = jnp.maximum(y * g, 0.0).astype(o_ref.dtype)


# ----------------------------- kernel wrappers ------------------------------

def _phase_split(x, s, PH, PW):
    """Space-to-depth split: (N,Hp,Wp,C) -> (N, s*s, PH, PW, C), zero padded."""
    phases = []
    for py in range(s):
        for px in range(s):
            ph = x[:, py::s, px::s, :]
            ph = jnp.pad(ph, ((0, 0), (0, PH - ph.shape[1]),
                              (0, PW - ph.shape[2]), (0, 0)))
            phases.append(ph)
    return jnp.stack(phases, axis=1)


def conv_bias_act(x, w, b, k, s, p, activation="relu"):
    """Dense conv + bias + act. x:(N,H,W,Cin), w:(Cout,Cin,k,k), b:(Cout,)."""
    N, H, W, Cin = x.shape
    Cout = w.shape[0]
    x = x.astype(COMPUTE_DTYPE)
    if p > 0:
        x = jnp.pad(x, ((0, 0), (p, p), (p, p), (0, 0)))
    Hp, Wp = H + 2 * p, W + 2 * p
    Ho = (Hp - k) // s + 1
    Wo = (Wp - k) // s + 1
    # Pad the output width to a multiple of 8 so the in-kernel (Ho,Wo,Cin) ->
    # (Ho*Wo,Cin) collapse is a trivial vreg re-indexing.
    Wo_p = _round_up(Wo, 8)
    Wp_eff = max(Wp, (Wo_p - 1) * s + k)
    if Wp_eff > Wp:
        x = jnp.pad(x, ((0, 0), (0, 0), (0, Wp_eff - Wp), (0, 0)))
    PH, PW = -(-Hp // s), -(-Wp_eff // s)
    xp = _phase_split(x, s, PH, PW).reshape(N * s * s, PH, PW, Cin)

    # Lane-dense Cout tiles: 256 wide where possible (fills v6e/v7x MXU).
    Np = _round_up(Cout, LANE)
    tn = 256 if Np % 256 == 0 else LANE
    wm = jnp.transpose(w, (2, 3, 1, 0)).reshape(k * k, Cin, Cout)
    wm = jnp.pad(wm, ((0, 0), (0, 0), (0, Np - Cout))).astype(COMPUTE_DTYPE)
    bm = jnp.pad(b.astype(jnp.float32).reshape(1, Cout), ((0, 0), (0, Np - Cout)))

    out = pl.pallas_call(
        functools.partial(_conv_kernel, k=k, s=s, Ho=Ho, Wo=Wo_p,
                          activation=activation),
        out_shape=jax.ShapeDtypeStruct((N, Ho * Wo_p, Np), STORE_DTYPE),
        grid=(N, Np // tn),
        in_specs=[pl.BlockSpec((s * s, PH, PW, Cin), lambda n, j: (n, 0, 0, 0)),
                  pl.BlockSpec((k * k, Cin, tn), lambda n, j: (0, 0, j)),
                  pl.BlockSpec((1, tn), lambda n, j: (0, j))],
        out_specs=pl.BlockSpec((1, Ho * Wo_p, tn), lambda n, j: (n, 0, j)),
        compiler_params=pltpu.CompilerParams(
            dimension_semantics=("parallel", "parallel"),
            vmem_limit_bytes=_VMEM_LIMIT),
    )(xp, wm, bm)
    return out.reshape(N, Ho, Wo_p, Np)[:, :, :Wo, :Cout]


def depthwise_bias_act(x, w_dw, b, k, s, p, activation="relu"):
    """Depthwise conv + bias + act. x:(N,H,W,C), w_dw:(C,1,k,k), b:(C,)."""
    N, H, W, C = x.shape
    x = x.astype(COMPUTE_DTYPE)
    if p > 0:
        x = jnp.pad(x, ((0, 0), (p, p), (p, p), (0, 0)))
    Hp, Wp = H + 2 * p, W + 2 * p
    Ho = (Hp - k) // s + 1
    Wo = (Wp - k) // s + 1
    PH, PW = -(-Hp // s), -(-Wp // s)
    # Merge (W, C) -> lane-dense W*C: every tap is a contiguous slice and the
    # output's last dim is a multiple of 128 even when C < 128.
    xp = _phase_split(x, s, PH, PW).reshape(N * s * s, PH, PW * C)
    wt = jnp.transpose(w_dw[:, 0], (1, 2, 0)).reshape(k * k, C)
    wt = jnp.tile(wt, (1, Wo)).astype(jnp.float32)                 # (k*k, Wo*C)
    bt = jnp.tile(b.reshape(1, C), (1, Wo)).astype(jnp.float32)    # (1, Wo*C)

    out = pl.pallas_call(
        functools.partial(_depthwise_kernel, k=k, s=s, Ho=Ho, WoC=Wo * C, C=C,
                          activation=activation),
        out_shape=jax.ShapeDtypeStruct((N, Ho, Wo * C), STORE_DTYPE),
        grid=(N,),
        in_specs=[pl.BlockSpec((s * s, PH, PW * C), lambda n: (n, 0, 0)),
                  pl.BlockSpec((k * k, Wo * C), lambda n: (0, 0)),
                  pl.BlockSpec((1, Wo * C), lambda n: (0, 0))],
        out_specs=pl.BlockSpec((1, Ho, Wo * C), lambda n: (n, 0, 0)),
        compiler_params=pltpu.CompilerParams(
            dimension_semantics=("parallel",),
            vmem_limit_bytes=_VMEM_LIMIT),
    )(xp, wt, bt)
    return out.reshape(N, Ho, Wo, C)


def se_gate_relu(y, sp):
    """relu(y * sigmoid(FC2(relu(FC1(avgpool(y)))))) in one kernel."""
    N, H, W, C = y.shape
    mid = sp["w1"].shape[0]
    midp = _round_up(mid, 8)
    w1 = jnp.pad(sp["w1"].reshape(mid, C).T,
                 ((0, 0), (0, midp - mid))).astype(jnp.float32)      # (C, midp)
    b1 = jnp.pad(sp["b1"].reshape(1, mid),
                 ((0, 0), (0, midp - mid))).astype(jnp.float32)      # (1, midp)
    w2 = jnp.pad(sp["w2"].reshape(C, mid).T,
                 ((0, midp - mid), (0, 0))).astype(jnp.float32)      # (midp, C)
    b2 = sp["b2"].reshape(1, C).astype(jnp.float32)

    out = pl.pallas_call(
        _se_gate_relu_kernel,
        out_shape=jax.ShapeDtypeStruct((N, H * W, C), STORE_DTYPE),
        grid=(N,),
        in_specs=[pl.BlockSpec((1, H * W, C), lambda n: (n, 0, 0)),
                  pl.BlockSpec((C, midp), lambda n: (0, 0)),
                  pl.BlockSpec((1, midp), lambda n: (0, 0)),
                  pl.BlockSpec((midp, C), lambda n: (0, 0)),
                  pl.BlockSpec((1, C), lambda n: (0, 0))],
        out_specs=pl.BlockSpec((1, H * W, C), lambda n: (n, 0, 0)),
        compiler_params=pltpu.CompilerParams(
            dimension_semantics=("parallel",),
            vmem_limit_bytes=_VMEM_LIMIT),
    )(y.astype(COMPUTE_DTYPE).reshape(N, H * W, C), w1, b1, w2, b2)
    return out.reshape(N, H, W, C)


# ------------------------------- JAX glue -----------------------------------

def _bn_scale_shift(bn):
    scale = bn["gamma"] / jnp.sqrt(bn["var"] + EPS)
    shift = bn["beta"] - bn["mean"] * scale
    return scale, shift


def _fuse_conv_bn(cp):
    scale, shift = _bn_scale_shift(cp["bn"])
    return cp["w"] * scale[:, None, None, None], shift


def _identity_kernel_weight(in_ch, g, k):
    # Identity as a grouped-conv kernel (forward-correct within-group index
    # i % (in_ch // g); coincides with fuse() for g in {1, C}).
    cin_g = in_ch // g
    wid = np.zeros((in_ch, cin_g, k, k), np.float32)
    for i in range(in_ch):
        wid[i, i % cin_g, k // 2, k // 2] = 1.0
    return jnp.asarray(wid)


def _grouped_to_dense(w, g):
    """(Cout, Cin/g, k, k) grouped weight -> block-diagonal dense (Cout, Cin, k, k)."""
    Cout, cin_g, k, _ = w.shape
    cout_g = Cout // g
    blocks = []
    for gi in range(g):
        wg = w[gi * cout_g:(gi + 1) * cout_g]
        blocks.append(jnp.pad(
            wg, ((0, 0), (gi * cin_g, (g - 1 - gi) * cin_g), (0, 0), (0, 0))))
    return jnp.concatenate(blocks, axis=0)


def reparameterize_residual(rp):
    """Fold conv1 branches + 1x1 conv2 + identity BN into one conv (W, b).

    Equivalent to Residual.fuse() / the eval-mode forward sum y1 + y2 + y3.
    """
    k, s, p, g = rp["k"], rp["s"], rp["p"], rp["g"]
    w_sum, b_sum = None, None
    for cp in rp["conv1"]:
        w, b = _fuse_conv_bn(cp)
        w_sum = w if w_sum is None else w_sum + w
        b_sum = b if b_sum is None else b_sum + b
    if rp["conv2"] is not None:
        assert p == k // 2, "1x1-branch folding requires p == k//2"
        w2, b2 = _fuse_conv_bn(rp["conv2"])            # (Cout, Cin/g, 1, 1)
        w_sum = w_sum + jnp.pad(w2, ((0, 0), (0, 0), (p, p), (p, p)))
        b_sum = b_sum + b2
    if rp["identity"] is not None:
        assert p == k // 2 and s == 1
        in_ch = w_sum.shape[0]
        scale, shift = _bn_scale_shift(rp["identity"])
        w_sum = w_sum + _identity_kernel_weight(in_ch, g, k) * scale[:, None, None, None]
        b_sum = b_sum + shift
    return w_sum, b_sum


def residual_forward(x, rp):
    """One Residual block, NHWC in / NHWC out."""
    k, s, p, g = rp["k"], rp["s"], rp["p"], rp["g"]
    _, _, _, Cin = x.shape
    Cout = rp["conv1"][0]["w"].shape[0]
    w_f, b_f = reparameterize_residual(rp)
    # When SE is present the ReLU is fused into the SE/gate kernel instead.
    act = "none" if rp["se"] is not None else "relu"

    if g == Cin and Cout == Cin and g > 1:
        y = depthwise_bias_act(x, w_f, b_f, k, s, p, activation=act)
    else:
        if g > 1:
            # Pack all groups into one lane-dense direct conv via a
            # block-diagonal dense weight (no per-group lane padding).
            w_f = _grouped_to_dense(w_f, g)
        y = conv_bias_act(x, w_f, b_f, k, s, p, activation=act)

    if rp["se"] is not None:
        y = se_gate_relu(y, rp["se"])
    return y


# --------------------------- parameter construction --------------------------

class KeyGen:
    def __init__(self, seed):
        self._key = jax.random.PRNGKey(seed)

    def __call__(self):
        self._key, k = jax.random.split(self._key)
        return k


def make_bn(ch, kg):
    return {"gamma": jax.random.uniform(kg(), (ch,), jnp.float32, 0.5, 1.5),
            "beta": 0.1 * jax.random.normal(kg(), (ch,), jnp.float32),
            "mean": 0.1 * jax.random.normal(kg(), (ch,), jnp.float32),
            "var": jax.random.uniform(kg(), (ch,), jnp.float32, 0.5, 1.5)}


def make_conv(in_ch, out_ch, k, g, kg):
    return {"w": 0.1 * jax.random.normal(kg(), (out_ch, in_ch // g, k, k), jnp.float32),
            "bn": make_bn(out_ch, kg)}


def make_se(ch, kg):
    mid = ch // 16
    return {"w1": 0.1 * jax.random.normal(kg(), (mid, ch, 1, 1), jnp.float32),
            "b1": 0.1 * jax.random.normal(kg(), (mid,), jnp.float32),
            "w2": 0.1 * jax.random.normal(kg(), (ch, mid, 1, 1), jnp.float32),
            "b2": 0.1 * jax.random.normal(kg(), (ch,), jnp.float32)}


def make_residual(in_ch, out_ch, k, s, p, g, se, num_conv, kg):
    return {"k": k, "s": s, "p": p, "g": g,
            "conv1": [make_conv(in_ch, out_ch, k, g, kg) for _ in range(num_conv)],
            "conv2": make_conv(in_ch, out_ch, 1, g, kg) if k > 1 else None,
            "identity": make_bn(in_ch, kg) if (in_ch == out_ch and s == 1) else None,
            "se": make_se(out_ch, kg) if se else None}


# ---------------------------------- main ------------------------------------

if __name__ == "__main__":
    kg = KeyGen(1)
    # Chain exercising every path: dense stride-2 (+1x1 branch), depthwise
    # (+identity), depthwise stride-2, pointwise (+identity, +SE), grouped
    # (+identity).
    blocks = [
        make_residual(4, 32, k=3, s=2, p=1, g=1, se=False, num_conv=2, kg=kg),
        make_residual(32, 32, k=3, s=1, p=1, g=32, se=False, num_conv=2, kg=kg),
        make_residual(32, 32, k=3, s=2, p=1, g=32, se=False, num_conv=1, kg=kg),
        make_residual(32, 32, k=1, s=1, p=0, g=1, se=True, num_conv=2, kg=kg),
        make_residual(32, 32, k=3, s=1, p=1, g=4, se=False, num_conv=2, kg=kg),
    ]

    x = jax.random.normal(jax.random.PRNGKey(0), (2, 4, 16, 16), jnp.float32)  # NCHW

    @jax.jit
    def forward(x_nchw):
        h = jnp.transpose(x_nchw, (0, 2, 3, 1))                   # -> NHWC
        for rp in blocks:
            h = residual_forward(h, rp)
        return jnp.transpose(h, (0, 3, 1, 2)).astype(jnp.float32)  # -> NCHW

    out = jax.block_until_ready(forward(x))

    assert out.shape == (2, 32, 4, 4), out.shape
    assert bool(jnp.all(jnp.isfinite(out)))
    print("KERNEL_OK")
</pallas_src>

<mosaic_0001>
module attributes {stable_mosaic.version = 11 : i64} {
  func.func @_conv_kernel(%arg0: i32, %arg1: i32, %arg2: memref<4x9x9x4xbf16, #tpu.memory_space<vmem>>, %arg3: memref<9x4x128xbf16, #tpu.memory_space<vmem>>, %arg4: memref<1x128xf32, #tpu.memory_space<vmem>>, %arg5: memref<1x64x128xbf16, #tpu.memory_space<vmem>>) attributes {dimension_semantics = [#tpu.dimension_semantics<parallel>, #tpu.dimension_semantics<parallel>], iteration_bounds = array<i64: 2, 1>, scalar_prefetch = 0 : i64, scratch_operands = 0 : i64, tpu.core_type = #tpu.core_type<tc>, window_params = [{transform_indices = @transform_0, window_bounds = array<i64: 4, 9, 9, 4>}, {transform_indices = @transform_1, window_bounds = array<i64: 9, 4, 128>}, {transform_indices = @transform_2, window_bounds = array<i64: 1, 128>}, {transform_indices = @transform_3, window_bounds = array<i64: 1, 64, 128>}]} {
    %cst = arith.constant 0.000000e+00 : f32
    %0 = vector.broadcast %cst : f32 to vector<64x128xf32>
    %c0 = arith.constant 0 : index
    %c0_0 = arith.constant 0 : index
    %c0_1 = arith.constant 0 : index
    %c0_2 = arith.constant 0 : index
    %1 = vector.load %arg2[%c0, %c0_0, %c0_1, %c0_2] : memref<4x9x9x4xbf16, #tpu.memory_space<vmem>>, vector<1x8x8x4xbf16>
    %2 = vector.shape_cast %1 : vector<1x8x8x4xbf16> to vector<8x8x4xbf16>
    %3 = vector.shape_cast %2 : vector<8x8x4xbf16> to vector<64x4xbf16>
    %c0_3 = arith.constant 0 : index
    %c0_4 = arith.constant 0 : index
    %c0_5 = arith.constant 0 : index
    %4 = vector.load %arg3[%c0_3, %c0_4, %c0_5] : memref<9x4x128xbf16, #tpu.memory_space<vmem>>, vector<1x4x128xbf16>
    %5 = vector.shape_cast %4 : vector<1x4x128xbf16> to vector<4x128xbf16>
    %cst_6 = arith.constant dense<0.000000e+00> : vector<64x128xf32>
    %6 = tpu.matmul %3, %5, %cst_6 {dimension_numbers = #tpu.dot_dimension_numbers<[1], [0], [0], [1], [0, 0, 1, 1], [], []>} : vector<64x4xbf16>, vector<4x128xbf16>, vector<64x128xf32> -> vector<64x128xf32>
    %7 = arith.addf %0, %6 : vector<64x128xf32>
    %c1 = arith.constant 1 : index
    %c0_7 = arith.constant 0 : index
    %c0_8 = arith.constant 0 : index
    %c0_9 = arith.constant 0 : index
    %8 = vector.load %arg2[%c1, %c0_7, %c0_8, %c0_9] : memref<4x9x9x4xbf16, #tpu.memory_space<vmem>>, vector<1x8x8x4xbf16>
    %9 = vector.shape_cast %8 : vector<1x8x8x4xbf16> to vector<8x8x4xbf16>
    %10 = vector.shape_cast %9 : vector<8x8x4xbf16> to vector<64x4xbf16>
    %c1_10 = arith.constant 1 : index
    %c0_11 = arith.constant 0 : index
    %c0_12 = arith.constant 0 : index
    %11 = vector.load %arg3[%c1_10, %c0_11, %c0_12] : memref<9x4x128xbf16, #tpu.memory_space<vmem>>, vector<1x4x128xbf16>
    %12 = vector.shape_cast %11 : vector<1x4x128xbf16> to vector<4x128xbf16>
    %cst_13 = arith.constant dense<0.000000e+00> : vector<64x128xf32>
    %13 = tpu.matmul %10, %12, %cst_13 {dimension_numbers = #tpu.dot_dimension_numbers<[1], [0], [0], [1], [0, 0, 1, 1], [], []>} : vector<64x4xbf16>, vector<4x128xbf16>, vector<64x128xf32> -> vector<64x128xf32>
    %14 = arith.addf %7, %13 : vector<64x128xf32>
    %c0_14 = arith.constant 0 : index
    %c0_15 = arith.constant 0 : index
    %c1_16 = arith.constant 1 : index
    %c0_17 = arith.constant 0 : index
    %15 = vector.load %arg2[%c0_14, %c0_15, %c1_16, %c0_17] : memref<4x9x9x4xbf16, #tpu.memory_space<vmem>>, vector<1x8x8x4xbf16>
    %16 = vector.shape_cast %15 : vector<1x8x8x4xbf16> to vector<8x8x4xbf16>
    %17 = vector.shape_cast %16 : vector<8x8x4xbf16> to vector<64x4xbf16>
    %c2 = arith.constant 2 : index
    %c0_18 = arith.constant 0 : index
    %c0_19 = arith.constant 0 : index
    %18 = vector.load %arg3[%c2, %c0_18, %c0_19] : memref<9x4x128xbf16, #tpu.memory_space<vmem>>, vector<1x4x128xbf16>
    %19 = vector.shape_cast %18 : vector<1x4x128xbf16> to vector<4x128xbf16>
    %cst_20 = arith.constant dense<0.000000e+00> : vector<64x128xf32>
    %20 = tpu.matmul %17, %19, %cst_20 {dimension_numbers = #tpu.dot_dimension_numbers<[1], [0], [0], [1], [0, 0, 1, 1], [], []>} : vector<64x4xbf16>, vector<4x128xbf16>, vector<64x128xf32> -> vector<64x128xf32>
    %21 = arith.addf %14, %20 : vector<64x128xf32>
    %c2_21 = arith.constant 2 : index
    %c0_22 = arith.constant 0 : index
    %c0_23 = arith.constant 0 : index
    %c0_24 = arith.constant 0 : index
    %22 = vector.load %arg2[%c2_21, %c0_22, %c0_23, %c0_24] : memref<4x9x9x4xbf16, #tpu.memory_space<vmem>>, vector<1x8x8x4xbf16>
    %23 = vector.shape_cast %22 : vector<1x8x8x4xbf16> to vector<8x8x4xbf16>
    %24 = vector.shape_cast %23 : vector<8x8x4xbf16> to vector<64x4xbf16>
    %c3 = arith.constant 3 : index
    %c0_25 = arith.constant 0 : index
    %c0_26 = arith.constant 0 : index
    %25 = vector.load %arg3[%c3, %c0_25, %c0_26] : memref<9x4x128xbf16, #tpu.memory_space<vmem>>, vector<1x4x128xbf16>
    %26 = vector.shape_cast %25 : vector<1x4x128xbf16> to vector<4x128xbf16>
    %cst_27 = arith.constant dense<0.000000e+00> : vector<64x128xf32>
    %27 = tpu.matmul %24, %26, %cst_27 {dimension_numbers = #tpu.dot_dimension_numbers<[1], [0], [0], [1], [0, 0, 1, 1], [], []>} : vector<64x4xbf16>, vector<4x128xbf16>, vector<64x128xf32> -> vector<64x128xf32>
    %28 = arith.addf %21, %27 : vector<64x128xf32>
    %c3_28 = arith.constant 3 : index
    %c0_29 = arith.constant 0 : index
    %c0_30 = arith.constant 0 : index
    %c0_31 = arith.constant 0 : index
    %29 = vector.load %arg2[%c3_28, %c0_29, %c0_30, %c0_31] : memref<4x9x9x4xbf16, #tpu.memory_space<vmem>>, vector<1x8x8x4xbf16>
    %30 = vector.shape_cast %29 : vector<1x8x8x4xbf16> to vector<8x8x4xbf16>
    %31 = vector.shape_cast %30 : vector<8x8x4xbf16> to vector<64x4xbf16>
    %c4 = arith.constant 4 : index
    %c0_32 = arith.constant 0 : index
    %c0_33 = arith.constant 0 : index
    %32 = vector.load %arg3[%c4, %c0_32, %c0_33] : memref<9x4x128xbf16, #tpu.memory_space<vmem>>, vector<1x4x128xbf16>
    %33 = vector.shape_cast %32 : vector<1x4x128xbf16> to vector<4x128xbf16>
    %cst_34 = arith.constant dense<0.000000e+00> : vector<64x128xf32>
    %34 = tpu.matmul %31, %33, %cst_34 {dimension_numbers = #tpu.dot_dimension_numbers<[1], [0], [0], [1], [0, 0, 1, 1], [], []>} : vector<64x4xbf16>, vector<4x128xbf16>, vector<64x128xf32> -> vector<64x128xf32>
    %35 = arith.addf %28, %34 : vector<64x128xf32>
    %c2_35 = arith.constant 2 : index
    %c0_36 = arith.constant 0 : index
    %c1_37 = arith.constant 1 : index
    %c0_38 = arith.constant 0 : index
    %36 = vector.load %arg2[%c2_35, %c0_36, %c1_37, %c0_38] : memref<4x9x9x4xbf16, #tpu.memory_space<vmem>>, vector<1x8x8x4xbf16>
    %37 = vector.shape_cast %36 : vector<1x8x8x4xbf16> to vector<8x8x4xbf16>
    %38 = vector.shape_cast %37 : vector<8x8x4xbf16> to vector<64x4xbf16>
    %c5 = arith.constant 5 : index
    %c0_39 = arith.constant 0 : index
    %c0_40 = arith.constant 0 : index
    %39 = vector.load %arg3[%c5, %c0_39, %c0_40] : memref<9x4x128xbf16, #tpu.memory_space<vmem>>, vector<1x4x128xbf16>
    %40 = vector.shape_cast %39 : vector<1x4x128xbf16> to vector<4x128xbf16>
    %cst_41 = arith.constant dense<0.000000e+00> : vector<64x128xf32>
    %41 = tpu.matmul %38, %40, %cst_41 {dimension_numbers = #tpu.dot_dimension_numbers<[1], [0], [0], [1], [0, 0, 1, 1], [], []>} : vector<64x4xbf16>, vector<4x128xbf16>, vector<64x128xf32> -> vector<64x128xf32>
    %42 = arith.addf %35, %41 : vector<64x128xf32>
    %c0_42 = arith.constant 0 : index
    %c1_43 = arith.constant 1 : index
    %c0_44 = arith.constant 0 : index
    %c0_45 = arith.constant 0 : index
    %43 = vector.load %arg2[%c0_42, %c1_43, %c0_44, %c0_45] : memref<4x9x9x4xbf16, #tpu.memory_space<vmem>>, vector<1x8x8x4xbf16>
    %44 = vector.shape_cast %43 : vector<1x8x8x4xbf16> to vector<8x8x4xbf16>
    %45 = vector.shape_cast %44 : vector<8x8x4xbf16> to vector<64x4xbf16>
    %c6 = arith.constant 6 : index
    %c0_46 = arith.constant 0 : index
    %c0_47 = arith.constant 0 : index
    %46 = vector.load %arg3[%c6, %c0_46, %c0_47] : memref<9x4x128xbf16, #tpu.memory_space<vmem>>, vector<1x4x128xbf16>
    %47 = vector.shape_cast %46 : vector<1x4x128xbf16> to vector<4x128xbf16>
    %cst_48 = arith.constant dense<0.000000e+00> : vector<64x128xf32>
    %48 = tpu.matmul %45, %47, %cst_48 {dimension_numbers = #tpu.dot_dimension_numbers<[1], [0], [0], [1], [0, 0, 1, 1], [], []>} : vector<64x4xbf16>, vector<4x128xbf16>, vector<64x128xf32> -> vector<64x128xf32>
    %49 = arith.addf %42, %48 : vector<64x128xf32>
    %c1_49 = arith.constant 1 : index
    %c1_50 = arith.constant 1 : index
    %c0_51 = arith.constant 0 : index
    %c0_52 = arith.constant 0 : index
    %50 = vector.load %arg2[%c1_49, %c1_50, %c0_51, %c0_52] : memref<4x9x9x4xbf16, #tpu.memory_space<vmem>>, vector<1x8x8x4xbf16>
    %51 = vector.shape_cast %50 : vector<1x8x8x4xbf16> to vector<8x8x4xbf16>
    %52 = vector.shape_cast %51 : vector<8x8x4xbf16> to vector<64x4xbf16>
    %c7 = arith.constant 7 : index
    %c0_53 = arith.constant 0 : index
    %c0_54 = arith.constant 0 : index
    %53 = vector.load %arg3[%c7, %c0_53, %c0_54] : memref<9x4x128xbf16, #tpu.memory_space<vmem>>, vector<1x4x128xbf16>
    %54 = vector.shape_cast %53 : vector<1x4x128xbf16> to vector<4x128xbf16>
    %cst_55 = arith.constant dense<0.000000e+00> : vector<64x128xf32>
    %55 = tpu.matmul %52, %54, %cst_55 {dimension_numbers = #tpu.dot_dimension_numbers<[1], [0], [0], [1], [0, 0, 1, 1], [], []>} : vector<64x4xbf16>, vector<4x128xbf16>, vector<64x128xf32> -> vector<64x128xf32>
    %56 = arith.addf %49, %55 : vector<64x128xf32>
    %c0_56 = arith.constant 0 : index
    %c1_57 = arith.constant 1 : index
    %c1_58 = arith.constant 1 : index
    %c0_59 = arith.constant 0 : index
    %57 = vector.load %arg2[%c0_56, %c1_57, %c1_58, %c0_59] : memref<4x9x9x4xbf16, #tpu.memory_space<vmem>>, vector<1x8x8x4xbf16>
    %58 = vector.shape_cast %57 : vector<1x8x8x4xbf16> to vector<8x8x4xbf16>
    %59 = vector.shape_cast %58 : vector<8x8x4xbf16> to vector<64x4xbf16>
    %c8 = arith.constant 8 : index
    %c0_60 = arith.constant 0 : index
    %c0_61 = arith.constant 0 : index
    %60 = vector.load %arg3[%c8, %c0_60, %c0_61] : memref<9x4x128xbf16, #tpu.memory_space<vmem>>, vector<1x4x128xbf16>
    %61 = vector.shape_cast %60 : vector<1x4x128xbf16> to vector<4x128xbf16>
    %cst_62 = arith.constant dense<0.000000e+00> : vector<64x128xf32>
    %62 = tpu.matmul %59, %61, %cst_62 {dimension_numbers = #tpu.dot_dimension_numbers<[1], [0], [0], [1], [0, 0, 1, 1], [], []>} : vector<64x4xbf16>, vector<4x128xbf16>, vector<64x128xf32> -> vector<64x128xf32>
    %63 = arith.addf %56, %62 : vector<64x128xf32>
    %c0_63 = arith.constant 0 : index
    %c0_64 = arith.constant 0 : index
    %64 = vector.load %arg4[%c0_63, %c0_64] : memref<1x128xf32, #tpu.memory_space<vmem>>, vector<1x128xf32>
    %65 = vector.broadcast %64 : vector<1x128xf32> to vector<64x128xf32>
    %66 = arith.addf %63, %65 : vector<64x128xf32>
    %cst_65 = arith.constant 0.000000e+00 : f32
    %67 = vector.broadcast %cst_65 : f32 to vector<64x128xf32>
    %68 = arith.maximumf %66, %67 : vector<64x128xf32>
    %69 = arith.truncf %68 : vector<64x128xf32> to vector<64x128xbf16>
    %c0_66 = arith.constant 0 : index
    %c0_67 = arith.constant 0 : index
    %c0_68 = arith.constant 0 : index
    %70 = vector.load %arg5[%c0_66, %c0_67, %c0_68] : memref<1x64x128xbf16, #tpu.memory_space<vmem>>, vector<1x64x128xbf16>
    %71 = vector.shape_cast %70 : vector<1x64x128xbf16> to vector<64x128xbf16>
    %72 = vector.shape_cast %69 : vector<64x128xbf16> to vector<1x64x128xbf16>
    tpu.vector_store %arg5[%c0_66, %c0_67, %c0_68], %72 {strides = array<i32>} : memref<1x64x128xbf16, #tpu.memory_space<vmem>>, vector<1x64x128xbf16>,
    return
  }
  func.func @transform_0(%arg0: i32, %arg1: i32) -> (i32, i32, i32, i32) {
    %c0_i32 = arith.constant 0 : i32
    %c0_i32_0 = arith.constant 0 : i32
    %c0_i32_1 = arith.constant 0 : i32
    %c0_i32_2 = arith.constant 0 : i32
    return %arg0, %c0_i32, %c0_i32_0, %c0_i32_1 : i32, i32, i32, i32
  }
  func.func @transform_1(%arg0: i32, %arg1: i32) -> (i32, i32, i32) {
    %c0_i32 = arith.constant 0 : i32
    %c0_i32_0 = arith.constant 0 : i32
    %c0_i32_1 = arith.constant 0 : i32
    return %c0_i32, %c0_i32_0, %arg1 : i32, i32, i32
  }
  func.func @transform_2(%arg0: i32, %arg1: i32) -> (i32, i32) {
    %c0_i32 = arith.constant 0 : i32
    %c0_i32_0 = arith.constant 0 : i32
    return %c0_i32, %arg1 : i32, i32
  }
  func.func @transform_3(%arg0: i32, %arg1: i32) -> (i32, i32, i32) {
    %c0_i32 = arith.constant 0 : i32
    %c0_i32_0 = arith.constant 0 : i32
    return %arg0, %c0_i32, %arg1 : i32, i32, i32
  }
}

module attributes {stable_mosaic.version = 11 : i64} {
  func.func @_depthwise_kernel(%arg0: i32, %arg1: memref<1x10x320xbf16, #tpu.memory_space<vmem>>, %arg2: memref<9x256xf32, #tpu.memory_space<vmem>>, %arg3: memref<1x256xf32, #tpu.memory_space<vmem>>, %arg4: memref<1x8x256xbf16, #tpu.memory_space<vmem>>) attributes {dimension_semantics = [#tpu.dimension_semantics<parallel>], iteration_bounds = array<i64: 2>, scalar_prefetch = 0 : i64, scratch_operands = 0 : i64, tpu.core_type = #tpu.core_type<tc>, window_params = [{transform_indices = @transform_0, window_bounds = array<i64: 1, 10, 320>}, {pipeline_mode = #tpu.pipeline_mode<synchronous>, transform_indices = @transform_1, window_bounds = array<i64: 9, 256>}, {pipeline_mode = #tpu.pipeline_mode<synchronous>, transform_indices = @transform_2, window_bounds = array<i64: 1, 256>}, {transform_indices = @transform_3, window_bounds = array<i64: 1, 8, 256>}]} {
    %cst = arith.constant 0.000000e+00 : f32
    %0 = vector.broadcast %cst : f32 to vector<8x256xf32>
    %c0 = arith.constant 0 : index
    %c0_0 = arith.constant 0 : index
    %c0_1 = arith.constant 0 : index
    %1 = vector.load %arg1[%c0, %c0_0, %c0_1] : memref<1x10x320xbf16, #tpu.memory_space<vmem>>, vector<1x8x256xbf16>
    %2 = vector.shape_cast %1 : vector<1x8x256xbf16> to vector<8x256xbf16>
    %c0_2 = arith.constant 0 : index
    %c0_3 = arith.constant 0 : index
    %3 = vector.load %arg2[%c0_2, %c0_3] : memref<9x256xf32, #tpu.memory_space<vmem>>, vector<1x256xf32>
    %4 = arith.extf %2 : vector<8x256xbf16> to vector<8x256xf32>
    %5 = vector.broadcast %3 : vector<1x256xf32> to vector<8x256xf32>
    %6 = arith.mulf %4, %5 : vector<8x256xf32>
    %7 = arith.addf %0, %6 : vector<8x256xf32>
    %c0_4 = arith.constant 0 : index
    %c0_5 = arith.constant 0 : index
    %c32 = arith.constant 32 : index
    %8 = vector.load %arg1[%c0_4, %c0_5, %c32] : memref<1x10x320xbf16, #tpu.memory_space<vmem>>, vector<1x8x256xbf16>
    %9 = vector.shape_cast %8 : vector<1x8x256xbf16> to vector<8x256xbf16>
    %c1 = arith.constant 1 : index
    %c0_6 = arith.constant 0 : index
    %10 = vector.load %arg2[%c1, %c0_6] : memref<9x256xf32, #tpu.memory_space<vmem>>, vector<1x256xf32>
    %11 = arith.extf %9 : vector<8x256xbf16> to vector<8x256xf32>
    %12 = vector.broadcast %10 : vector<1x256xf32> to vector<8x256xf32>
    %13 = arith.mulf %11, %12 : vector<8x256xf32>
    %14 = arith.addf %7, %13 : vector<8x256xf32>
    %c0_7 = arith.constant 0 : index
    %c0_8 = arith.constant 0 : index
    %c64 = arith.constant 64 : index
    %15 = vector.load %arg1[%c0_7, %c0_8, %c64] : memref<1x10x320xbf16, #tpu.memory_space<vmem>>, vector<1x8x256xbf16>
    %16 = vector.shape_cast %15 : vector<1x8x256xbf16> to vector<8x256xbf16>
    %c2 = arith.constant 2 : index
    %c0_9 = arith.constant 0 : index
    %17 = vector.load %arg2[%c2, %c0_9] : memref<9x256xf32, #tpu.memory_space<vmem>>, vector<1x256xf32>
    %18 = arith.extf %16 : vector<8x256xbf16> to vector<8x256xf32>
    %19 = vector.broadcast %17 : vector<1x256xf32> to vector<8x256xf32>
    %20 = arith.mulf %18, %19 : vector<8x256xf32>
    %21 = arith.addf %14, %20 : vector<8x256xf32>
    %c0_10 = arith.constant 0 : index
    %c1_11 = arith.constant 1 : index
    %c0_12 = arith.constant 0 : index
    %22 = vector.load %arg1[%c0_10, %c1_11, %c0_12] : memref<1x10x320xbf16, #tpu.memory_space<vmem>>, vector<1x8x256xbf16>
    %23 = vector.shape_cast %22 : vector<1x8x256xbf16> to vector<8x256xbf16>
    %c3 = arith.constant 3 : index
    %c0_13 = arith.constant 0 : index
    %24 = vector.load %arg2[%c3, %c0_13] : memref<9x256xf32, #tpu.memory_space<vmem>>, vector<1x256xf32>
    %25 = arith.extf %23 : vector<8x256xbf16> to vector<8x256xf32>
    %26 = vector.broadcast %24 : vector<1x256xf32> to vector<8x256xf32>
    %27 = arith.mulf %25, %26 : vector<8x256xf32>
    %28 = arith.addf %21, %27 : vector<8x256xf32>
    %c0_14 = arith.constant 0 : index
    %c1_15 = arith.constant 1 : index
    %c32_16 = arith.constant 32 : index
    %29 = vector.load %arg1[%c0_14, %c1_15, %c32_16] : memref<1x10x320xbf16, #tpu.memory_space<vmem>>, vector<1x8x256xbf16>
    %30 = vector.shape_cast %29 : vector<1x8x256xbf16> to vector<8x256xbf16>
    %c4 = arith.constant 4 : index
    %c0_17 = arith.constant 0 : index
    %31 = vector.load %arg2[%c4, %c0_17] : memref<9x256xf32, #tpu.memory_space<vmem>>, vector<1x256xf32>
    %32 = arith.extf %30 : vector<8x256xbf16> to vector<8x256xf32>
    %33 = vector.broadcast %31 : vector<1x256xf32> to vector<8x256xf32>
    %34 = arith.mulf %32, %33 : vector<8x256xf32>
    %35 = arith.addf %28, %34 : vector<8x256xf32>
    %c0_18 = arith.constant 0 : index
    %c1_19 = arith.constant 1 : index
    %c64_20 = arith.constant 64 : index
    %36 = vector.load %arg1[%c0_18, %c1_19, %c64_20] : memref<1x10x320xbf16, #tpu.memory_space<vmem>>, vector<1x8x256xbf16>
    %37 = vector.shape_cast %36 : vector<1x8x256xbf16> to vector<8x256xbf16>
    %c5 = arith.constant 5 : index
    %c0_21 = arith.constant 0 : index
    %38 = vector.load %arg2[%c5, %c0_21] : memref<9x256xf32, #tpu.memory_space<vmem>>, vector<1x256xf32>
    %39 = arith.extf %37 : vector<8x256xbf16> to vector<8x256xf32>
    %40 = vector.broadcast %38 : vector<1x256xf32> to vector<8x256xf32>
    %41 = arith.mulf %39, %40 : vector<8x256xf32>
    %42 = arith.addf %35, %41 : vector<8x256xf32>
    %c0_22 = arith.constant 0 : index
    %c2_23 = arith.constant 2 : index
    %c0_24 = arith.constant 0 : index
    %43 = vector.load %arg1[%c0_22, %c2_23, %c0_24] : memref<1x10x320xbf16, #tpu.memory_space<vmem>>, vector<1x8x256xbf16>
    %44 = vector.shape_cast %43 : vector<1x8x256xbf16> to vector<8x256xbf16>
    %c6 = arith.constant 6 : index
    %c0_25 = arith.constant 0 : index
    %45 = vector.load %arg2[%c6, %c0_25] : memref<9x256xf32, #tpu.memory_space<vmem>>, vector<1x256xf32>
    %46 = arith.extf %44 : vector<8x256xbf16> to vector<8x256xf32>
    %47 = vector.broadcast %45 : vector<1x256xf32> to vector<8x256xf32>
    %48 = arith.mulf %46, %47 : vector<8x256xf32>
    %49 = arith.addf %42, %48 : vector<8x256xf32>
    %c0_26 = arith.constant 0 : index
    %c2_27 = arith.constant 2 : index
    %c32_28 = arith.constant 32 : index
    %50 = vector.load %arg1[%c0_26, %c2_27, %c32_28] : memref<1x10x320xbf16, #tpu.memory_space<vmem>>, vector<1x8x256xbf16>
    %51 = vector.shape_cast %50 : vector<1x8x256xbf16> to vector<8x256xbf16>
    %c7 = arith.constant 7 : index
    %c0_29 = arith.constant 0 : index
    %52 = vector.load %arg2[%c7, %c0_29] : memref<9x256xf32, #tpu.memory_space<vmem>>, vector<1x256xf32>
    %53 = arith.extf %51 : vector<8x256xbf16> to vector<8x256xf32>
    %54 = vector.broadcast %52 : vector<1x256xf32> to vector<8x256xf32>
    %55 = arith.mulf %53, %54 : vector<8x256xf32>
    %56 = arith.addf %49, %55 : vector<8x256xf32>
    %c0_30 = arith.constant 0 : index
    %c2_31 = arith.constant 2 : index
    %c64_32 = arith.constant 64 : index
    %57 = vector.load %arg1[%c0_30, %c2_31, %c64_32] : memref<1x10x320xbf16, #tpu.memory_space<vmem>>, vector<1x8x256xbf16>
    %58 = vector.shape_cast %57 : vector<1x8x256xbf16> to vector<8x256xbf16>
    %c8 = arith.constant 8 : index
    %c0_33 = arith.constant 0 : index
    %59 = vector.load %arg2[%c8, %c0_33] : memref<9x256xf32, #tpu.memory_space<vmem>>, vector<1x256xf32>
    %60 = arith.extf %58 : vector<8x256xbf16> to vector<8x256xf32>
    %61 = vector.broadcast %59 : vector<1x256xf32> to vector<8x256xf32>
    %62 = arith.mulf %60, %61 : vector<8x256xf32>
    %63 = arith.addf %56, %62 : vector<8x256xf32>
    %c0_34 = arith.constant 0 : index
    %c0_35 = arith.constant 0 : index
    %64 = vector.load %arg3[%c0_34, %c0_35] : memref<1x256xf32, #tpu.memory_space<vmem>>, vector<1x256xf32>
    %65 = vector.broadcast %64 : vector<1x256xf32> to vector<8x256xf32>
    %66 = arith.addf %63, %65 : vector<8x256xf32>
    %cst_36 = arith.constant 0.000000e+00 : f32
    %67 = vector.broadcast %cst_36 : f32 to vector<8x256xf32>
    %68 = arith.maximumf %66, %67 : vector<8x256xf32>
    %69 = arith.truncf %68 : vector<8x256xf32> to vector<8x256xbf16>
    %c0_37 = arith.constant 0 : index
    %c0_38 = arith.constant 0 : index
    %c0_39 = arith.constant 0 : index
    %70 = vector.load %arg4[%c0_37, %c0_38, %c0_39] : memref<1x8x256xbf16, #tpu.memory_space<vmem>>, vector<1x8x256xbf16>
    %71 = vector.shape_cast %70 : vector<1x8x256xbf16> to vector<8x256xbf16>
    %72 = vector.shape_cast %69 : vector<8x256xbf16> to vector<1x8x256xbf16>
    tpu.vector_store %arg4[%c0_37, %c0_38, %c0_39], %72 {strides = array<i32>} : memref<1x8x256xbf16, #tpu.memory_space<vmem>>, vector<1x8x256xbf16>,
    return
  }
  func.func @transform_0(%arg0: i32) -> (i32, i32, i32) {
    %c0_i32 = arith.constant 0 : i32
    %c0_i32_0 = arith.constant 0 : i32
    %c0_i32_1 = arith.constant 0 : i32
    return %arg0, %c0_i32, %c0_i32_0 : i32, i32, i32
  }
  func.func @transform_1(%arg0: i32) -> (i32, i32) {
    %c0_i32 = arith.constant 0 : i32
    %c0_i32_0 = arith.constant 0 : i32
    %c0_i32_1 = arith.constant 0 : i32
    return %c0_i32, %c0_i32_0 : i32, i32
  }
  func.func @transform_2(%arg0: i32) -> (i32, i32) {
    %c0_i32 = arith.constant 0 : i32
    %c0_i32_0 = arith.constant 0 : i32
    %c0_i32_1 = arith.constant 0 : i32
    return %c0_i32, %c0_i32_0 : i32, i32
  }
  func.func @transform_3(%arg0: i32) -> (i32, i32, i32) {
    %c0_i32 = arith.constant 0 : i32
    %c0_i32_0 = arith.constant 0 : i32
    %c0_i32_1 = arith.constant 0 : i32
    return %arg0, %c0_i32, %c0_i32_0 : i32, i32, i32
  }
}

module attributes {stable_mosaic.version = 11 : i64} {
  func.func @_conv_kernel(%arg0: i32, %arg1: i32, %arg2: memref<1x4x8x32xbf16, #tpu.memory_space<vmem>>, %arg3: memref<1x32x128xbf16, #tpu.memory_space<vmem>>, %arg4: memref<1x128xf32, #tpu.memory_space<vmem>>, %arg5: memref<1x32x128xbf16, #tpu.memory_space<vmem>>) attributes {dimension_semantics = [#tpu.dimension_semantics<parallel>, #tpu.dimension_semantics<parallel>], iteration_bounds = array<i64: 2, 1>, scalar_prefetch = 0 : i64, scratch_operands = 0 : i64, tpu.core_type = #tpu.core_type<tc>, window_params = [{transform_indices = @transform_0, window_bounds = array<i64: 1, 4, 8, 32>}, {transform_indices = @transform_1, window_bounds = array<i64: 1, 32, 128>}, {transform_indices = @transform_2, window_bounds = array<i64: 1, 128>}, {transform_indices = @transform_3, window_bounds = array<i64: 1, 32, 128>}]} {
    %cst = arith.constant 0.000000e+00 : f32
    %0 = vector.broadcast %cst : f32 to vector<32x128xf32>
    %c0 = arith.constant 0 : index
    %c0_0 = arith.constant 0 : index
    %c0_1 = arith.constant 0 : index
    %c0_2 = arith.constant 0 : index
    %1 = vector.load %arg2[%c0, %c0_0, %c0_1, %c0_2] : memref<1x4x8x32xbf16, #tpu.memory_space<vmem>>, vector<1x4x8x32xbf16>
    %2 = vector.shape_cast %1 : vector<1x4x8x32xbf16> to vector<4x8x32xbf16>
    %3 = vector.shape_cast %2 : vector<4x8x32xbf16> to vector<32x32xbf16>
    %c0_3 = arith.constant 0 : index
    %c0_4 = arith.constant 0 : index
    %c0_5 = arith.constant 0 : index
    %4 = vector.load %arg3[%c0_3, %c0_4, %c0_5] : memref<1x32x128xbf16, #tpu.memory_space<vmem>>, vector<1x32x128xbf16>
    %5 = vector.shape_cast %4 : vector<1x32x128xbf16> to vector<32x128xbf16>
    %cst_6 = arith.constant dense<0.000000e+00> : vector<32x128xf32>
    %6 = tpu.matmul %3, %5, %cst_6 {dimension_numbers = #tpu.dot_dimension_numbers<[1], [0], [0], [1], [0, 0, 1, 1], [], []>} : vector<32x32xbf16>, vector<32x128xbf16>, vector<32x128xf32> -> vector<32x128xf32>
    %7 = arith.addf %0, %6 : vector<32x128xf32>
    %c0_7 = arith.constant 0 : index
    %c0_8 = arith.constant 0 : index
    %8 = vector.load %arg4[%c0_7, %c0_8] : memref<1x128xf32, #tpu.memory_space<vmem>>, vector<1x128xf32>
    %9 = vector.broadcast %8 : vector<1x128xf32> to vector<32x128xf32>
    %10 = arith.addf %7, %9 : vector<32x128xf32>
    %11 = arith.truncf %10 : vector<32x128xf32> to vector<32x128xbf16>
    %c0_9 = arith.constant 0 : index
    %c0_10 = arith.constant 0 : index
    %c0_11 = arith.constant 0 : index
    %12 = vector.load %arg5[%c0_9, %c0_10, %c0_11] : memref<1x32x128xbf16, #tpu.memory_space<vmem>>, vector<1x32x128xbf16>
    %13 = vector.shape_cast %12 : vector<1x32x128xbf16> to vector<32x128xbf16>
    %14 = vector.shape_cast %11 : vector<32x128xbf16> to vector<1x32x128xbf16>
    tpu.vector_store %arg5[%c0_9, %c0_10, %c0_11], %14 {strides = array<i32>} : memref<1x32x128xbf16, #tpu.memory_space<vmem>>, vector<1x32x128xbf16>,
    return
  }
  func.func @transform_0(%arg0: i32, %arg1: i32) -> (i32, i32, i32, i32) {
    %c0_i32 = arith.constant 0 : i32
    %c0_i32_0 = arith.constant 0 : i32
    %c0_i32_1 = arith.constant 0 : i32
    %c0_i32_2 = arith.constant 0 : i32
    return %arg0, %c0_i32, %c0_i32_0, %c0_i32_1 : i32, i32, i32, i32
  }
  func.func @transform_1(%arg0: i32, %arg1: i32) -> (i32, i32, i32) {
    %c0_i32 = arith.constant 0 : i32
    %c0_i32_0 = arith.constant 0 : i32
    %c0_i32_1 = arith.constant 0 : i32
    return %c0_i32, %c0_i32_0, %arg1 : i32, i32, i32
  }
  func.func @transform_2(%arg0: i32, %arg1: i32) -> (i32, i32) {
    %c0_i32 = arith.constant 0 : i32
    %c0_i32_0 = arith.constant 0 : i32
    return %c0_i32, %arg1 : i32, i32
  }
  func.func @transform_3(%arg0: i32, %arg1: i32) -> (i32, i32, i32) {
    %c0_i32 = arith.constant 0 : i32
    %c0_i32_0 = arith.constant 0 : i32
    return %arg0, %c0_i32, %arg1 : i32, i32, i32
  }
}

module attributes {stable_mosaic.version = 11 : i64} {
  func.func @_se_gate_relu_kernel(%arg0: i32, %arg1: memref<1x16x32xbf16, #tpu.memory_space<vmem>>, %arg2: memref<32x8xf32, #tpu.memory_space<vmem>>, %arg3: memref<1x8xf32, #tpu.memory_space<vmem>>, %arg4: memref<8x32xf32, #tpu.memory_space<vmem>>, %arg5: memref<1x32xf32, #tpu.memory_space<vmem>>, %arg6: memref<1x16x32xbf16, #tpu.memory_space<vmem>>) attributes {dimension_semantics = [#tpu.dimension_semantics<parallel>], iteration_bounds = array<i64: 2>, scalar_prefetch = 0 : i64, scratch_operands = 0 : i64, tpu.core_type = #tpu.core_type<tc>, window_params = [{transform_indices = @transform_0, window_bounds = array<i64: 1, 16, 32>}, {pipeline_mode = #tpu.pipeline_mode<synchronous>, transform_indices = @transform_1, window_bounds = array<i64: 32, 8>}, {pipeline_mode = #tpu.pipeline_mode<synchronous>, transform_indices = @transform_2, window_bounds = array<i64: 1, 8>}, {pipeline_mode = #tpu.pipeline_mode<synchronous>, transform_indices = @transform_3, window_bounds = array<i64: 8, 32>}, {pipeline_mode = #tpu.pipeline_mode<synchronous>, transform_indices = @transform_4, window_bounds = array<i64: 1, 32>}, {transform_indices = @transform_5, window_bounds = array<i64: 1, 16, 32>}]} {
    %c0 = arith.constant 0 : index
    %c0_0 = arith.constant 0 : index
    %c0_1 = arith.constant 0 : index
    %0 = vector.load %arg1[%c0, %c0_0, %c0_1] : memref<1x16x32xbf16, #tpu.memory_space<vmem>>, vector<1x16x32xbf16>
    %1 = vector.shape_cast %0 : vector<1x16x32xbf16> to vector<16x32xbf16>
    %2 = arith.extf %1 : vector<16x32xbf16> to vector<16x32xf32>
    %cst = arith.constant dense<0.000000e+00> : vector<32xf32>
    %3 = vector.multi_reduction <add>, %2, %cst [0] : vector<16x32xf32> to vector<32xf32>
    %4 = vector.shape_cast %3 : vector<32xf32> to vector<1x32xf32>
    %cst_2 = arith.constant 1.600000e+01 : f32
    %5 = vector.broadcast %cst_2 : f32 to vector<1x32xf32>
    %6 = arith.divf %4, %5 : vector<1x32xf32>
    %c0_3 = arith.constant 0 : index
    %c0_4 = arith.constant 0 : index
    %7 = vector.load %arg2[%c0_3, %c0_4] : memref<32x8xf32, #tpu.memory_space<vmem>>, vector<32x8xf32>
    %cst_5 = arith.constant dense<0.000000e+00> : vector<1x8xf32>
    %8 = tpu.matmul %6, %7, %cst_5 {dimension_numbers = #tpu.dot_dimension_numbers<[1], [0], [0], [1], [0, 0, 1, 1], [], []>} : vector<1x32xf32>, vector<32x8xf32>, vector<1x8xf32> -> vector<1x8xf32>
    %c0_6 = arith.constant 0 : index
    %c0_7 = arith.constant 0 : index
    %9 = vector.load %arg3[%c0_6, %c0_7] : memref<1x8xf32, #tpu.memory_space<vmem>>, vector<1x8xf32>
    %10 = arith.addf %8, %9 : vector<1x8xf32>
    %cst_8 = arith.constant 0.000000e+00 : f32
    %11 = vector.broadcast %cst_8 : f32 to vector<1x8xf32>
    %12 = arith.maximumf %10, %11 : vector<1x8xf32>
    %c0_9 = arith.constant 0 : index
    %c0_10 = arith.constant 0 : index
    %13 = vector.load %arg4[%c0_9, %c0_10] : memref<8x32xf32, #tpu.memory_space<vmem>>, vector<8x32xf32>
    %cst_11 = arith.constant dense<0.000000e+00> : vector<1x32xf32>
    %14 = tpu.matmul %12, %13, %cst_11 {dimension_numbers = #tpu.dot_dimension_numbers<[1], [0], [0], [1], [0, 0, 1, 1], [], []>} : vector<1x8xf32>, vector<8x32xf32>, vector<1x32xf32> -> vector<1x32xf32>
    %c0_12 = arith.constant 0 : index
    %c0_13 = arith.constant 0 : index
    %15 = vector.load %arg5[%c0_12, %c0_13] : memref<1x32xf32, #tpu.memory_space<vmem>>, vector<1x32xf32>
    %16 = arith.addf %14, %15 : vector<1x32xf32>
    %cst_14 = arith.constant 0.000000e+00 : f32
    %17 = vector.broadcast %cst_14 : f32 to vector<1x32xf32>
    %18 = arith.subf %17, %16 : vector<1x32xf32>
    %19 = math.exp %18 : vector<1x32xf32>
    %cst_15 = arith.constant 1.000000e+00 : f32
    %20 = vector.broadcast %cst_15 : f32 to vector<1x32xf32>
    %21 = arith.addf %20, %19 : vector<1x32xf32>
    %cst_16 = arith.constant 1.000000e+00 : f32
    %22 = vector.broadcast %cst_16 : f32 to vector<1x32xf32>
    %23 = arith.divf %22, %21 : vector<1x32xf32>
    %24 = vector.broadcast %23 : vector<1x32xf32> to vector<16x32xf32>
    %25 = arith.mulf %2, %24 : vector<16x32xf32>
    %cst_17 = arith.constant 0.000000e+00 : f32
    %26 = vector.broadcast %cst_17 : f32 to vector<16x32xf32>
    %27 = arith.maximumf %25, %26 : vector<16x32xf32>
    %28 = arith.truncf %27 : vector<16x32xf32> to vector<16x32xbf16>
    %c0_18 = arith.constant 0 : index
    %c0_19 = arith.constant 0 : index
    %c0_20 = arith.constant 0 : index
    %29 = vector.load %arg6[%c0_18, %c0_19, %c0_20] : memref<1x16x32xbf16, #tpu.memory_space<vmem>>, vector<1x16x32xbf16>
    %30 = vector.shape_cast %29 : vector<1x16x32xbf16> to vector<16x32xbf16>
    %31 = vector.shape_cast %28 : vector<16x32xbf16> to vector<1x16x32xbf16>
    tpu.vector_store %arg6[%c0_18, %c0_19, %c0_20], %31 {strides = array<i32>} : memref<1x16x32xbf16, #tpu.memory_space<vmem>>, vector<1x16x32xbf16>,
    return
  }
  func.func @transform_0(%arg0: i32) -> (i32, i32, i32) {
    %c0_i32 = arith.constant 0 : i32
    %c0_i32_0 = arith.constant 0 : i32
    %c0_i32_1 = arith.constant 0 : i32
    return %arg0, %c0_i32, %c0_i32_0 : i32, i32, i32
  }
  func.func @transform_1(%arg0: i32) -> (i32, i32) {
    %c0_i32 = arith.constant 0 : i32
    %c0_i32_0 = arith.constant 0 : i32
    %c0_i32_1 = arith.constant 0 : i32
    return %c0_i32, %c0_i32_0 : i32, i32
  }
  func.func @transform_2(%arg0: i32) -> (i32, i32) {
    %c0_i32 = arith.constant 0 : i32
    %c0_i32_0 = arith.constant 0 : i32
    %c0_i32_1 = arith.constant 0 : i32
    return %c0_i32, %c0_i32_0 : i32, i32
  }
  func.func @transform_3(%arg0: i32) -> (i32, i32) {
    %c0_i32 = arith.constant 0 : i32
    %c0_i32_0 = arith.constant 0 : i32
    %c0_i32_1 = arith.constant 0 : i32
    return %c0_i32, %c0_i32_0 : i32, i32
  }
  func.func @transform_4(%arg0: i32) -> (i32, i32) {
    %c0_i32 = arith.constant 0 : i32
    %c0_i32_0 = arith.constant 0 : i32
    %c0_i32_1 = arith.constant 0 : i32
    return %c0_i32, %c0_i32_0 : i32, i32
  }
  func.func @transform_5(%arg0: i32) -> (i32, i32, i32) {
    %c0_i32 = arith.constant 0 : i32
    %c0_i32_0 = arith.constant 0 : i32
    %c0_i32_1 = arith.constant 0 : i32
    return %arg0, %c0_i32, %c0_i32_0 : i32, i32, i32
  }
}

module attributes {stable_mosaic.version = 11 : i64} {
  func.func @_depthwise_kernel(%arg0: i32, %arg1: memref<4x5x160xbf16, #tpu.memory_space<vmem>>, %arg2: memref<9x128xf32, #tpu.memory_space<vmem>>, %arg3: memref<1x128xf32, #tpu.memory_space<vmem>>, %arg4: memref<1x4x128xbf16, #tpu.memory_space<vmem>>) attributes {dimension_semantics = [#tpu.dimension_semantics<parallel>], iteration_bounds = array<i64: 2>, scalar_prefetch = 0 : i64, scratch_operands = 0 : i64, tpu.core_type = #tpu.core_type<tc>, window_params = [{transform_indices = @transform_0, window_bounds = array<i64: 4, 5, 160>}, {pipeline_mode = #tpu.pipeline_mode<synchronous>, transform_indices = @transform_1, window_bounds = array<i64: 9, 128>}, {pipeline_mode = #tpu.pipeline_mode<synchronous>, transform_indices = @transform_2, window_bounds = array<i64: 1, 128>}, {transform_indices = @transform_3, window_bounds = array<i64: 1, 4, 128>}]} {
    %cst = arith.constant 0.000000e+00 : f32
    %0 = vector.broadcast %cst : f32 to vector<4x128xf32>
    %c0 = arith.constant 0 : index
    %c0_0 = arith.constant 0 : index
    %c0_1 = arith.constant 0 : index
    %1 = vector.load %arg1[%c0, %c0_0, %c0_1] : memref<4x5x160xbf16, #tpu.memory_space<vmem>>, vector<1x4x128xbf16>
    %2 = vector.shape_cast %1 : vector<1x4x128xbf16> to vector<4x128xbf16>
    %c0_2 = arith.constant 0 : index
    %c0_3 = arith.constant 0 : index
    %3 = vector.load %arg2[%c0_2, %c0_3] : memref<9x128xf32, #tpu.memory_space<vmem>>, vector<1x128xf32>
    %4 = arith.extf %2 : vector<4x128xbf16> to vector<4x128xf32>
    %5 = vector.broadcast %3 : vector<1x128xf32> to vector<4x128xf32>
    %6 = arith.mulf %4, %5 : vector<4x128xf32>
    %7 = arith.addf %0, %6 : vector<4x128xf32>
    %c1 = arith.constant 1 : index
    %c0_4 = arith.constant 0 : index
    %c0_5 = arith.constant 0 : index
    %8 = vector.load %arg1[%c1, %c0_4, %c0_5] : memref<4x5x160xbf16, #tpu.memory_space<vmem>>, vector<1x4x128xbf16>
    %9 = vector.shape_cast %8 : vector<1x4x128xbf16> to vector<4x128xbf16>
    %c1_6 = arith.constant 1 : index
    %c0_7 = arith.constant 0 : index
    %10 = vector.load %arg2[%c1_6, %c0_7] : memref<9x128xf32, #tpu.memory_space<vmem>>, vector<1x128xf32>
    %11 = arith.extf %9 : vector<4x128xbf16> to vector<4x128xf32>
    %12 = vector.broadcast %10 : vector<1x128xf32> to vector<4x128xf32>
    %13 = arith.mulf %11, %12 : vector<4x128xf32>
    %14 = arith.addf %7, %13 : vector<4x128xf32>
    %c0_8 = arith.constant 0 : index
    %c0_9 = arith.constant 0 : index
    %c32 = arith.constant 32 : index
    %15 = vector.load %arg1[%c0_8, %c0_9, %c32] : memref<4x5x160xbf16, #tpu.memory_space<vmem>>, vector<1x4x128xbf16>
    %16 = vector.shape_cast %15 : vector<1x4x128xbf16> to vector<4x128xbf16>
    %c2 = arith.constant 2 : index
    %c0_10 = arith.constant 0 : index
    %17 = vector.load %arg2[%c2, %c0_10] : memref<9x128xf32, #tpu.memory_space<vmem>>, vector<1x128xf32>
    %18 = arith.extf %16 : vector<4x128xbf16> to vector<4x128xf32>
    %19 = vector.broadcast %17 : vector<1x128xf32> to vector<4x128xf32>
    %20 = arith.mulf %18, %19 : vector<4x128xf32>
    %21 = arith.addf %14, %20 : vector<4x128xf32>
    %c2_11 = arith.constant 2 : index
    %c0_12 = arith.constant 0 : index
    %c0_13 = arith.constant 0 : index
    %22 = vector.load %arg1[%c2_11, %c0_12, %c0_13] : memref<4x5x160xbf16, #tpu.memory_space<vmem>>, vector<1x4x128xbf16>
    %23 = vector.shape_cast %22 : vector<1x4x128xbf16> to vector<4x128xbf16>
    %c3 = arith.constant 3 : index
    %c0_14 = arith.constant 0 : index
    %24 = vector.load %arg2[%c3, %c0_14] : memref<9x128xf32, #tpu.memory_space<vmem>>, vector<1x128xf32>
    %25 = arith.extf %23 : vector<4x128xbf16> to vector<4x128xf32>
    %26 = vector.broadcast %24 : vector<1x128xf32> to vector<4x128xf32>
    %27 = arith.mulf %25, %26 : vector<4x128xf32>
    %28 = arith.addf %21, %27 : vector<4x128xf32>
    %c3_15 = arith.constant 3 : index
    %c0_16 = arith.constant 0 : index
    %c0_17 = arith.constant 0 : index
    %29 = vector.load %arg1[%c3_15, %c0_16, %c0_17] : memref<4x5x160xbf16, #tpu.memory_space<vmem>>, vector<1x4x128xbf16>
    %30 = vector.shape_cast %29 : vector<1x4x128xbf16> to vector<4x128xbf16>
    %c4 = arith.constant 4 : index
    %c0_18 = arith.constant 0 : index
    %31 = vector.load %arg2[%c4, %c0_18] : memref<9x128xf32, #tpu.memory_space<vmem>>, vector<1x128xf32>
    %32 = arith.extf %30 : vector<4x128xbf16> to vector<4x128xf32>
    %33 = vector.broadcast %31 : vector<1x128xf32> to vector<4x128xf32>
    %34 = arith.mulf %32, %33 : vector<4x128xf32>
    %35 = arith.addf %28, %34 : vector<4x128xf32>
    %c2_19 = arith.constant 2 : index
    %c0_20 = arith.constant 0 : index
    %c32_21 = arith.constant 32 : index
    %36 = vector.load %arg1[%c2_19, %c0_20, %c32_21] : memref<4x5x160xbf16, #tpu.memory_space<vmem>>, vector<1x4x128xbf16>
    %37 = vector.shape_cast %36 : vector<1x4x128xbf16> to vector<4x128xbf16>
    %c5 = arith.constant 5 : index
    %c0_22 = arith.constant 0 : index
    %38 = vector.load %arg2[%c5, %c0_22] : memref<9x128xf32, #tpu.memory_space<vmem>>, vector<1x128xf32>
    %39 = arith.extf %37 : vector<4x128xbf16> to vector<4x128xf32>
    %40 = vector.broadcast %38 : vector<1x128xf32> to vector<4x128xf32>
    %41 = arith.mulf %39, %40 : vector<4x128xf32>
    %42 = arith.addf %35, %41 : vector<4x128xf32>
    %c0_23 = arith.constant 0 : index
    %c1_24 = arith.constant 1 : index
    %c0_25 = arith.constant 0 : index
    %43 = vector.load %arg1[%c0_23, %c1_24, %c0_25] : memref<4x5x160xbf16, #tpu.memory_space<vmem>>, vector<1x4x128xbf16>
    %44 = vector.shape_cast %43 : vector<1x4x128xbf16> to vector<4x128xbf16>
    %c6 = arith.constant 6 : index
    %c0_26 = arith.constant 0 : index
    %45 = vector.load %arg2[%c6, %c0_26] : memref<9x128xf32, #tpu.memory_space<vmem>>, vector<1x128xf32>
    %46 = arith.extf %44 : vector<4x128xbf16> to vector<4x128xf32>
    %47 = vector.broadcast %45 : vector<1x128xf32> to vector<4x128xf32>
    %48 = arith.mulf %46, %47 : vector<4x128xf32>
    %49 = arith.addf %42, %48 : vector<4x128xf32>
    %c1_27 = arith.constant 1 : index
    %c1_28 = arith.constant 1 : index
    %c0_29 = arith.constant 0 : index
    %50 = vector.load %arg1[%c1_27, %c1_28, %c0_29] : memref<4x5x160xbf16, #tpu.memory_space<vmem>>, vector<1x4x128xbf16>
    %51 = vector.shape_cast %50 : vector<1x4x128xbf16> to vector<4x128xbf16>
    %c7 = arith.constant 7 : index
    %c0_30 = arith.constant 0 : index
    %52 = vector.load %arg2[%c7, %c0_30] : memref<9x128xf32, #tpu.memory_space<vmem>>, vector<1x128xf32>
    %53 = arith.extf %51 : vector<4x128xbf16> to vector<4x128xf32>
    %54 = vector.broadcast %52 : vector<1x128xf32> to vector<4x128xf32>
    %55 = arith.mulf %53, %54 : vector<4x128xf32>
    %56 = arith.addf %49, %55 : vector<4x128xf32>
    %c0_31 = arith.constant 0 : index
    %c1_32 = arith.constant 1 : index
    %c32_33 = arith.constant 32 : index
    %57 = vector.load %arg1[%c0_31, %c1_32, %c32_33] : memref<4x5x160xbf16, #tpu.memory_space<vmem>>, vector<1x4x128xbf16>
    %58 = vector.shape_cast %57 : vector<1x4x128xbf16> to vector<4x128xbf16>
    %c8 = arith.constant 8 : index
    %c0_34 = arith.constant 0 : index
    %59 = vector.load %arg2[%c8, %c0_34] : memref<9x128xf32, #tpu.memory_space<vmem>>, vector<1x128xf32>
    %60 = arith.extf %58 : vector<4x128xbf16> to vector<4x128xf32>
    %61 = vector.broadcast %59 : vector<1x128xf32> to vector<4x128xf32>
    %62 = arith.mulf %60, %61 : vector<4x128xf32>
    %63 = arith.addf %56, %62 : vector<4x128xf32>
    %c0_35 = arith.constant 0 : index
    %c0_36 = arith.constant 0 : index
    %64 = vector.load %arg3[%c0_35, %c0_36] : memref<1x128xf32, #tpu.memory_space<vmem>>, vector<1x128xf32>
    %65 = vector.broadcast %64 : vector<1x128xf32> to vector<4x128xf32>
    %66 = arith.addf %63, %65 : vector<4x128xf32>
    %cst_37 = arith.constant 0.000000e+00 : f32
    %67 = vector.broadcast %cst_37 : f32 to vector<4x128xf32>
    %68 = arith.maximumf %66, %67 : vector<4x128xf32>
    %69 = arith.truncf %68 : vector<4x128xf32> to vector<4x128xbf16>
    %c0_38 = arith.constant 0 : index
    %c0_39 = arith.constant 0 : index
    %c0_40 = arith.constant 0 : index
    %70 = vector.load %arg4[%c0_38, %c0_39, %c0_40] : memref<1x4x128xbf16, #tpu.memory_space<vmem>>, vector<1x4x128xbf16>
    %71 = vector.shape_cast %70 : vector<1x4x128xbf16> to vector<4x128xbf16>
    %72 = vector.shape_cast %69 : vector<4x128xbf16> to vector<1x4x128xbf16>
    tpu.vector_store %arg4[%c0_38, %c0_39, %c0_40], %72 {strides = array<i32>} : memref<1x4x128xbf16, #tpu.memory_space<vmem>>, vector<1x4x128xbf16>,
    return
  }
  func.func @transform_0(%arg0: i32) -> (i32, i32, i32) {
    %c0_i32 = arith.constant 0 : i32
    %c0_i32_0 = arith.constant 0 : i32
    %c0_i32_1 = arith.constant 0 : i32
    return %arg0, %c0_i32, %c0_i32_0 : i32, i32, i32
  }
  func.func @transform_1(%arg0: i32) -> (i32, i32) {
    %c0_i32 = arith.constant 0 : i32
    %c0_i32_0 = arith.constant 0 : i32
    %c0_i32_1 = arith.constant 0 : i32
    return %c0_i32, %c0_i32_0 : i32, i32
  }
  func.func @transform_2(%arg0: i32) -> (i32, i32) {
    %c0_i32 = arith.constant 0 : i32
    %c0_i32_0 = arith.constant 0 : i32
    %c0_i32_1 = arith.constant 0 : i32
    return %c0_i32, %c0_i32_0 : i32, i32
  }
  func.func @transform_3(%arg0: i32) -> (i32, i32, i32) {
    %c0_i32 = arith.constant 0 : i32
    %c0_i32_0 = arith.constant 0 : i32
    %c0_i32_1 = arith.constant 0 : i32
    return %arg0, %c0_i32, %c0_i32_0 : i32, i32, i32
  }
}

module attributes {stable_mosaic.version = 11 : i64} {
  func.func @_conv_kernel(%arg0: i32, %arg1: i32, %arg2: memref<1x6x10x32xbf16, #tpu.memory_space<vmem>>, %arg3: memref<9x32x128xbf16, #tpu.memory_space<vmem>>, %arg4: memref<1x128xf32, #tpu.memory_space<vmem>>, %arg5: memref<1x32x128xbf16, #tpu.memory_space<vmem>>) attributes {dimension_semantics = [#tpu.dimension_semantics<parallel>, #tpu.dimension_semantics<parallel>], iteration_bounds = array<i64: 2, 1>, scalar_prefetch = 0 : i64, scratch_operands = 0 : i64, tpu.core_type = #tpu.core_type<tc>, window_params = [{transform_indices = @transform_0, window_bounds = array<i64: 1, 6, 10, 32>}, {transform_indices = @transform_1, window_bounds = array<i64: 9, 32, 128>}, {transform_indices = @transform_2, window_bounds = array<i64: 1, 128>}, {transform_indices = @transform_3, window_bounds = array<i64: 1, 32, 128>}]} {
    %cst = arith.constant 0.000000e+00 : f32
    %0 = vector.broadcast %cst : f32 to vector<32x128xf32>
    %c0 = arith.constant 0 : index
    %c0_0 = arith.constant 0 : index
    %c0_1 = arith.constant 0 : index
    %c0_2 = arith.constant 0 : index
    %1 = vector.load %arg2[%c0, %c0_0, %c0_1, %c0_2] : memref<1x6x10x32xbf16, #tpu.memory_space<vmem>>, vector<1x4x8x32xbf16>
    %2 = vector.shape_cast %1 : vector<1x4x8x32xbf16> to vector<4x8x32xbf16>
    %3 = vector.shape_cast %2 : vector<4x8x32xbf16> to vector<32x32xbf16>
    %c0_3 = arith.constant 0 : index
    %c0_4 = arith.constant 0 : index
    %c0_5 = arith.constant 0 : index
    %4 = vector.load %arg3[%c0_3, %c0_4, %c0_5] : memref<9x32x128xbf16, #tpu.memory_space<vmem>>, vector<1x32x128xbf16>
    %5 = vector.shape_cast %4 : vector<1x32x128xbf16> to vector<32x128xbf16>
    %cst_6 = arith.constant dense<0.000000e+00> : vector<32x128xf32>
    %6 = tpu.matmul %3, %5, %cst_6 {dimension_numbers = #tpu.dot_dimension_numbers<[1], [0], [0], [1], [0, 0, 1, 1], [], []>} : vector<32x32xbf16>, vector<32x128xbf16>, vector<32x128xf32> -> vector<32x128xf32>
    %7 = arith.addf %0, %6 : vector<32x128xf32>
    %c0_7 = arith.constant 0 : index
    %c0_8 = arith.constant 0 : index
    %c1 = arith.constant 1 : index
    %c0_9 = arith.constant 0 : index
    %8 = vector.load %arg2[%c0_7, %c0_8, %c1, %c0_9] : memref<1x6x10x32xbf16, #tpu.memory_space<vmem>>, vector<1x4x8x32xbf16>
    %9 = vector.shape_cast %8 : vector<1x4x8x32xbf16> to vector<4x8x32xbf16>
    %10 = vector.shape_cast %9 : vector<4x8x32xbf16> to vector<32x32xbf16>
    %c1_10 = arith.constant 1 : index
    %c0_11 = arith.constant 0 : index
    %c0_12 = arith.constant 0 : index
    %11 = vector.load %arg3[%c1_10, %c0_11, %c0_12] : memref<9x32x128xbf16, #tpu.memory_space<vmem>>, vector<1x32x128xbf16>
    %12 = vector.shape_cast %11 : vector<1x32x128xbf16> to vector<32x128xbf16>
    %cst_13 = arith.constant dense<0.000000e+00> : vector<32x128xf32>
    %13 = tpu.matmul %10, %12, %cst_13 {dimension_numbers = #tpu.dot_dimension_numbers<[1], [0], [0], [1], [0, 0, 1, 1], [], []>} : vector<32x32xbf16>, vector<32x128xbf16>, vector<32x128xf32> -> vector<32x128xf32>
    %14 = arith.addf %7, %13 : vector<32x128xf32>
    %c0_14 = arith.constant 0 : index
    %c0_15 = arith.constant 0 : index
    %c2 = arith.constant 2 : index
    %c0_16 = arith.constant 0 : index
    %15 = vector.load %arg2[%c0_14, %c0_15, %c2, %c0_16] : memref<1x6x10x32xbf16, #tpu.memory_space<vmem>>, vector<1x4x8x32xbf16>
    %16 = vector.shape_cast %15 : vector<1x4x8x32xbf16> to vector<4x8x32xbf16>
    %17 = vector.shape_cast %16 : vector<4x8x32xbf16> to vector<32x32xbf16>
    %c2_17 = arith.constant 2 : index
    %c0_18 = arith.constant 0 : index
    %c0_19 = arith.constant 0 : index
    %18 = vector.load %arg3[%c2_17, %c0_18, %c0_19] : memref<9x32x128xbf16, #tpu.memory_space<vmem>>, vector<1x32x128xbf16>
    %19 = vector.shape_cast %18 : vector<1x32x128xbf16> to vector<32x128xbf16>
    %cst_20 = arith.constant dense<0.000000e+00> : vector<32x128xf32>
    %20 = tpu.matmul %17, %19, %cst_20 {dimension_numbers = #tpu.dot_dimension_numbers<[1], [0], [0], [1], [0, 0, 1, 1], [], []>} : vector<32x32xbf16>, vector<32x128xbf16>, vector<32x128xf32> -> vector<32x128xf32>
    %21 = arith.addf %14, %20 : vector<32x128xf32>
    %c0_21 = arith.constant 0 : index
    %c1_22 = arith.constant 1 : index
    %c0_23 = arith.constant 0 : index
    %c0_24 = arith.constant 0 : index
    %22 = vector.load %arg2[%c0_21, %c1_22, %c0_23, %c0_24] : memref<1x6x10x32xbf16, #tpu.memory_space<vmem>>, vector<1x4x8x32xbf16>
    %23 = vector.shape_cast %22 : vector<1x4x8x32xbf16> to vector<4x8x32xbf16>
    %24 = vector.shape_cast %23 : vector<4x8x32xbf16> to vector<32x32xbf16>
    %c3 = arith.constant 3 : index
    %c0_25 = arith.constant 0 : index
    %c0_26 = arith.constant 0 : index
    %25 = vector.load %arg3[%c3, %c0_25, %c0_26] : memref<9x32x128xbf16, #tpu.memory_space<vmem>>, vector<1x32x128xbf16>
    %26 = vector.shape_cast %25 : vector<1x32x128xbf16> to vector<32x128xbf16>
    %cst_27 = arith.constant dense<0.000000e+00> : vector<32x128xf32>
    %27 = tpu.matmul %24, %26, %cst_27 {dimension_numbers = #tpu.dot_dimension_numbers<[1], [0], [0], [1], [0, 0, 1, 1], [], []>} : vector<32x32xbf16>, vector<32x128xbf16>, vector<32x128xf32> -> vector<32x128xf32>
    %28 = arith.addf %21, %27 : vector<32x128xf32>
    %c0_28 = arith.constant 0 : index
    %c1_29 = arith.constant 1 : index
    %c1_30 = arith.constant 1 : index
    %c0_31 = arith.constant 0 : index
    %29 = vector.load %arg2[%c0_28, %c1_29, %c1_30, %c0_31] : memref<1x6x10x32xbf16, #tpu.memory_space<vmem>>, vector<1x4x8x32xbf16>
    %30 = vector.shape_cast %29 : vector<1x4x8x32xbf16> to vector<4x8x32xbf16>
    %31 = vector.shape_cast %30 : vector<4x8x32xbf16> to vector<32x32xbf16>
    %c4 = arith.constant 4 : index
    %c0_32 = arith.constant 0 : index
    %c0_33 = arith.constant 0 : index
    %32 = vector.load %arg3[%c4, %c0_32, %c0_33] : memref<9x32x128xbf16, #tpu.memory_space<vmem>>, vector<1x32x128xbf16>
    %33 = vector.shape_cast %32 : vector<1x32x128xbf16> to vector<32x128xbf16>
    %cst_34 = arith.constant dense<0.000000e+00> : vector<32x128xf32>
    %34 = tpu.matmul %31, %33, %cst_34 {dimension_numbers = #tpu.dot_dimension_numbers<[1], [0], [0], [1], [0, 0, 1, 1], [], []>} : vector<32x32xbf16>, vector<32x128xbf16>, vector<32x128xf32> -> vector<32x128xf32>
    %35 = arith.addf %28, %34 : vector<32x128xf32>
    %c0_35 = arith.constant 0 : index
    %c1_36 = arith.constant 1 : index
    %c2_37 = arith.constant 2 : index
    %c0_38 = arith.constant 0 : index
    %36 = vector.load %arg2[%c0_35, %c1_36, %c2_37, %c0_38] : memref<1x6x10x32xbf16, #tpu.memory_space<vmem>>, vector<1x4x8x32xbf16>
    %37 = vector.shape_cast %36 : vector<1x4x8x32xbf16> to vector<4x8x32xbf16>
    %38 = vector.shape_cast %37 : vector<4x8x32xbf16> to vector<32x32xbf16>
    %c5 = arith.constant 5 : index
    %c0_39 = arith.constant 0 : index
    %c0_40 = arith.constant 0 : index
    %39 = vector.load %arg3[%c5, %c0_39, %c0_40] : memref<9x32x128xbf16, #tpu.memory_space<vmem>>, vector<1x32x128xbf16>
    %40 = vector.shape_cast %39 : vector<1x32x128xbf16> to vector<32x128xbf16>
    %cst_41 = arith.constant dense<0.000000e+00> : vector<32x128xf32>
    %41 = tpu.matmul %38, %40, %cst_41 {dimension_numbers = #tpu.dot_dimension_numbers<[1], [0], [0], [1], [0, 0, 1, 1], [], []>} : vector<32x32xbf16>, vector<32x128xbf16>, vector<32x128xf32> -> vector<32x128xf32>
    %42 = arith.addf %35, %41 : vector<32x128xf32>
    %c0_42 = arith.constant 0 : index
    %c2_43 = arith.constant 2 : index
    %c0_44 = arith.constant 0 : index
    %c0_45 = arith.constant 0 : index
    %43 = vector.load %arg2[%c0_42, %c2_43, %c0_44, %c0_45] : memref<1x6x10x32xbf16, #tpu.memory_space<vmem>>, vector<1x4x8x32xbf16>
    %44 = vector.shape_cast %43 : vector<1x4x8x32xbf16> to vector<4x8x32xbf16>
    %45 = vector.shape_cast %44 : vector<4x8x32xbf16> to vector<32x32xbf16>
    %c6 = arith.constant 6 : index
    %c0_46 = arith.constant 0 : index
    %c0_47 = arith.constant 0 : index
    %46 = vector.load %arg3[%c6, %c0_46, %c0_47] : memref<9x32x128xbf16, #tpu.memory_space<vmem>>, vector<1x32x128xbf16>
    %47 = vector.shape_cast %46 : vector<1x32x128xbf16> to vector<32x128xbf16>
    %cst_48 = arith.constant dense<0.000000e+00> : vector<32x128xf32>
    %48 = tpu.matmul %45, %47, %cst_48 {dimension_numbers = #tpu.dot_dimension_numbers<[1], [0], [0], [1], [0, 0, 1, 1], [], []>} : vector<32x32xbf16>, vector<32x128xbf16>, vector<32x128xf32> -> vector<32x128xf32>
    %49 = arith.addf %42, %48 : vector<32x128xf32>
    %c0_49 = arith.constant 0 : index
    %c2_50 = arith.constant 2 : index
    %c1_51 = arith.constant 1 : index
    %c0_52 = arith.constant 0 : index
    %50 = vector.load %arg2[%c0_49, %c2_50, %c1_51, %c0_52] : memref<1x6x10x32xbf16, #tpu.memory_space<vmem>>, vector<1x4x8x32xbf16>
    %51 = vector.shape_cast %50 : vector<1x4x8x32xbf16> to vector<4x8x32xbf16>
    %52 = vector.shape_cast %51 : vector<4x8x32xbf16> to vector<32x32xbf16>
    %c7 = arith.constant 7 : index
    %c0_53 = arith.constant 0 : index
    %c0_54 = arith.constant 0 : index
    %53 = vector.load %arg3[%c7, %c0_53, %c0_54] : memref<9x32x128xbf16, #tpu.memory_space<vmem>>, vector<1x32x128xbf16>
    %54 = vector.shape_cast %53 : vector<1x32x128xbf16> to vector<32x128xbf16>
    %cst_55 = arith.constant dense<0.000000e+00> : vector<32x128xf32>
    %55 = tpu.matmul %52, %54, %cst_55 {dimension_numbers = #tpu.dot_dimension_numbers<[1], [0], [0], [1], [0, 0, 1, 1], [], []>} : vector<32x32xbf16>, vector<32x128xbf16>, vector<32x128xf32> -> vector<32x128xf32>
    %56 = arith.addf %49, %55 : vector<32x128xf32>
    %c0_56 = arith.constant 0 : index
    %c2_57 = arith.constant 2 : index
    %c2_58 = arith.constant 2 : index
    %c0_59 = arith.constant 0 : index
    %57 = vector.load %arg2[%c0_56, %c2_57, %c2_58, %c0_59] : memref<1x6x10x32xbf16, #tpu.memory_space<vmem>>, vector<1x4x8x32xbf16>
    %58 = vector.shape_cast %57 : vector<1x4x8x32xbf16> to vector<4x8x32xbf16>
    %59 = vector.shape_cast %58 : vector<4x8x32xbf16> to vector<32x32xbf16>
    %c8 = arith.constant 8 : index
    %c0_60 = arith.constant 0 : index
    %c0_61 = arith.constant 0 : index
    %60 = vector.load %arg3[%c8, %c0_60, %c0_61] : memref<9x32x128xbf16, #tpu.memory_space<vmem>>, vector<1x32x128xbf16>
    %61 = vector.shape_cast %60 : vector<1x32x128xbf16> to vector<32x128xbf16>
    %cst_62 = arith.constant dense<0.000000e+00> : vector<32x128xf32>
    %62 = tpu.matmul %59, %61, %cst_62 {dimension_numbers = #tpu.dot_dimension_numbers<[1], [0], [0], [1], [0, 0, 1, 1], [], []>} : vector<32x32xbf16>, vector<32x128xbf16>, vector<32x128xf32> -> vector<32x128xf32>
    %63 = arith.addf %56, %62 : vector<32x128xf32>
    %c0_63 = arith.constant 0 : index
    %c0_64 = arith.constant 0 : index
    %64 = vector.load %arg4[%c0_63, %c0_64] : memref<1x128xf32, #tpu.memory_space<vmem>>, vector<1x128xf32>
    %65 = vector.broadcast %64 : vector<1x128xf32> to vector<32x128xf32>
    %66 = arith.addf %63, %65 : vector<32x128xf32>
    %cst_65 = arith.constant 0.000000e+00 : f32
    %67 = vector.broadcast %cst_65 : f32 to vector<32x128xf32>
    %68 = arith.maximumf %66, %67 : vector<32x128xf32>
    %69 = arith.truncf %68 : vector<32x128xf32> to vector<32x128xbf16>
    %c0_66 = arith.constant 0 : index
    %c0_67 = arith.constant 0 : index
    %c0_68 = arith.constant 0 : index
    %70 = vector.load %arg5[%c0_66, %c0_67, %c0_68] : memref<1x32x128xbf16, #tpu.memory_space<vmem>>, vector<1x32x128xbf16>
    %71 = vector.shape_cast %70 : vector<1x32x128xbf16> to vector<32x128xbf16>
    %72 = vector.shape_cast %69 : vector<32x128xbf16> to vector<1x32x128xbf16>
    tpu.vector_store %arg5[%c0_66, %c0_67, %c0_68], %72 {strides = array<i32>} : memref<1x32x128xbf16, #tpu.memory_space<vmem>>, vector<1x32x128xbf16>,
    return
  }
  func.func @transform_0(%arg0: i32, %arg1: i32) -> (i32, i32, i32, i32) {
    %c0_i32 = arith.constant 0 : i32
    %c0_i32_0 = arith.constant 0 : i32
    %c0_i32_1 = arith.constant 0 : i32
    %c0_i32_2 = arith.constant 0 : i32
    return %arg0, %c0_i32, %c0_i32_0, %c0_i32_1 : i32, i32, i32, i32
  }
  func.func @transform_1(%arg0: i32, %arg1: i32) -> (i32, i32, i32) {
    %c0_i32 = arith.constant 0 : i32
    %c0_i32_0 = arith.constant 0 : i32
    %c0_i32_1 = arith.constant 0 : i32
    return %c0_i32, %c0_i32_0, %arg1 : i32, i32, i32
  }
  func.func @transform_2(%arg0: i32, %arg1: i32) -> (i32, i32) {
    %c0_i32 = arith.constant 0 : i32
    %c0_i32_0 = arith.constant 0 : i32
    return %c0_i32, %arg1 : i32, i32
  }
  func.func @transform_3(%arg0: i32, %arg1: i32) -> (i32, i32, i32) {
    %c0_i32 = arith.constant 0 : i32
    %c0_i32_0 = arith.constant 0 : i32
    return %arg0, %c0_i32, %arg1 : i32, i32, i32
  }
}

</mosaic_0001>

<bundles_post_ra>
// kernel: tile.19
= control target key start
LH: loop header
LB: loop body
LE: loop exit
PB: predicated region body
PF: predicated region fallthrough
CT: control target
= control target key end

     0   :  { %s50_s6 = smov 3  ;;  %vm32_vm0 = vcmask 1047556   ;;  %s149_s11 = smov 96   ;;  %vm3_vm1 = vcmask 261120   ;;  %vm36_vm2 = vcmask 1048320   ;;  %vm65_vm3 = vcmask 785920   ;;  %s276_s0 = inlined_call_operand.vmem [shape: f32[9,8,32], index: 0, kind: input, shape index: {}]   ;;  %s277_s1 = inlined_call_operand.vmem [shape: f32[9,256], index: 1, kind: output, shape index: {}]  }
   0x1   :  { %v130_v0 = vld [vmem:[%s276_s0 + $0x43] ss:$4 sm:%s50_s6]   ;;  %v132_v4 = vld [vmem:[%s276_s0 + $0x2] ss:$8 sm:$0xf]   ;;  %s150_s26 = smov 64  }
   0x2   :  { %v125_v1 = vld [vmem:[%s276_s0 + $0x3] ss:$8 sm:$0xf]   ;;  %52 = vrot.lane.b32.xlu1 %v130_v0, %s149_s11  ;;  %v133_v5 = vld [vmem:[%s276_s0 + $0x2] ss:$8 sm:$0xf0]  }
   0x3   :  { %v126_v2 = vld [vmem:[%s276_s0 + $0x3] ss:$8 sm:$0xf0]   ;;  %v127_v6 = vld [vmem:[%s276_s0 + $0x7] ss:$8 sm:$0xf]   ;;  %v62_v8 = vsel %vm32_vm0, %v133_v5, %v132_v4 }
   0x4   :  { %v33_v3 = vsel %vm32_vm0, %v126_v2, %v125_v1  ;;  %v128_v7 = vld [vmem:[%s276_s0 + $0x7] ss:$8 sm:$0xf0]   ;;  %v134_v9 = vld [vmem:[%s276_s0 + $0x6] ss:$8 sm:$0xf]  }
   0x5   :  { %34 = vrot.lane.b32.xlu0 %v33_v3, %s149_s11  ;;  %v135_v10 = vld [vmem:[%s276_s0 + $0x6] ss:$8 sm:$0xf0]   ;;  %v43_v12 = vsel %vm32_vm0, %v128_v7, %v127_v6  ;;  %s79_s27 = smov 3  ;;  %s151_s9 = smov 32   ;;  %vm94_vm4 = vcmask 523520  }
   0x6   :  { %v72_v11 = vsel %vm32_vm0, %v135_v10, %v134_v9  ;;  %v141_v13 = vld [vmem:[%s276_s0 + $0x5] ss:$8 sm:$0xf]   ;;  %v139_v15 = vld [vmem:[%s276_s0 + $0x1] ss:$8 sm:$0xf]  }
   0x7   :  { %73 = vrot.lane.b32.xlu2 %v72_v11, %s150_s26  ;;  %v142_v14 = vld [vmem:[%s276_s0 + $0x5] ss:$8 sm:$0xf0]   ;;  %v140_v16 = vld [vmem:[%s276_s0 + $0x1] ss:$8 sm:$0xf0]  }
   0x8   :  { %v137_v17 = vld [vmem:[%s276_s0 + $0x42] ss:$4 sm:%s79_s27]   ;;  %v101_v18 = vsel %vm32_vm0, %v142_v14, %v141_v13  ;;  %v91_v19 = vsel %vm32_vm0, %v140_v16, %v139_v15  ;;  %s108_s10 = smov 3  ;;  %s23_s13 = smov 3  ;;  %v2_v22 = vld [vmem:[%s276_s0] ss:$4 sm:$0xff]  }
   0x9   :  { %v144_v20 = vld [vmem:[%s276_s0 + $0x41] ss:$4 sm:%s108_s10]   ;;  %v123_v21 = vld [vmem:[%s276_s0 + $0x40] ss:$4 sm:%s23_s13]  }
   0xa   :  { %63 = vrot.lane.b32.xlu1 %v62_v8, %s150_s26  ;;  %124 = vst.msk [vmem:[%s277_s1 + $0x10] ss:$8 sm:$0x3] %vm3_vm1, %v123_v21   ;;  %v118_v23 = vld [vmem:[%s276_s0 + $0x20] ss:$4 sm:$0xff]  }
   0xb   :  { %4 = vst.msk [vmem:[%s277_s1] ss:$8 sm:$0x3] %vm3_vm1, %v2_v22  }
   0xc   :  { %115 = vst.msk [vmem:[%s277_s1 - $0xf] ss:$8 sm:$0xc] %vm3_vm1, %v2_v22  }
   0xd   :  { %44 = vrot.lane.b32.xlu0 %v43_v12, %s149_s11  ;;  %116 = vst.msk [vmem:[%s277_s1 - $0x1e] ss:$8 sm:$0x30] %vm3_vm1, %v2_v22  }
   0xe   :  { %117 = vst.msk [vmem:[%s277_s1 - $0x2d] ss:$8 sm:$0xc0] %vm3_vm1, %v2_v22  }
   0xf   :  { %81 = vrot.lane.b32.xlu2 %v137_v17, %s150_s26  ;;  %119 = vst.msk [vmem:[%s277_s1 + $0x4] ss:$8 sm:$0x3] %vm3_vm1, %v118_v23  }
  0x10   :  { %120 = vst.msk [vmem:[%s277_s1 - $0xb] ss:$8 sm:$0xc] %vm3_vm1, %v118_v23  }
  0x11   :  { %121 = vst.msk [vmem:[%s277_s1 - $0x1a] ss:$8 sm:$0x30] %vm3_vm1, %v118_v23  }
  0x12   :  { %102 = vrot.lane.b32.xlu1 %v101_v18, %s151_s9  ;;  %122 = vst.msk [vmem:[%s277_s1 - $0x29] ss:$8 sm:$0xc0] %vm3_vm1, %v118_v23  }
  0x15   :  { %92 = vrot.lane.b32.xlu0 %v91_v19, %s151_s9 }
  0x17   :  { %110 = vrot.lane.b32.xlu2 %v144_v20, %s151_s9 }
  0x61   :  { %v74_v24 = vpop.permute.xlu2 %73  }
  0x69   :  { %v82_v25 = vpop.permute.xlu2 %81  }
  0x71   :  { %v111_v26 = vpop.permute.xlu2 %110  }
  0x74   :  { %v53_v27 = vpop.permute.xlu1 %52  }
  0x75   :  { %131 = vst.msk [vmem:[%s277_s1 + $0x10] ss:$8 sm:$0x3] %vm36_vm2, %v53_v27  }
  0x76   :  { %138 = vst.msk [vmem:[%s277_s1 + $0x10] ss:$8 sm:$0x3] %vm65_vm3, %v82_v25  }
  0x77   :  { %v35_v28 = vpop.permute.xlu0 %34   ;;  %145 = vst.msk [vmem:[%s277_s1 + $0x10] ss:$8 sm:$0x3] %vm94_vm4, %v111_v26  }
  0x78   :  { %37 = vst.msk [vmem:[%s277_s1] sm:$0xff] %vm36_vm2, %v35_v28  }
  0x7c   :  { %v64_v29 = vpop.permute.xlu1 %63  }
  0x7d   :  { %66 = vst.msk [vmem:[%s277_s1] sm:$0xff] %vm65_vm3, %v64_v29  }
  0x7f   :  { %v45_v30 = vpop.permute.xlu0 %44  }
  0x80   :  { %129 = vst.msk [vmem:[%s277_s1 + $0x8] sm:$0xff] %vm36_vm2, %v45_v30  }
  0x81   :  { %136 = vst.msk [vmem:[%s277_s1 + $0x8] sm:$0xff] %vm65_vm3, %v74_v24  }
  0x84   :  { %v103_v31 = vpop.permute.xlu1 %102  }
  0x85   :  { %143 = vst.msk [vmem:[%s277_s1 + $0x8] sm:$0xff] %vm94_vm4, %v103_v31  }
  0x87   :  { %v93_v32 = vpop.permute.xlu0 %92  }
  0x88   :  { %95 = vst.msk [vmem:[%s277_s1] sm:$0xff] %vm94_vm4, %v93_v32  }

// kernel: forward.6
= control target key start
LH: loop header
LB: loop body
LE: loop exit
PB: predicated region body
PF: predicated region fallthrough
CT: control target
= control target key end

     0   :  { %s1782_s12 = smov 0   ;;  %s1784_s13 = smov 0   ;;  %s2103_s0 = inlined_call_operand.vmem [shape: bf16[8,9,9,4], index: 0, kind: input, shape index: {}]   ;;  %s2104_s1 = inlined_call_operand.vmem [shape: bf16[9,4,128], index: 1, kind: input, shape index: {}]   ;;  %s2105_s2 = inlined_call_operand.vmem [shape: f32[1,128], index: 2, kind: input, shape index: {}]   ;;  %s2106_s3 = inlined_call_operand.vmem [shape: bf16[2,64,128], index: 3, kind: output, shape index: {}]  }
   0x1   :  { %s1786_s14 = smov 0  }
   0x2 LB: > { %s25_s15 = sadd.s32 1, %s1756_s13  ;;  %p1442_p0 = scmp.ge.s32.totalorder %s1760_s14, 1  ;;  %s1760_s14 = sphi %s1786_s14, %s13_s14   ;;  %s1756_s13 = sphi %s1784_s13, %s2110_s13   ;;  %s1752_s12 = sphi %s1782_s12, %s2109_s12  }
   0x3   : > { %p27_p1 = scmp.ge.s32.totalorder %s25_s15, 2  ;;  %p170_p2 = scmp.lt.s32.totalorder %s1760_s14, 3 }
   0x5   : > { %s2112_s15 = smov (%p27_p1, %s25_s15), 0  ;;  %p171_p3 = pnand %p1442_p0, %p170_p2 }
   0x6   : > { %s1443_s18 = sshll.u32 (!%p171_p3), %s1752_s12, 2  ;;  %p219_p5 = scmp.lt.s32.totalorder (!%p171_p3), %s1752_s12, 1 }
   0x7   : > { %174 = sbr.rel (%p171_p3) target bundleno = 302 (0x12e), region = 32  ;;  %p206_p4 = scmp.lt.s32.totalorder (!%p171_p3), %s1443_s18, 7 }
   0xc   : > { %v1455_v0 = vld [vmem:[%s2104_s1 + $0x2] sm:$0x3]  ;;  %vm281_vm0 = vcmask 1041408   ;;  %v1496_v2 = vld [vmem:[%s2104_s1 + $0x4] sm:$0x3]  ;;  %s2114_s18 = smov (!%p206_p4, %s1443_s18), 7 }
   0xd   : > { %v283_v1 = vsel %vm281_vm0, %v1455_v0, 0  ;;  %v1509_v3 = vld [vmem:[%s2104_s1 + $0x6] sm:$0x3]  ;;  %v536_v4 = vsel %vm281_vm0, %v1496_v2, 0  ;;  %v236_v6 = vld [vmem:[%s2104_s1] sm:$0x3] }
   0xe   : > { %1709 = vmatpush.bf16.msra.mxu1 %v283_v1  ;;  %1710 = vmatpush.bf16.msra.mxu2 %v283_v1  ;;  %v619_v5 = vsel %vm281_vm0, %v1509_v3, 0  ;;  %v1538_v7 = vld [vmem:[%s2104_s1 + $0x8] sm:$0x3]  ;;  %v347_v8 = vsel %vm281_vm0, %v236_v6, 0  ;;  %s1712_s27 = smul.u32 72, %s2114_s18  ;;  %vm268_vm1 = vcmask 31744  }
   0xf   : > { %1711 = vmatpush.bf16.msra.mxu3 %v283_v1  ;;  %292 = vmatpush.bf16.msra.mxu0 %v283_v1  ;;  %v702_v9 = vsel %vm281_vm0, %v1538_v7, 0  ;;  %v1588_v10 = vld [vmem:[%s2104_s1 + $0xc] sm:$0x3]  ;;  %v1617_v11 = vld [vmem:[%s2104_s1 + $0xe] sm:$0x3]  ;;  %s2116_s12 = smov (!%p219_p5, %s1752_s12), 1 }
  0x10   : > { %s1829_s5 = scalar_lea.vmem %s2103_s0, %s1712_s27  ;;  %v1575_v12 = vld [vmem:[%s2104_s1 + $0xa] sm:$0x3]  ;;  %v1654_v13 = vld [vmem:[%s2104_s1 + $0x10] sm:$0x3]  ;;  %v979_v25 = vsel %vm281_vm0, %v1588_v10, 0  ;;  %v1062_v26 = vsel %vm281_vm0, %v1617_v11, 0 }
  0x11   : > { %v1462_v14 = vld [vmem:[%s1829_s5 + $0x58] sm:$0xf]  ;;  %v1667_v15 = vld [vmem:[%s1829_s5 + $0x5c] sm:$0xf0]  ;;  %v1466_v16 = vld [vmem:[%s1829_s5 + $0x68] sm:$0xf] }
  0x12   : > { %545 = vmatpush.bf16.msrb.mxu2 %v536_v4  ;;  %356 = vmatpush.bf16.msrb.mxu1 %v347_v8  ;;  %v1463_v17 = vor.u32 %v1667_v15, %v1462_v14  ;;  %v1668_v18 = vld [vmem:[%s1829_s5 + $0x6c] sm:$0xf0]  ;;  %v1470_v19 = vld [vmem:[%s1829_s5 + $0x78] sm:$0xf]  ;;  %v1669_v20 = vld [vmem:[%s1829_s5 + $0x7c] sm:$0xf0] }
  0x13   : > { %628 = vmatpush.bf16.msrb.mxu3 %v619_v5  ;;  %711 = vmatpush.bf16.msrb.mxu0 %v702_v9  ;;  %v1467_v21 = vor.u32 %v1668_v18, %v1466_v16  ;;  %v1471_v22 = vor.u32 %v1669_v20, %v1470_v19  ;;  %v1458_v23 = vld [vmem:[%s1829_s5 + $0x48] sm:$0xf]  ;;  %v1666_v24 = vld [vmem:[%s1829_s5 + $0x4c] sm:$0xf0]  ;;  %v378_v28 = vld [vmem:[%s1829_s5] sm:$0xf] }
  0x14   : > { %1473 = vmatmul.msk.bf16.vlgmr.msra.gmra.mxu1 %vm268_vm1, %v1463_v17  ;;  %v1459_v27 = vor.u32 %v1666_v24, %v1458_v23  ;;  %v379_v29 = vld [vmem:[%s1829_s5 + $0x4] sm:$0x1]  ;;  %v896_v30 = vsel %vm281_vm0, %v1575_v12, 0  ;;  %v1256_v31 = vsel %vm281_vm0, %v1654_v13, 0  ;;  %v380_v32 = vld [vmem:[%s1829_s5 + $0x8] sm:$0xf] }
  0x15   : > { %1474 = vmatmul.msk.bf16.vlgmr.msra.gmra.mxu2 %vm268_vm1, %v1467_v21  ;;  %1475 = vmatmul.msk.bf16.vlgmr.msra.gmra.mxu3 %vm268_vm1, %v1471_v22  ;;  %v381_v33 = vld [vmem:[%s1829_s5 + $0xc] sm:$0x1]  ;;  %v398_v34 = vshrl.u32 %v378_v28, 16  ;;  %v401_v35 = vshll.u32 %v378_v28, 16  ;;  %v407_v36 = vshll.u32 %v379_v29, 16  ;;  %v412_v37 = vshrl.u32 %v380_v32, 16 }
  0x16   : > { %1472 = vmatmul.msk.bf16.vlgmr.msra.gmra.mxu0 %vm268_vm1, %v1459_v27  ;;  %v415_v38 = vshll.u32 %v380_v32, 16  ;;  %v421_v39 = vshll.u32 %v381_v33, 16  ;;  %988 = vmatpush.bf16.msra.mxu2 %v979_v25  ;;  %vm394_vm2 = vsmask.f32 3328  ;;  %vm395_vm3 = vsmask.f32 7440 }
  0x17   : > { %v400_v40 = vrot.slane %v398_v34, 4  ;;  %v403_v41 = vrot.slane %v401_v35, 5  ;;  %1071 = vmatpush.bf16.msra.mxu3 %v1062_v26  ;;  %905 = vmatpush.bf16.msra.mxu1 %v896_v30  ;;  %v414_v42 = vrot.slane %v412_v37, 4  ;;  %v409_v45 = vrot.slane %v407_v36, 5  ;;  %v382_v46 = vld [vmem:[%s1829_s5 + $0x10] sm:$0xf]  ;;  %vm1861_vm4 = vmor %vm394_vm2, %vm395_vm3 }
  0x18   : > { %v417_v43 = vrot.slane %v415_v38, 5  ;;  %1265 = vmatpush.bf16.msra.mxu0 %v1256_v31  ;;  %v423_v49 = vrot.slane %v421_v39, 5  ;;  %v384_v50 = vld [vmem:[%s1829_s5 + $0x18] sm:$0xf]  ;;  %v1478_v51 = vld [vmem:[%s1829_s5] sm:$0xf] }
  0x19   : > { %v404_v44 = vor.u32 %v403_v41, %v400_v40  ;;  %v426_v53 = vshrl.u32 %v382_v46, 16  ;;  %v429_v54 = vshll.u32 %v382_v46, 16  ;;  %v1662_v55 = vld [vmem:[%s1829_s5 + $0x4] sm:$0xf0]  ;;  %v440_v57 = vshrl.u32 %v384_v50, 16  ;;  %s1661_s18 = sshll.u32 %s2116_s12, 5 }
  0x1a   : > { %v418_v48 = vor.u32 %v417_v43, %v414_v42  ;;  %v443_v58 = vshll.u32 %v384_v50, 16  ;;  %v1512_v60 = vld [vmem:[%s1829_s5 + $0x90] sm:$0xf]  ;;  %v1670_v61 = vld [vmem:[%s1829_s5 + $0x94] sm:$0xf0]  ;;  %v1479_v9 = vor.u32 %v1662_v55, %v1478_v51  ;;  %s2069_s21 = scalar_lea.vmem %s2106_s3, %s1661_s18 }
  0x1b   : > { %v405_v52 = vrot.slane %v404_v44, 4  ;;  %v428_v62 = vrot.slane %v426_v53, 4  ;;  %v431_v63 = vrot.slane %v429_v54, 5  ;;  %v1541_v2 = vld [vmem:[%s1829_s5 + $0xd8] sm:$0xf]  ;;  %v442_v4 = vrot.slane %v440_v57, 4 }
  0x1c   : > { %v419_v56 = vrot.slane %v418_v48, 4  ;;  %v1674_v3 = vld [vmem:[%s1829_s5 + $0xdc] sm:$0xf0]  ;;  %v445_v5 = vrot.slane %v443_v58, 5  ;;  %v383_v7 = vld [vmem:[%s1829_s5 + $0x14] sm:$0x1]  ;;  %v1513_v11 = vor.u32 %v1670_v61, %v1512_v60 }
  0x1d   : > { %v410_v59 = vsel %vm1861_vm4, %v405_v52, %v409_v45  ;;  %v385_v8 = vld [vmem:[%s1829_s5 + $0x1c] sm:$0x1]  ;;  %v1542_v12 = vor.u32 %v1674_v3, %v1541_v2  ;;  %v432_v13 = vor.u32 %v431_v63, %v428_v62  ;;  %v435_v14 = vshll.u32 %v383_v7, 16  ;;  %v386_v21 = vld [vmem:[%s1829_s5 + $0x20] sm:$0xf] }
  0x1e   : > { %v424_v0 = vsel %vm1861_vm4, %v419_v56, %v423_v49  ;;  %v511_v1 = vunpack.c.l.b16 %v410_v59  ;;  %v446_v15 = vor.u32 %v445_v5, %v442_v4  ;;  %v449_v16 = vshll.u32 %v385_v8, 16  ;;  %v388_v22 = vld [vmem:[%s1829_s5 + $0x28] sm:$0xf]  ;;  %v1482_v29 = vld [vmem:[%s1829_s5 + $0x10] sm:$0xf] }
  0x1f   : > { %v512_v6 = vunpack.c.l.b16 %v424_v0  ;;  %v433_v17 = vrot.slane %v432_v13, 4  ;;  %v437_v18 = vrot.slane %v435_v14, 5  ;;  %v454_v23 = vshrl.u32 %v386_v21, 16  ;;  %v1663_v30 = vld [vmem:[%s1829_s5 + $0x14] sm:$0xf0] }
  0x20   : > { %v447_v19 = vrot.slane %v446_v15, 4  ;;  %v451_v20 = vrot.slane %v449_v16, 5  ;;  %v457_v24 = vshll.u32 %v386_v21, 16  ;;  %v468_v27 = vshrl.u32 %v388_v22, 16  ;;  %v1516_v33 = vld [vmem:[%s1829_s5 + $0xa0] sm:$0xf] }
  0x21   : > { %v519_v10 = vpack.c.b16 %v512_v6, %v511_v1  ;;  %v438_v25 = vsel %vm1861_vm4, %v433_v17, %v437_v18  ;;  %v471_v28 = vshll.u32 %v388_v22, 16  ;;  %v1671_v34 = vld [vmem:[%s1829_s5 + $0xa4] sm:$0xf0]  ;;  %v1675_v36 = vld [vmem:[%s1829_s5 + $0xec] sm:$0xf0]  ;;  %v456_v37 = vrot.slane %v454_v23, 4 }
  0x22   : > { %v452_v26 = vsel %vm1861_vm4, %v447_v19, %v451_v20  ;;  %v513_v31 = vunpack.c.l.b16 %v438_v25  ;;  %v1545_v35 = vld [vmem:[%s1829_s5 + $0xe8] sm:$0xf]  ;;  %v459_v38 = vrot.slane %v457_v24, 5  ;;  %v470_v39 = vrot.slane %v468_v27, 4  ;;  %v387_v41 = vld [vmem:[%s1829_s5 + $0x24] sm:$0x1] }
  0x23   : > { %v514_v32 = vunpack.c.l.b16 %v452_v26  ;;  %v473_v40 = vrot.slane %v471_v28, 5  ;;  %v389_v42 = vld [vmem:[%s1829_s5 + $0x2c] sm:$0x1]  ;;  %v1483_v43 = vor.u32 %v1663_v30, %v1482_v29  ;;  %v1517_v45 = vor.u32 %v1671_v34, %v1516_v33  ;;  %v390_v52 = vld [vmem:[%s1829_s5 + $0x30] sm:$0xf] }
  0x24   : > { %1492 = vmatmul.msk.bf16.vlgmr.msrb.gmra.mxu1 %vm268_vm1, %v1479_v9  ;;  %v1546_v46 = vor.u32 %v1675_v36, %v1545_v35  ;;  %v460_v48 = vor.u32 %v459_v38, %v456_v37  ;;  %v463_v49 = vshll.u32 %v387_v41, 16  ;;  %v477_v51 = vshll.u32 %v389_v42, 16  ;;  %v392_v53 = vld [vmem:[%s1829_s5 + $0x38] sm:$0xf]  ;;  %v391_v4 = vld [vmem:[%s1829_s5 + $0x34] sm:$0x1] }
  0x25   : > { %1497 = vmatmul.msk.bf16.vlgmr.msrb.gmra.mxu2 %vm268_vm1, %v519_v10  ;;  %1526 = vmatmul.msk.bf16.vlgmr.msrb.gmra.mxu3 %vm268_vm1, %v1513_v11  ;;  %v520_v44 = vpack.c.b16 %v514_v32, %v513_v31  ;;  %v474_v50 = vor.u32 %v473_v40, %v470_v39  ;;  %v482_v58 = vshrl.u32 %v390_v52, 16  ;;  %v485_v59 = vshll.u32 %v390_v52, 16  ;;  %v393_v5 = vld [vmem:[%s1829_s5 + $0x3c] sm:$0x1]  ;;  %v1486_v6 = vld [vmem:[%s1829_s5 + $0x20] sm:$0xf] }
  0x26   : > { %1555 = vmatmul.msk.bf16.vlgmr.msrb.gmra.mxu0 %vm268_vm1, %v1542_v12  ;;  %v461_v54 = vrot.slane %v460_v48, 4  ;;  %v465_v55 = vrot.slane %v463_v49, 5  ;;  %v479_v57 = vrot.slane %v477_v51, 5  ;;  %v496_v60 = vshrl.u32 %v392_v53, 16  ;;  %v1664_v7 = vld [vmem:[%s1829_s5 + $0x24] sm:$0xf0] }
  0x27   : > { %v475_v56 = vrot.slane %v474_v50, 4  ;;  %v499_v61 = vshll.u32 %v392_v53, 16  ;;  %v484_v0 = vrot.slane %v482_v58, 4  ;;  %v487_v1 = vrot.slane %v485_v59, 5  ;;  %v1520_v10 = vld [vmem:[%s1829_s5 + $0xb0] sm:$0xf] }
  0x28   : > { %v466_v62 = vsel %vm1861_vm4, %v461_v54, %v465_v55  ;;  %v498_v2 = vrot.slane %v496_v60, 4  ;;  %v1672_v11 = vld [vmem:[%s1829_s5 + $0xb4] sm:$0xf0]  ;;  %v1676_v13 = vld [vmem:[%s1829_s5 + $0xfc] sm:$0xf0]  ;;  %v491_v15 = vshll.u32 %v391_v4, 16  ;;  %v1487_v18 = vor.u32 %v1664_v7, %v1486_v6 }
  0x29   : > { %v480_v63 = vsel %vm1861_vm4, %v475_v56, %v479_v57  ;;  %v501_v3 = vrot.slane %v499_v61, 5  ;;  %v515_v8 = vunpack.c.l.b16 %v466_v62  ;;  %v1549_v12 = vld [vmem:[%s1829_s5 + $0xf8] sm:$0xf]  ;;  %v488_v14 = vor.u32 %v487_v1, %v484_v0  ;;  %v1559_v26 = vld [vmem:[%s1829_s5 + $0x90] sm:$0xf] }
  0x2a   : > { %v516_v9 = vunpack.c.l.b16 %v480_v63  ;;  %v505_v17 = vshll.u32 %v393_v5, 16  ;;  %v1521_v20 = vor.u32 %v1672_v11, %v1520_v10  ;;  %v1550_v21 = vor.u32 %v1676_v13, %v1549_v12  ;;  %v1561_v27 = vld [vmem:[%s1829_s5 + $0x98] sm:$0xf]  ;;  %v1638_v28 = vld [vmem:[%s1829_s5 + $0x8] sm:$0xf] }
  0x2b   : > { %v502_v16 = vor.u32 %v501_v3, %v498_v2  ;;  %v489_v22 = vrot.slane %v488_v14, 4  ;;  %v493_v23 = vrot.slane %v491_v15, 5  ;;  %v1640_v29 = vld [vmem:[%s1829_s5 + $0x10] sm:$0xf]  ;;  %v758_v32 = vshrl.u32 %v1559_v26, 16 }
  0x2c   : > { %v521_v19 = vpack.c.b16 %v516_v9, %v515_v8  ;;  %v507_v25 = vrot.slane %v505_v17, 5  ;;  %v761_v33 = vshll.u32 %v1559_v26, 16  ;;  %v772_v34 = vshrl.u32 %v1561_v27, 16  ;;  %v1490_v40 = vld [vmem:[%s1829_s5 + $0x30] sm:$0xf] }
  0x2d   : > { %v503_v24 = vrot.slane %v502_v16, 4  ;;  %v494_v30 = vsel %vm1861_vm4, %v489_v22, %v493_v23  ;;  %v775_v35 = vshll.u32 %v1561_v27, 16  ;;  %v1118_v36 = vshrl.u32 %v1638_v28, 16  ;;  %v1665_v41 = vld [vmem:[%s1829_s5 + $0x34] sm:$0xf0] }
  0x2e   : > { %v1121_v37 = vshll.u32 %v1638_v28, 16  ;;  %v1132_v38 = vshrl.u32 %v1640_v29, 16  ;;  %v1135_v39 = vshll.u32 %v1640_v29, 16  ;;  %v517_v42 = vunpack.c.l.b16 %v494_v30  ;;  %v1562_v52 = vld [vmem:[%s1829_s5 + $0x9c] sm:$0x1] }
  0x2f   : > { %v508_v31 = vsel %vm1861_vm4, %v503_v24, %v507_v25  ;;  %v760_v48 = vrot.slane %v758_v32, 4  ;;  %v763_v49 = vrot.slane %v761_v33, 5  ;;  %v774_v50 = vrot.slane %v772_v34, 4  ;;  %v1639_v57 = vld [vmem:[%s1829_s5 + $0xc] sm:$0x1] }
  0x30   : > { %v777_v51 = vrot.slane %v775_v35, 5  ;;  %v1120_v53 = vrot.slane %v1118_v36, 4  ;;  %v1123_v54 = vrot.slane %v1121_v37, 5  ;;  %v1134_v55 = vrot.slane %v1132_v38, 4  ;;  %v1641_v58 = vld [vmem:[%s1829_s5 + $0x14] sm:$0x1] }
  0x31   : > { %v1137_v56 = vrot.slane %v1135_v39, 5  ;;  %v1491_v59 = vor.u32 %v1665_v41, %v1490_v40  ;;  %v1553_v62 = vld [vmem:[%s1829_s5 + $0x108] sm:$0xf]  ;;  %v1677_v63 = vld [vmem:[%s1829_s5 + $0x10c] sm:$0xf0]  ;;  %v764_v0 = vor.u32 %v763_v49, %v760_v48  ;;  %v781_v3 = vshll.u32 %v1562_v52, 16 }
  0x32   : > { %v778_v2 = vor.u32 %v777_v51, %v774_v50  ;;  %v1124_v4 = vor.u32 %v1123_v54, %v1120_v53  ;;  %v1127_v5 = vshll.u32 %v1639_v57, 16  ;;  %v1141_v7 = vshll.u32 %v1641_v58, 16  ;;  %v1563_v9 = vld [vmem:[%s1829_s5 + $0xa0] sm:$0xf]  ;;  %v1565_v10 = vld [vmem:[%s1829_s5 + $0xa8] sm:$0xf] }
  0x33   : > { %v1138_v6 = vor.u32 %v1137_v56, %v1134_v55  ;;  %v1554_v8 = vor.u32 %v1677_v63, %v1553_v62  ;;  %v765_v11 = vrot.slane %v764_v0, 4  ;;  %v783_v14 = vrot.slane %v781_v3, 5  ;;  %v1642_v23 = vld [vmem:[%s1829_s5 + $0x18] sm:$0xf]  ;;  %v1644_v24 = vld [vmem:[%s1829_s5 + $0x20] sm:$0xf] }
  0x34   : > { %1493 = vmatmul.msk.bf16.gmra.mxu1 %vm268_vm1, %v1483_v43  ;;  %v518_v43 = vunpack.c.l.b16 %v508_v31  ;;  %v779_v13 = vrot.slane %v778_v2, 4  ;;  %v1125_v15 = vrot.slane %v1124_v4, 4  ;;  %v1129_v16 = vrot.slane %v1127_v5, 5  ;;  %v1564_v29 = vld [vmem:[%s1829_s5 + $0xa4] sm:$0x1] }
  0x35   : > { %1498 = vmatmul.msk.bf16.gmra.mxu2 %vm268_vm1, %v520_v44  ;;  %1527 = vmatmul.msk.bf16.gmra.mxu3 %vm268_vm1, %v1517_v45  ;;  %v1524_v44 = vld [vmem:[%s1829_s5 + $0xc0] sm:$0xf]  ;;  %v1673_v45 = vld [vmem:[%s1829_s5 + $0xc4] sm:$0xf0]  ;;  %v1139_v17 = vrot.slane %v1138_v6, 4  ;;  %v803_v22 = vshll.u32 %v1565_v10, 16 }
  0x36   : > { %1556 = vmatmul.msk.bf16.gmra.mxu0 %vm268_vm1, %v1546_v46  ;;  %v1560_v46 = vld [vmem:[%s1829_s5 + $0x94] sm:$0x1]  ;;  %v522_v60 = vpack.c.b16 %v518_v43, %v517_v42  ;;  %v1525_v61 = vor.u32 %v1673_v45, %v1524_v44  ;;  %v784_v26 = vsel %vm1861_vm4, %v779_v13, %v783_v14  ;;  %v1130_v27 = vsel %vm1861_vm4, %v1125_v15, %v1129_v16  ;;  %v1566_v34 = vld [vmem:[%s1829_s5 + $0xac] sm:$0x1]  ;;  %v1591_v41 = vld [vmem:[%s1829_s5 + $0x8] sm:$0xf] }
  0x37   : > { %v767_v1 = vshll.u32 %v1560_v46, 16  ;;  %v805_v33 = vrot.slane %v803_v22, 5  ;;  %v1146_v35 = vshrl.u32 %v1642_v23, 16  ;;  %v1149_v36 = vshll.u32 %v1642_v23, 16  ;;  %v1678_v42 = vld [vmem:[%s1829_s5 + $0xc] sm:$0xf0] }
  0x38   : > { %v1160_v37 = vshrl.u32 %v1644_v24, 16  ;;  %v1163_v38 = vshll.u32 %v1644_v24, 16  ;;  %v872_v40 = vunpack.c.l.b16 %v784_v26  ;;  %v1231_v43 = vunpack.c.l.b16 %v1130_v27  ;;  %v1620_v45 = vld [vmem:[%s1829_s5 + $0x50] sm:$0xf]  ;;  %v1682_v46 = vld [vmem:[%s1829_s5 + $0x54] sm:$0xf0] }
  0x39   : > { %v769_v12 = vrot.slane %v767_v1, 5  ;;  %v795_v49 = vshll.u32 %v1564_v29, 16  ;;  %v809_v51 = vshll.u32 %v1566_v34, 16  ;;  %v1148_v52 = vrot.slane %v1146_v35, 4  ;;  %v1643_v57 = vld [vmem:[%s1829_s5 + $0x1c] sm:$0x1] }
  0x3a   : > { %v1151_v53 = vrot.slane %v1149_v36, 5  ;;  %v1162_v54 = vrot.slane %v1160_v37, 4  ;;  %v1165_v55 = vrot.slane %v1163_v38, 5  ;;  %v1645_v58 = vld [vmem:[%s1829_s5 + $0x24] sm:$0x1]  ;;  %v1155_v3 = vshll.u32 %v1643_v57, 16 }
  0x3b   : > { %v770_v25 = vsel %vm1861_vm4, %v765_v11, %v769_v12  ;;  %v797_v63 = vrot.slane %v795_v49, 5  ;;  %v811_v1 = vrot.slane %v809_v51, 5  ;;  %v1169_v5 = vshll.u32 %v1645_v58, 16  ;;  %v1567_v6 = vld [vmem:[%s1829_s5 + $0xb0] sm:$0xf] }
  0x3c   : > { %v871_v39 = vunpack.c.l.b16 %v770_v25  ;;  %v1152_v2 = vor.u32 %v1151_v53, %v1148_v52  ;;  %v1166_v4 = vor.u32 %v1165_v55, %v1162_v54  ;;  %v1157_v12 = vrot.slane %v1155_v3, 5  ;;  %v1648_v15 = vld [vmem:[%s1829_s5 + $0x30] sm:$0xf]  ;;  %v1679_v29 = vld [vmem:[%s1829_s5 + $0x1c] sm:$0xf0] }
  0x3d   : > { %v1171_v14 = vrot.slane %v1169_v5, 5  ;;  %v814_v16 = vshrl.u32 %v1567_v6, 16  ;;  %v1188_v22 = vshrl.u32 %v1648_v15, 16  ;;  %v1191_v23 = vshll.u32 %v1648_v15, 16  ;;  %v1568_v35 = vld [vmem:[%s1829_s5 + $0xb4] sm:$0x1] }
  0x3e   : > { %v879_v56 = vpack.c.b16 %v872_v40, %v871_v39  ;;  %v1153_v11 = vrot.slane %v1152_v2, 4  ;;  %v1167_v13 = vrot.slane %v1166_v4, 4  ;;  %v1570_v36 = vld [vmem:[%s1829_s5 + $0xbc] sm:$0x1]  ;;  %v1683_v39 = vld [vmem:[%s1829_s5 + $0x64] sm:$0xf0] }
  0x3f   : > { %v823_v49 = vshll.u32 %v1568_v35, 16  ;;  %v837_v51 = vshll.u32 %v1570_v36, 16  ;;  %v1571_v3 = vld [vmem:[%s1829_s5 + $0xc0] sm:$0xf]  ;;  %v1573_v4 = vld [vmem:[%s1829_s5 + $0xc8] sm:$0xf] }
  0x40   : > { %v1158_v26 = vsel %vm1861_vm4, %v1153_v11, %v1157_v12  ;;  %v1172_v27 = vsel %vm1861_vm4, %v1167_v13, %v1171_v14  ;;  %v856_v11 = vshrl.u32 %v1573_v4, 16  ;;  %v859_v12 = vshll.u32 %v1573_v4, 16  ;;  %v1632_v4 = vld [vmem:[%s1829_s5 + $0x80] sm:$0xf] }
  0x41   : > { %v1233_v40 = vunpack.c.l.b16 %v1158_v26 }
  0x44   : > { %1494 = vmatmul.msk.bf16.gmra.mxu1 %vm268_vm1, %v1487_v18  ;;  %v1143_v18 = vrot.slane %v1141_v7, 5  ;;  %v1569_v7 = vld [vmem:[%s1829_s5 + $0xb8] sm:$0xf] }
  0x45   : > { %1499 = vmatmul.msk.bf16.gmra.mxu2 %vm268_vm1, %v521_v19  ;;  %1528 = vmatmul.msk.bf16.gmra.mxu3 %vm268_vm1, %v1521_v20  ;;  %v786_v19 = vshrl.u32 %v1563_v9, 16  ;;  %v789_v20 = vshll.u32 %v1563_v9, 16 }
  0x46   : > { %1557 = vmatmul.msk.bf16.gmra.mxu0 %vm268_vm1, %v1550_v21  ;;  %v800_v21 = vshrl.u32 %v1565_v10, 16  ;;  %v1144_v28 = vsel %vm1861_vm4, %v1139_v17, %v1143_v18  ;;  %v1646_v10 = vld [vmem:[%s1829_s5 + $0x28] sm:$0xf]  ;;  %v817_v17 = vshll.u32 %v1567_v6, 16  ;;  %v828_v18 = vshrl.u32 %v1569_v7, 16 }
  0x47   : > { %v788_v30 = vrot.slane %v786_v19, 4  ;;  %v791_v31 = vrot.slane %v789_v20, 5  ;;  %v1232_v44 = vunpack.c.l.b16 %v1144_v28  ;;  %v831_v19 = vshll.u32 %v1569_v7, 16  ;;  %v1595_v28 = vld [vmem:[%s1829_s5 + $0x18] sm:$0xf] }
  0x48   : > { %v802_v32 = vrot.slane %v800_v21, 4  ;;  %v1174_v20 = vshrl.u32 %v1646_v10, 16  ;;  %v1177_v21 = vshll.u32 %v1646_v10, 16  ;;  %v1596_v52 = vor.u32 %v1679_v29, %v1595_v28  ;;  %v1650_v7 = vld [vmem:[%s1829_s5 + $0x38] sm:$0xf] }
  0x49   : > { %v792_v48 = vor.u32 %v791_v31, %v788_v30  ;;  %v1624_v30 = vld [vmem:[%s1829_s5 + $0x60] sm:$0xf]  ;;  %v816_v31 = vrot.slane %v814_v16, 4  ;;  %v833_v34 = vrot.slane %v831_v19, 5  ;;  %v845_v10 = vshll.u32 %v1571_v3, 16 }
  0x4a   : > { %v806_v50 = vor.u32 %v805_v33, %v802_v32  ;;  %v819_v32 = vrot.slane %v817_v17, 5  ;;  %v830_v33 = vrot.slane %v828_v18, 4  ;;  %v1176_v37 = vrot.slane %v1174_v20, 4 }
  0x4b   : > { %v793_v62 = vrot.slane %v792_v48, 4  ;;  %v1179_v38 = vrot.slane %v1177_v21, 5  ;;  %v1625_v53 = vor.u32 %v1683_v39, %v1624_v30  ;;  %v1202_v15 = vshrl.u32 %v1650_v7, 16  ;;  %v1599_v21 = vld [vmem:[%s1829_s5 + $0x28] sm:$0xf] }
  0x4c   : > { %v807_v0 = vrot.slane %v806_v50, 4  ;;  %v820_v48 = vor.u32 %v819_v32, %v816_v31  ;;  %v834_v50 = vor.u32 %v833_v34, %v830_v33  ;;  %v1205_v16 = vshll.u32 %v1650_v7, 16  ;;  %v1572_v31 = vld [vmem:[%s1829_s5 + $0xc4] sm:$0x1]  ;;  %v1574_v32 = vld [vmem:[%s1829_s5 + $0xcc] sm:$0x1] }
  0x4d   : > { %v1180_v54 = vor.u32 %v1179_v38, %v1176_v37  ;;  %v847_v26 = vrot.slane %v845_v10, 5  ;;  %v861_v28 = vrot.slane %v859_v12, 5  ;;  %v1204_v33 = vrot.slane %v1202_v15, 4 }
  0x4e   : > { %v812_v9 = vsel %vm1861_vm4, %v807_v0, %v811_v1  ;;  %v1207_v34 = vrot.slane %v1205_v16, 5 }
  0x4f   : > { %v874_v25 = vunpack.c.l.b16 %v812_v9  ;;  %v842_v9 = vshrl.u32 %v1571_v3, 16  ;;  %v1681_v3 = vld [vmem:[%s1829_s5 + $0x3c] sm:$0xf0] }
  0x54   : > { %1495 = vmatmul.msk.bf16.gmra.mxu1 %vm268_vm1, %v1491_v59  ;;  %v1592_v59 = vor.u32 %v1678_v42, %v1591_v41  ;;  %v1234_v41 = vunpack.c.l.b16 %v1172_v27  ;;  %v1647_v42 = vld [vmem:[%s1829_s5 + $0x2c] sm:$0x1]  ;;  %v858_v27 = vrot.slane %v856_v11, 4 }
  0x55   : > { %1500 = vmatmul.msk.bf16.gmra.mxu2 %vm268_vm1, %v522_v60  ;;  %1529 = vmatmul.msk.bf16.gmra.mxu3 %vm268_vm1, %v1525_v61  ;;  %v1621_v60 = vor.u32 %v1682_v46, %v1620_v45  ;;  %v1239_v61 = vpack.c.b16 %v1232_v44, %v1231_v43  ;;  %v1190_v43 = vrot.slane %v1188_v22, 4  ;;  %v1193_v44 = vrot.slane %v1191_v23, 5  ;;  %v1649_v46 = vld [vmem:[%s1829_s5 + $0x34] sm:$0x1]  ;;  %v1680_v22 = vld [vmem:[%s1829_s5 + $0x2c] sm:$0xf0] }
  0x56   : > { %1558 = vmatmul.msk.bf16.gmra.mxu0 %vm268_vm1, %v1554_v8  ;;  %v798_v8 = vsel %vm1861_vm4, %v793_v62, %v797_v63  ;;  %v1183_v55 = vshll.u32 %v1647_v42, 16  ;;  %v1197_v58 = vshll.u32 %v1649_v46, 16  ;;  %v839_v62 = vrot.slane %v837_v51, 5  ;;  %v1628_v23 = vld [vmem:[%s1829_s5 + $0x70] sm:$0xf] }
  0x57   : > { %v873_v24 = vunpack.c.l.b16 %v798_v8  ;;  %v1194_v57 = vor.u32 %v1193_v44, %v1190_v43  ;;  %v1181_v63 = vrot.slane %v1180_v54, 4  ;;  %v1652_v8 = vld [vmem:[%s1829_s5 + $0x40] sm:$0xf]  ;;  %v1600_v38 = vor.u32 %v1680_v22, %v1599_v21 }
  0x58   : > { %v1185_v0 = vrot.slane %v1183_v55, 5  ;;  %v1199_v2 = vrot.slane %v1197_v58, 5  ;;  %v1216_v17 = vshrl.u32 %v1652_v8, 16  ;;  %v1219_v18 = vshll.u32 %v1652_v8, 16 }
  0x59   : > { %v880_v45 = vpack.c.b16 %v874_v25, %v873_v24  ;;  %v1195_v1 = vrot.slane %v1194_v57, 4  ;;  %v1684_v24 = vld [vmem:[%s1829_s5 + $0x74] sm:$0xf0]  ;;  %v844_v25 = vrot.slane %v842_v9, 4  ;;  %v851_v43 = vshll.u32 %v1572_v31, 16 }
  0x5a   : > { %v1186_v13 = vsel %vm1861_vm4, %v1181_v63, %v1185_v0  ;;  %v1218_v35 = vrot.slane %v1216_v17, 4  ;;  %v1221_v36 = vrot.slane %v1219_v18, 5  ;;  %v1629_v39 = vor.u32 %v1684_v24, %v1628_v23 }
  0x5b   : > { %v1200_v14 = vsel %vm1861_vm4, %v1195_v1, %v1199_v2  ;;  %v1235_v29 = vunpack.c.l.b16 %v1186_v13  ;;  %v848_v42 = vor.u32 %v847_v26, %v844_v25  ;;  %v862_v44 = vor.u32 %v861_v28, %v858_v27  ;;  %v1603_v2 = vld [vmem:[%s1829_s5 + $0x38] sm:$0xf] }
  0x5c   : > { %v1236_v30 = vunpack.c.l.b16 %v1200_v14  ;;  %v1604_v10 = vor.u32 %v1681_v3, %v1603_v2 }
  0x5d   : > { %v863_v54 = vrot.slane %v862_v44, 4 }
  0x5e   : > { %v1241_v46 = vpack.c.b16 %v1236_v30, %v1235_v29 }
  0x64   : > { %1576 = vmatmul.msk.bf16.vlgmr.msra.gmra.mxu1 %vm268_vm1, %v879_v56  ;;  %v1240_v56 = vpack.c.b16 %v1234_v41, %v1233_v40  ;;  %v1651_v40 = vld [vmem:[%s1829_s5 + $0x3c] sm:$0x1]  ;;  %v1653_v41 = vld [vmem:[%s1829_s5 + $0x44] sm:$0x1] }
  0x65   : > { %1605 = vmatmul.msk.bf16.vlgmr.msra.gmra.mxu2 %vm268_vm1, %v1592_v59  ;;  %1634 = vmatmul.msk.bf16.vlgmr.msra.gmra.mxu3 %vm268_vm1, %v1621_v60  ;;  %v821_v59 = vrot.slane %v820_v48, 4  ;;  %v825_v60 = vrot.slane %v823_v49, 5  ;;  %v1208_v48 = vor.u32 %v1207_v34, %v1204_v33  ;;  %v1211_v49 = vshll.u32 %v1651_v40, 16 }
  0x66   : > { %1655 = vmatmul.msk.bf16.vlgmr.msra.gmra.mxu0 %vm268_vm1, %v1239_v61  ;;  %v835_v61 = vrot.slane %v834_v50, 4  ;;  %v1222_v50 = vor.u32 %v1221_v36, %v1218_v35  ;;  %v1225_v51 = vshll.u32 %v1653_v41, 16 }
  0x67   : > { %v826_v5 = vsel %vm1861_vm4, %v821_v59, %v825_v60  ;;  %v1213_v57 = vrot.slane %v1211_v49, 5 }
  0x68   : > { %v840_v6 = vsel %vm1861_vm4, %v835_v61, %v839_v62  ;;  %v875_v19 = vunpack.c.l.b16 %v826_v5  ;;  %v1223_v58 = vrot.slane %v1222_v50, 4  ;;  %v1227_v59 = vrot.slane %v1225_v51, 5  ;;  %v1685_v5 = vld [vmem:[%s1829_s5 + $0x84] sm:$0xf0] }
  0x69   : > { %v876_v20 = vunpack.c.l.b16 %v840_v6  ;;  %v1633_v11 = vor.u32 %v1685_v5, %v1632_v4 }
  0x6a   : > { %v1228_v63 = vsel %vm1861_vm4, %v1223_v58, %v1227_v59 }
  0x6b   : > { %v881_v37 = vpack.c.b16 %v876_v20, %v875_v19  ;;  %v1238_v7 = vunpack.c.l.b16 %v1228_v63 }
  0x74   : > { %1577 = vmatmul.msk.bf16.gmra.mxu1 %vm268_vm1, %v880_v45  ;;  %v865_v45 = vshll.u32 %v1574_v32, 16 }
  0x75   : > { %1606 = vmatmul.msk.bf16.gmra.mxu2 %vm268_vm1, %v1596_v52  ;;  %1635 = vmatmul.msk.bf16.gmra.mxu3 %vm268_vm1, %v1625_v53  ;;  %v849_v52 = vrot.slane %v848_v42, 4  ;;  %v853_v53 = vrot.slane %v851_v43, 5 }
  0x76   : > { %1656 = vmatmul.msk.bf16.gmra.mxu0 %vm268_vm1, %v1240_v56  ;;  %v867_v55 = vrot.slane %v865_v45, 5  ;;  %v1209_v56 = vrot.slane %v1208_v48, 4 }
  0x77   : > { %v854_v60 = vsel %vm1861_vm4, %v849_v52, %v853_v53 }
  0x78   : > { %v868_v61 = vsel %vm1861_vm4, %v863_v54, %v867_v55  ;;  %v1214_v62 = vsel %vm1861_vm4, %v1209_v56, %v1213_v57  ;;  %v877_v0 = vunpack.c.l.b16 %v854_v60 }
  0x79   : > { %v878_v1 = vunpack.c.l.b16 %v868_v61  ;;  %v1237_v6 = vunpack.c.l.b16 %v1214_v62 }
  0x7b   : > { %v882_v8 = vpack.c.b16 %v878_v1, %v877_v0  ;;  %v1242_v12 = vpack.c.b16 %v1238_v7, %v1237_v6 }
  0x84   : > { %1578 = vmatmul.msk.bf16.gmra.mxu1 %vm268_vm1, %v881_v37 }
  0x85   : > { %1607 = vmatmul.msk.bf16.gmra.mxu2 %vm268_vm1, %v1600_v38  ;;  %1636 = vmatmul.msk.bf16.gmra.mxu3 %vm268_vm1, %v1629_v39 }
  0x86   : > { %1657 = vmatmul.msk.bf16.gmra.mxu0 %vm268_vm1, %v1241_v46 }
  0x91   : > { %v299_v9 = vpop.f32.mrf.mxu1 }
  0x93   : > { %v294_v13 = vpop.f32.mrf.mxu0 }
  0x94   : > { %1579 = vmatmul.msk.bf16.gmra.mxu1 %vm268_vm1, %v882_v8 }
  0x95   : > { %1608 = vmatmul.msk.bf16.gmra.mxu2 %vm268_vm1, %v1604_v10  ;;  %1637 = vmatmul.msk.bf16.gmra.mxu3 %vm268_vm1, %v1633_v11 }
  0x96   : > { %1658 = vmatmul.msk.bf16.gmra.mxu0 %vm268_vm1, %v1242_v12 }
  0x98   : > { %v304_v47 = vpop.f32.mrf.mxu2  ;;  %v309_v14 = vpop.f32.mrf.mxu3 }
  0x99   : > { %v2028_v15 = vpop.f32.mrf.mxu1 }
  0x9b   : > { %v296_v16 = vpop.f32.mrf.mxu0 }
  0xa0   : > { %v2030_v17 = vpop.f32.mrf.mxu2  ;;  %v2032_v18 = vpop.f32.mrf.mxu3 }
  0xa1   : > { %v358_v19 = vpop.f32.mrf.mxu1 }
  0xa2   : > { %v359_v20 = vadd.f32 %v358_v19, %v294_v13 }
  0xa3   : > { %v713_v21 = vpop.f32.mrf.mxu0 }
  0xa8   : > { %v547_v22 = vpop.f32.mrf.mxu2  ;;  %v630_v23 = vpop.f32.mrf.mxu3 }
  0xa9   : > { %v567_v24 = vadd.f32 %v547_v22, %v359_v20  ;;  %v360_v25 = vpop.f32.mrf.mxu1 }
  0xaa   : > { %v361_v5 = vadd.f32 %v360_v25, %v296_v16  ;;  %v2060_v16 = vld [vmem:[%s2105_s2] ss:$0 sm:$0xff] }
  0xab   : > { %v650_v26 = vadd.f32 %v630_v23, %v567_v24  ;;  %v715_v27 = vpop.f32.mrf.mxu0 }
  0xad   : > { %v733_v28 = vadd.f32 %v713_v21, %v650_v26 }
  0xb0   : > { %v549_v29 = vpop.f32.mrf.mxu2  ;;  %v632_v30 = vpop.f32.mrf.mxu3 }
  0xb1   : > { %v363_v31 = vpop.f32.mrf.mxu1  ;;  %v568_v7 = vadd.f32 %v549_v29, %v361_v5 }
  0xb2   : > { %v364_v32 = vadd.f32 %v363_v31, %v299_v9 }
  0xb3   : > { %v718_v33 = vpop.f32.mrf.mxu0  ;;  %v651_v11 = vadd.f32 %v632_v30, %v568_v7 }
  0xb5   : > { %v734_v19 = vadd.f32 %v715_v27, %v651_v11 }
  0xb8   : > { %v552_v34 = vpop.f32.mrf.mxu2  ;;  %v635_v35 = vpop.f32.mrf.mxu3 }
  0xb9   : > { %v569_v36 = vadd.f32 %v552_v34, %v364_v32  ;;  %v365_v37 = vpop.f32.mrf.mxu1 }
  0xba   : > { %v366_v26 = vadd.f32 %v365_v37, %v2028_v15 }
  0xbb   : > { %v652_v38 = vadd.f32 %v635_v35, %v569_v36  ;;  %v2034_v39 = vpop.f32.mrf.mxu0 }
  0xbd   : > { %v735_v40 = vadd.f32 %v718_v33, %v652_v38 }
  0xc0   : > { %v554_v41 = vpop.f32.mrf.mxu2  ;;  %v637_v42 = vpop.f32.mrf.mxu3 }
  0xc1   : > { %v368_v43 = vpop.f32.mrf.mxu1  ;;  %v570_v30 = vadd.f32 %v554_v41, %v366_v26 }
  0xc2   : > { %v369_v44 = vadd.f32 %v368_v43, %v304_v47 }
  0xc3   : > { %v723_v45 = vpop.f32.mrf.mxu0  ;;  %v653_v36 = vadd.f32 %v637_v42, %v570_v30 }
  0xc8   : > { %v557_v46 = vpop.f32.mrf.mxu2  ;;  %v640_v48 = vpop.f32.mrf.mxu3 }
  0xc9   : > { %v571_v49 = vadd.f32 %v557_v46, %v369_v44  ;;  %v2036_v50 = vpop.f32.mrf.mxu1  ;;  %v736_v46 = vadd.f32 %v2034_v39, %v653_v36 }
  0xcb   : > { %v654_v51 = vadd.f32 %v640_v48, %v571_v49  ;;  %v2038_v52 = vpop.f32.mrf.mxu0 }
  0xcd   : > { %v2040_v53 = vadd.f32 %v723_v45, %v654_v51 }
  0xd0   : > { %v2042_v54 = vpop.f32.mrf.mxu2  ;;  %v2044_v55 = vpop.f32.mrf.mxu3 }
  0xd1   : > { %v373_v56 = vpop.f32.mrf.mxu1 }
  0xd2   : > { %v374_v57 = vadd.f32 %v373_v56, %v309_v14 }
  0xd3   : > { %v728_v58 = vpop.f32.mrf.mxu0 }
  0xd8   : > { %v562_v59 = vpop.f32.mrf.mxu2  ;;  %v645_v60 = vpop.f32.mrf.mxu3 }
  0xd9   : > { %v573_v61 = vadd.f32 %v562_v59, %v374_v57  ;;  %v2046_v62 = vpop.f32.mrf.mxu1  ;;  %v371_v57 = vadd.f32 %v2036_v50, %v2030_v17 }
  0xdb   : > { %v656_v63 = vadd.f32 %v645_v60, %v573_v61  ;;  %v2048_v0 = vpop.f32.mrf.mxu0  ;;  %v572_v59 = vadd.f32 %v2042_v54, %v371_v57 }
  0xdd   : > { %v2050_v1 = vadd.f32 %v728_v58, %v656_v63  ;;  %v655_v7 = vadd.f32 %v2044_v55, %v572_v59 }
  0xdf   : > { %v738_v54 = vadd.f32 %v2038_v52, %v655_v7 }
  0xe0   : > { %v2052_v2 = vpop.f32.mrf.mxu2  ;;  %v2054_v3 = vpop.f32.mrf.mxu3 }
  0xe1   : > { %v907_v4 = vpop.f32.mrf.mxu1 }
  0xe2   : > { %v927_v8 = vadd.f32 %v907_v4, %v733_v28 }
  0xe3   : > { %v1267_v6 = vpop.f32.mrf.mxu0 }
  0xe8   : > { %v990_v9 = vpop.f32.mrf.mxu2  ;;  %v1073_v10 = vpop.f32.mrf.mxu3 }
  0xe9   : > { %v1010_v12 = vadd.f32 %v990_v9, %v927_v8  ;;  %v909_v13 = vpop.f32.mrf.mxu1 }
  0xea   : > { %v928_v20 = vadd.f32 %v909_v13, %v734_v19 }
  0xeb   : > { %v1269_v47 = vpop.f32.mrf.mxu0  ;;  %v1093_v14 = vadd.f32 %v1073_v10, %v1010_v12 }
  0xed   : > { %v1287_v23 = vadd.f32 %v1267_v6, %v1093_v14 }
  0xef   : > { %v1299_v27 = vadd.f32 %v2060_v16, %v1287_v23 }
  0xf0   : > { %v992_v21 = vpop.f32.mrf.mxu2  ;;  %v1075_v22 = vpop.f32.mrf.mxu3 }
  0xf1   : > { %v1011_v24 = vadd.f32 %v992_v21, %v928_v20  ;;  %v912_v25 = vpop.f32.mrf.mxu1  ;;  %v1307_v38 = vmax.f32 %v1299_v27, 0.0  ;;  %v376_v21 = vadd.f32 %v2046_v62, %v2032_v18 }
  0xf2   : > { %v929_v33 = vadd.f32 %v912_v25, %v735_v40 }
  0xf3   : > { %v1094_v28 = vadd.f32 %v1075_v22, %v1011_v24  ;;  %v1272_v29 = vpop.f32.mrf.mxu0  ;;  %v574_v22 = vadd.f32 %v2052_v2, %v376_v21 }
  0xf5   : > { %v1288_v31 = vadd.f32 %v1269_v47, %v1094_v28 }
  0xf7   : > { %v1300_v32 = vadd.f32 %v2060_v16, %v1288_v31 }
  0xf8   : > { %v995_v34 = vpop.f32.mrf.mxu2  ;;  %v1078_v35 = vpop.f32.mrf.mxu3 }
  0xf9   : > { %v1308_v43 = vmax.f32 %v1300_v32, 0.0  ;;  %v1012_v44 = vadd.f32 %v995_v34, %v929_v33  ;;  %v914_v45 = vpop.f32.mrf.mxu1 }
  0xfa   : > { %v930_v40 = vadd.f32 %v914_v45, %v736_v46 }
  0xfb   : > { %v1689_v15 = vpack.c.bf16 %v1308_v43, %v1307_v38  ;;  %v1274_v37 = vpop.f32.mrf.mxu0  ;;  %v1095_v41 = vadd.f32 %v1078_v35, %v1012_v44 }
  0xfd   : > { %1690 = vst [vmem:[%s2069_s21] sm:$0xff] %v1689_v15   ;;  %v1289_v42 = vadd.f32 %v1272_v29, %v1095_v41  ;;  %v657_v29 = vadd.f32 %v2054_v3, %v574_v22 }
  0xff   : > { %v1301_v60 = vadd.f32 %v2060_v16, %v1289_v42  ;;  %v740_v33 = vadd.f32 %v2048_v0, %v657_v29 }
 0x100   : > { %v997_v48 = vpop.f32.mrf.mxu2  ;;  %v1080_v49 = vpop.f32.mrf.mxu3 }
 0x101   : > { %v1013_v51 = vadd.f32 %v997_v48, %v930_v40  ;;  %v917_v56 = vpop.f32.mrf.mxu1  ;;  %v1309_v8 = vmax.f32 %v1301_v60, 0.0 }
 0x102   : > { %v931_v39 = vadd.f32 %v917_v56, %v2040_v53 }
 0x103   : > { %v1096_v58 = vadd.f32 %v1080_v49, %v1013_v51  ;;  %v1277_v63 = vpop.f32.mrf.mxu0 }
 0x105   : > { %v1290_v61 = vadd.f32 %v1274_v37, %v1096_v58 }
 0x107   : > { %v1302_v4 = vadd.f32 %v2060_v16, %v1290_v61 }
 0x108   : > { %v1000_v5 = vpop.f32.mrf.mxu2  ;;  %v1083_v6 = vpop.f32.mrf.mxu3 }
 0x109   : > { %v1310_v9 = vmax.f32 %v1302_v4, 0.0  ;;  %v1014_v10 = vadd.f32 %v1000_v5, %v931_v39  ;;  %v919_v17 = vpop.f32.mrf.mxu1 }
 0x10a   : > { %v932_v12 = vadd.f32 %v919_v17, %v738_v54 }
 0x10b   : > { %v1694_v50 = vpack.c.bf16 %v1310_v9, %v1309_v8  ;;  %v1097_v11 = vadd.f32 %v1083_v6, %v1014_v10  ;;  %v1279_v13 = vpop.f32.mrf.mxu0 }
 0x10d   : > { %1706 = vst [vmem:[%s2069_s21 + $0x8] sm:$0xff] %v1694_v50   ;;  %v1291_v19 = vadd.f32 %v1277_v63, %v1097_v11 }
 0x10f   : > { %v1303_v23 = vadd.f32 %v2060_v16, %v1291_v19 }
 0x110   : > { %v1002_v47 = vpop.f32.mrf.mxu2  ;;  %v1085_v14 = vpop.f32.mrf.mxu3 }
 0x111   : > { %v1015_v20 = vadd.f32 %v1002_v47, %v932_v12  ;;  %v922_v53 = vpop.f32.mrf.mxu1  ;;  %v1311_v30 = vmax.f32 %v1303_v23, 0.0 }
 0x112   : > { %v933_v52 = vadd.f32 %v922_v53, %v2050_v1 }
 0x113   : > { %v1098_v55 = vadd.f32 %v1085_v14, %v1015_v20  ;;  %v1282_v32 = vpop.f32.mrf.mxu0 }
 0x115   : > { %v1292_v24 = vadd.f32 %v1279_v13, %v1098_v55 }
 0x117   : > { %v1304_v25 = vadd.f32 %v2060_v16, %v1292_v24 }
 0x118   : > { %v1005_v26 = vpop.f32.mrf.mxu2  ;;  %v1088_v28 = vpop.f32.mrf.mxu3 }
 0x119   : > { %v1312_v27 = vmax.f32 %v1304_v25, 0.0  ;;  %v1016_v31 = vadd.f32 %v1005_v26, %v933_v52  ;;  %v924_v62 = vpop.f32.mrf.mxu1 }
 0x11a   : > { %v934_v34 = vadd.f32 %v924_v62, %v740_v33 }
 0x11b   : > { %v1699_v18 = vpack.c.bf16 %v1312_v27, %v1311_v30  ;;  %v1099_v2 = vadd.f32 %v1088_v28, %v1016_v31  ;;  %v1284_v44 = vpop.f32.mrf.mxu0 }
 0x11d   : > { %1707 = vst [vmem:[%s2069_s21 + $0x10] sm:$0xff] %v1699_v18   ;;  %v1293_v36 = vadd.f32 %v1282_v32, %v1099_v2 }
 0x11f   : > { %v1305_v3 = vadd.f32 %v2060_v16, %v1293_v36 }
 0x120   : > { %v1007_v35 = vpop.f32.mrf.mxu2  ;;  %v1090_v1 = vpop.f32.mrf.mxu3 }
 0x121   : > { %v1017_v38 = vadd.f32 %v1007_v35, %v934_v34  ;;  %v1313_v37 = vmax.f32 %v1305_v3, 0.0 }
 0x123   : > { %v1100_v43 = vadd.f32 %v1090_v1, %v1017_v38 }
 0x125   : > { %v1294_v45 = vadd.f32 %v1284_v44, %v1100_v43 }
 0x127   : > { %v1306_v15 = vadd.f32 %v2060_v16, %v1294_v45 }
 0x129   : > { %v1314_v41 = vmax.f32 %v1306_v15, 0.0 }
 0x12b   : > { %v1704_v46 = vpack.c.bf16 %v1314_v41, %v1313_v37 }
 0x12d   : > { %1708 = vst [vmem:[%s2069_s21 + $0x18] sm:$0xff] %v1704_v46  }
 0x12e PF: > { %s13_s14 = sadd.s32 1, %s1760_s14   ;;  %s2109_s12 = smov %s1756_s13 }
 0x12f   : > { %p10_p6 = scmp.ge.s32.totalorder %s13_s14, 4   ;;  %s2110_s13 = smov %s2112_s15 }
 0x131   :  { %12 = sbr.rel (!%p10_p6) target bundleno = 2 (0x2), region = 81 }

// kernel: tile.27
= control target key start
LH: loop header
LB: loop body
LE: loop exit
PB: predicated region body
PF: predicated region fallthrough
CT: control target
= control target key end

     0   :  { %vm40_vm0 = vcmask 1047556   ;;  %s116_s24 = smov 64   ;;  %s117_s25 = smov 32   ;;  %vm42_vm1 = vcmask 261120   ;;  %vm57_vm2 = vcmask 1048320   ;;  %vm74_vm3 = vcmask 785920   ;;  %s183_s0 = inlined_call_operand.vmem [shape: f32[9,4,32], index: 0, kind: input, shape index: {}]   ;;  %s184_s1 = inlined_call_operand.vmem [shape: f32[9,128], index: 1, kind: output, shape index: {}]  }
   0x1   :  { %v101_v0 = vld [vmem:[%s183_s0 + $0x1c] sm:$0xf]  ;;  %v102_v1 = vld [vmem:[%s183_s0 + $0x18] sm:$0xf]  ;;  %v103_v2 = vld [vmem:[%s183_s0 + $0x14] sm:$0xf] }
   0x2   :  { %11 = vst [vmem:[#allocation0 + $0x38] sm:$0xf] %v101_v0  ;;  %v104_v3 = vld [vmem:[%s183_s0 + $0x10] sm:$0xf]  ;;  %v105_v4 = vld [vmem:[%s183_s0 + $0xc] sm:$0xf] }
   0x3   :  { %15 = vst [vmem:[#allocation0 + $0x30] sm:$0xf] %v102_v1  ;;  %v106_v5 = vld [vmem:[%s183_s0 + $0x8] sm:$0xf]  ;;  %v107_v6 = vld [vmem:[%s183_s0 + $0x4] sm:$0xf] }
   0x4   :  { %19 = vst [vmem:[#allocation0 + $0x28] sm:$0xf] %v103_v2  ;;  %v36_v7 = vld [vmem:[%s183_s0] sm:$0xf]  ;;  %vm91_vm4 = vcmask 523520  }
   0x5   :  { %23 = vst [vmem:[#allocation0 + $0x20] sm:$0xf] %v104_v3  ;;  %v100_v8 = vld [vmem:[%s183_s0 + $0x20] sm:$0xf]  ;;  %s115_s0 = smov 96  }
   0x6   :  { %27 = vst [vmem:[#allocation0 + $0x18] sm:$0xf] %v105_v4 }
   0x7   :  { %31 = vst [vmem:[#allocation0 + $0x10] sm:$0xf] %v106_v5 }
   0x8   :  { %35 = vst [vmem:[#allocation0 + $0x8] sm:$0xf] %v107_v6 }
   0x9   :  { %37 = vst [vmem:[#allocation0] sm:$0xf] %v36_v7 }
   0xa   :  { %7 = vst [vmem:[#allocation0 + $0x40] sm:$0xf] %v100_v8 }
   0xc   :  { %v52_v9 = vld [vmem:[#allocation0 + $0x3] ss:$8 sm:$0xf0]   ;;  %v69_v10 = vld [vmem:[#allocation0 + $0x2] ss:$8 sm:$0xf0]  }
   0xd   :  { %v86_v11 = vld [vmem:[#allocation0 + $0x1] ss:$8 sm:$0xf0]   ;;  %v39_v22 = vld [vmem:[#allocation0] ss:$8 sm:$0xf0]  }
  0x10   :  { %v50_v12 = vld [vmem:[#allocation0 + $0x3] ss:$8 sm:$0xf]   ;;  %v67_v13 = vld [vmem:[#allocation0 + $0x2] ss:$8 sm:$0xf]  }
  0x11   :  { %v54_v14 = vsel %vm40_vm0, %v52_v9, %v50_v12  ;;  %v71_v15 = vsel %vm40_vm0, %v69_v10, %v67_v13  ;;  %v84_v16 = vld [vmem:[#allocation0 + $0x1] ss:$8 sm:$0xf]   ;;  %v60_v18 = vld [vmem:[#allocation0 + $0x43] sm:$0x1]  }
  0x12   :  { %55 = vrot.lane.b32.xlu0 %v54_v14, %s115_s0  ;;  %72 = vrot.lane.b32.xlu1 %v71_v15, %s116_s24  ;;  %v88_v17 = vsel %vm40_vm0, %v86_v11, %v84_v16  ;;  %v77_v19 = vld [vmem:[#allocation0 + $0x42] sm:$0x1]   ;;  %v94_v20 = vld [vmem:[#allocation0 + $0x41] sm:$0x1]   ;;  %v45_v24 = vld [vmem:[#allocation0 + $0x40] sm:$0x1]  }
  0x13   :  { %89 = vrot.lane.b32.xlu2 %v88_v17, %s117_s25  ;;  %v38_v21 = vld [vmem:[#allocation0] ss:$8 sm:$0xf]   ;;  %108 = vst.msk [vmem:[%s184_s1 + $0x8] sm:$0x1] %vm42_vm1, %v45_v24  }
  0x14   :  { %v41_v23 = vsel %vm40_vm0, %v39_v22, %v38_v21 }
  0x15   :  { %43 = vst.msk [vmem:[%s184_s1] sm:$0xff] %vm42_vm1, %v41_v23  }
  0x1a   :  { %61 = vrot.lane.b32.xlu0 %v60_v18, %s115_s0  ;;  %78 = vrot.lane.b32.xlu1 %v77_v19, %s116_s24 }
  0x1b   :  { %95 = vrot.lane.b32.xlu2 %v94_v20, %s117_s25 }
  0x6d   :  { %v90_v25 = vpop.permute.xlu2 %89  }
  0x75   :  { %v96_v26 = vpop.permute.xlu2 %95  }
  0x84   :  { %v56_v27 = vpop.permute.xlu0 %55   ;;  %v73_v28 = vpop.permute.xlu1 %72  }
  0x85   :  { %58 = vst.msk [vmem:[%s184_s1] sm:$0xff] %vm57_vm2, %v56_v27  }
  0x86   :  { %75 = vst.msk [vmem:[%s184_s1] sm:$0xff] %vm74_vm3, %v73_v28  }
  0x87   :  { %92 = vst.msk [vmem:[%s184_s1] sm:$0xff] %vm91_vm4, %v90_v25  }
  0x8c   :  { %v62_v29 = vpop.permute.xlu0 %61   ;;  %v79_v30 = vpop.permute.xlu1 %78  }
  0x8d   :  { %109 = vst.msk [vmem:[%s184_s1 + $0x8] sm:$0x1] %vm57_vm2, %v62_v29  }
  0x8e   :  { %110 = vst.msk [vmem:[%s184_s1 + $0x8] sm:$0x1] %vm74_vm3, %v79_v30  }
  0x8f   :  { %111 = vst.msk [vmem:[%s184_s1 + $0x8] sm:$0x1] %vm91_vm4, %v96_v26  }

// kernel: forward.7
= control target key start
LH: loop header
LB: loop body
LE: loop exit
PB: predicated region body
PF: predicated region fallthrough
CT: control target
= control target key end

     0   :  { %s626_s12 = smov 0   ;;  %s795_s0 = inlined_call_operand.vmem [shape: bf16[2,10,320], index: 0, kind: input, shape index: {}]   ;;  %s796_s1 = inlined_call_operand.vmem [shape: f32[9,256], index: 1, kind: input, shape index: {}]   ;;  %s797_s2 = inlined_call_operand.vmem [shape: f32[1,256], index: 2, kind: input, shape index: {}]   ;;  %s798_s3 = inlined_call_operand.vmem [shape: bf16[2,8,256], index: 3, kind: output, shape index: {}]  }
   0x1 LB: > { %s564_s13 = sadd.s32 4294967295, %s601_s12   ;;  %p568_p0 = scmp.ge.s32.totalorder %s601_s12, 1  ;;  %s601_s12 = sphi %s626_s12, %s13_s12  }
   0x2   : > { %p137_p1 = scmp.lt.s32.totalorder %s601_s12, 3 }
   0x4   : > { %p138_p2 = pnand %p568_p0, %p137_p1 }
   0x5   : > { %s603_s18 = smov (!%p138_p2), 64   ;;  %s604_s21 = smov (!%p138_p2), 32  }
   0x6   : > { %141 = sbr.rel (%p138_p2) target bundleno = 305 (0x131), region = 32  ;;  %p161_p3 = scmp.lt.s32.totalorder (!%p138_p2), %s564_s13, 1 }
   0x7   : > { %s605_s5 = smov (!%p138_p2), 96  }
   0xb   : > { %v573_v0 = vld [vmem:[%s796_s1 + $0x2] ss:$8 sm:$0x3]  ;;  %v572_v2 = vld [vmem:[%s796_s1 + $0x1] ss:$8 sm:$0x3] }
   0xc   : > { %v222_v1 = vperm.slane %v573_v0, 0  ;;  %v189_v3 = vperm.slane %v572_v2, 0  ;;  %v575_v4 = vld [vmem:[%s796_s1 + $0x4] ss:$8 sm:$0x3]  ;;  %v223_v6 = vperm.slane %v573_v0, 1 }
   0xd   : > { %v285_v5 = vperm.slane %v575_v4, 0  ;;  %v190_v7 = vperm.slane %v572_v2, 1  ;;  %v286_v8 = vperm.slane %v575_v4, 1  ;;  %v576_v9 = vld [vmem:[%s796_s1 + $0x5] ss:$8 sm:$0x3] }
   0xe   : > { %224 = vrot.lane.b32.xlu1 %v222_v1, %s603_s18  ;;  %191 = vrot.lane.b32.xlu0 %v189_v3, %s604_s21  ;;  %v332_v10 = vperm.slane %v576_v9, 1  ;;  %v331_v11 = vperm.slane %v576_v9, 0  ;;  %v578_v12 = vld [vmem:[%s796_s1 + $0x7] ss:$8 sm:$0x3]  ;;  %s800_s13 = smov (!%p161_p3, %s564_s13), 1 }
   0xf   : > { %287 = vrot.lane.b32.xlu2 %v285_v5, %s604_s21  ;;  %v408_v13 = vperm.slane %v578_v12, 0  ;;  %v579_v14 = vld [vmem:[%s796_s1 + $0x10] ss:$8 sm:$0x3]  ;;  %v409_v16 = vperm.slane %v578_v12, 1  ;;  %s583_s28 = smul.u32 24, %s800_s13 }
  0x10   : > { %v454_v15 = vperm.slane %v579_v14, 0  ;;  %v455_v17 = vperm.slane %v579_v14, 1  ;;  %vm195_vm0 = vcmask 261120   ;;  %vm228_vm1 = vcmask 523264   ;;  %s582_s16 = sshll.u32 %s800_s13, 3 }
  0x11   : > { %s668_s4 = scalar_lea.vmem %s795_s0, %s583_s28  ;;  %vm269_vm2 = vcmask 1046528   ;;  %vm392_vm3 = vcmask 1045504   ;;  %vm212_vm4 = vcmask 785408   ;;  %s170_s19 = scalar_lea.vmem %s798_s3, %s582_s16 }
  0x12   : > { %v171_v18 = vld [vmem:[%s668_s4] sm:$0xff]  ;;  %v251_v23 = vld [vmem:[%s668_s4 + $0xc] sm:$0x11]  ;;  %v184_v25 = vld [vmem:[%s668_s4 + $0x8] sm:$0xf] }
  0x13   : > { %v671_v19 = vunpack.c.l.bf16 %v171_v18  ;;  %v677_v26 = vunpack.c.l.bf16 %v251_v23  ;;  %v187_v27 = vunpack.c.l.bf16 %v184_v25  ;;  %v679_v28 = vunpack.c.h.bf16 %v171_v18  ;;  %v280_v35 = vld [vmem:[%s668_s4 + $0x14] sm:$0x1]  ;;  %v374_v50 = vld [vmem:[%s668_s4] sm:$0xee] }
  0x14   : > { %v690_v41 = vunpack.c.l.bf16 %v280_v35  ;;  %v692_v42 = vunpack.c.h.bf16 %v251_v23  ;;  %v706_v57 = vunpack.c.l.bf16 %v374_v50 }
  0x16   : > { %226 = vrot.lane.b32.xlu1 %v223_v6, %s603_s18  ;;  %193 = vrot.lane.b32.xlu0 %v190_v7, %s604_s21 }
  0x17   : > { %289 = vrot.lane.b32.xlu2 %v286_v8, %s604_s21 }
  0x1e   : > { %335 = vrot.lane.b32.xlu1 %v332_v10, %s603_s18  ;;  %333 = vrot.lane.b32.xlu0 %v331_v11, %s603_s18  ;;  %v403_v10 = vld [vmem:[%s668_s4 + $0x8] sm:$0xe] }
  0x1f   : > { %410 = vrot.lane.b32.xlu2 %v408_v13, %s604_s21 }
  0x26   : > { %456 = vrot.lane.b32.xlu1 %v454_v15, %s603_s18  ;;  %412 = vrot.lane.b32.xlu0 %v409_v16, %s604_s21 }
  0x27   : > { %458 = vrot.lane.b32.xlu2 %v455_v17, %s603_s18  ;;  %v406_v17 = vunpack.c.l.bf16 %v403_v10 }
  0x69   : > { %v288_v24 = vpop.permute.xlu2 %287 }
  0x6a   : > { %v295_v30 = vmul.f32 %v288_v24, %v671_v19  ;;  %v298_v31 = vmul.f32 %v288_v24, %v677_v26 }
  0x6c   : > { %v307_v38 = vrot.slane %v295_v30, 1  ;;  %v308_v39 = vrot.slane %v298_v31, 1 }
  0x6e   : > { %v309_v48 = vsel %vm269_vm2, %v307_v38, %v308_v39 }
  0x71   : > { %v290_v40 = vpop.permute.xlu2 %289 }
  0x72   : > { %v291_v45 = vsel %vm195_vm0, %v288_v24, %v290_v40  ;;  %v297_v46 = vmul.f32 %v290_v40, %v187_v27  ;;  %v300_v47 = vmul.f32 %v290_v40, %v690_v41 }
  0x73   : > { %v296_v54 = vmul.f32 %v291_v45, %v679_v28  ;;  %v299_v55 = vmul.f32 %v291_v45, %v692_v42 }
  0x74   : > { %v313_v58 = vrot.slane %v297_v46, 1  ;;  %v314_v59 = vrot.slane %v300_v47, 1 }
  0x75   : > { %v310_v63 = vrot.slane %v296_v54, 1  ;;  %v311_v0 = vrot.slane %v299_v55, 1 }
  0x76   : > { %v315_v6 = vsel %vm269_vm2, %v313_v58, %v314_v59 }
  0x77   : > { %v312_v11 = vsel %vm269_vm2, %v310_v63, %v311_v0 }
  0x79   : > { %v411_v62 = vpop.permute.xlu2 %410 }
  0x7a   : > { %v418_v4 = vmul.f32 %v411_v62, %v706_v57  ;;  %v421_v5 = vmul.f32 %v411_v62, %v677_v26 }
  0x7c   : > { %v430_v14 = vrot.slane %v418_v4, 2  ;;  %v431_v15 = vrot.slane %v421_v5, 2 }
  0x7e   : > { %v432_v25 = vsel %vm392_vm3, %v430_v14, %v431_v15  ;;  %v577_v14 = vld [vmem:[%s796_s1 + $0x6] ss:$8 sm:$0x3] }
  0x80   : > { %v192_v20 = vpop.permute.xlu0 %191  ;;  %v225_v21 = vpop.permute.xlu1 %224 }
  0x81   : > { %v200_v22 = vmul.f32 %v192_v20, %v671_v19  ;;  %v233_v29 = vmul.f32 %v225_v21, %v671_v19  ;;  %v459_v35 = vpop.permute.xlu2 %458 }
  0x82   : > { %v466_v46 = vmul.f32 %v459_v35, %v406_v17  ;;  %v469_v47 = vmul.f32 %v459_v35, %v690_v41 }
  0x83   : > { %206 = vrot.lane.b32.xlu0 %v200_v22, %s605_s5 }
  0x88   : > { %v194_v32 = vpop.permute.xlu0 %193  ;;  %v227_v37 = vpop.permute.xlu1 %226 }
  0x89   : > { %v196_v33 = vsel %vm195_vm0, %v192_v20, %v194_v32  ;;  %v202_v34 = vmul.f32 %v194_v32, %v187_v27  ;;  %v229_v43 = vsel %vm228_vm1, %v225_v21, %v227_v37  ;;  %v235_v44 = vmul.f32 %v227_v37, %v187_v27 }
  0x8a   : > { %v201_v36 = vmul.f32 %v196_v33, %v679_v28  ;;  %v234_v53 = vmul.f32 %v229_v43, %v679_v28  ;;  %v722_v21 = vunpack.c.h.bf16 %v374_v50 }
  0x8b   : > { %210 = vrot.lane.b32.xlu2 %v202_v34, %s605_s5  ;;  %239 = vrot.lane.b32.xlu0 %v233_v29, %s603_s18 }
  0x8c   : > { %208 = vrot.lane.b32.xlu1 %v201_v36, %s605_s5 }
  0x90   : > { %v334_v49 = vpop.permute.xlu0 %333  ;;  %v336_v56 = vpop.permute.xlu1 %335 }
  0x91   : > { %v341_v51 = vmul.f32 %v334_v49, %v671_v19  ;;  %v344_v52 = vmul.f32 %v334_v49, %v677_v26  ;;  %v337_v1 = vsel %vm228_vm1, %v334_v49, %v336_v56  ;;  %v343_v2 = vmul.f32 %v336_v56, %v187_v27 }
  0x92   : > { %v346_v3 = vmul.f32 %v336_v56, %v690_v41  ;;  %v342_v8 = vmul.f32 %v337_v1, %v679_v28  ;;  %v345_v9 = vmul.f32 %v337_v1, %v692_v42 }
  0x93   : > { %243 = vrot.lane.b32.xlu2 %v235_v44, %s603_s18  ;;  %316 = vrot.lane.b32.xlu0 %v309_v48, %s605_s5  ;;  %v353_v60 = vrot.slane %v341_v51, 1  ;;  %v354_v61 = vrot.slane %v344_v52, 1  ;;  %v359_v12 = vrot.slane %v343_v2, 1  ;;  %v482_v52 = vrot.slane %v466_v46, 2 }
  0x94   : > { %241 = vrot.lane.b32.xlu1 %v234_v53, %s603_s18  ;;  %v360_v13 = vrot.slane %v346_v3, 1  ;;  %v356_v18 = vrot.slane %v342_v8, 1  ;;  %v357_v20 = vrot.slane %v345_v9, 1  ;;  %v483_v53 = vrot.slane %v469_v47, 2 }
  0x95   : > { %v355_v7 = vsel %vm269_vm2, %v353_v60, %v354_v61  ;;  %v574_v2 = vld [vmem:[%s796_s1 + $0x3] ss:$8 sm:$0x3]  ;;  %v172_v3 = vld [vmem:[%s796_s1] ss:$8 sm:$0x3] }
  0x96   : > { %v361_v24 = vsel %vm269_vm2, %v359_v12, %v360_v13  ;;  %v358_v32 = vsel %vm269_vm2, %v356_v18, %v357_v20  ;;  %v257_v4 = vperm.slane %v574_v2, 0  ;;  %v258_v5 = vperm.slane %v574_v2, 1 }
  0x98   : > { %v413_v16 = vpop.permute.xlu0 %412  ;;  %v457_v22 = vpop.permute.xlu1 %456  ;;  %v262_v9 = vmul.f32 %v258_v5, %v679_v28  ;;  %v263_v10 = vmul.f32 %v257_v4, %v677_v26  ;;  %v261_v13 = vmul.f32 %v257_v4, %v671_v19 }
  0x99   : > { %v414_v23 = vsel %vm195_vm0, %v411_v62, %v413_v16  ;;  %v420_v27 = vmul.f32 %v413_v16, %v406_v17  ;;  %v423_v29 = vmul.f32 %v413_v16, %v690_v41  ;;  %v464_v30 = vmul.f32 %v457_v22, %v706_v57 }
  0x9a   : > { %v467_v31 = vmul.f32 %v457_v22, %v677_v26  ;;  %v419_v33 = vmul.f32 %v414_v23, %v722_v21  ;;  %v422_v34 = vmul.f32 %v414_v23, %v692_v42  ;;  %v460_v44 = vsel %vm228_vm1, %v457_v22, %v459_v35 }
  0x9b   : > { %320 = vrot.lane.b32.xlu2 %v315_v6, %s605_s5  ;;  %362 = vrot.lane.b32.xlu0 %v355_v7, %s603_s18  ;;  %v436_v36 = vrot.slane %v420_v27, 2  ;;  %v437_v37 = vrot.slane %v423_v29, 2  ;;  %v476_v38 = vrot.slane %v464_v30, 2  ;;  %v465_v50 = vmul.f32 %v460_v44, %v722_v21 }
  0x9c   : > { %318 = vrot.lane.b32.xlu1 %v312_v11, %s605_s5  ;;  %v477_v39 = vrot.slane %v467_v31, 2  ;;  %v433_v40 = vrot.slane %v419_v33, 2  ;;  %v434_v43 = vrot.slane %v422_v34, 2  ;;  %v468_v51 = vmul.f32 %v460_v44, %v692_v42 }
  0x9d   : > { %v438_v45 = vsel %vm392_vm3, %v436_v36, %v437_v37  ;;  %v479_v54 = vrot.slane %v465_v50, 2  ;;  %v484_v41 = vsel %vm392_vm3, %v482_v52, %v483_v53  ;;  %v176_v6 = vperm.slane %v172_v3, 0 }
  0x9e   : > { %v478_v48 = vsel %vm392_vm3, %v476_v38, %v477_v39  ;;  %v435_v49 = vsel %vm392_vm3, %v433_v40, %v434_v43  ;;  %v480_v55 = vrot.slane %v468_v51, 2  ;;  %v177_v7 = vperm.slane %v172_v3, 1 }
  0x9f   : > { %v264_v11 = vmul.f32 %v258_v5, %v692_v42  ;;  %v180_v16 = vmul.f32 %v176_v6, %v671_v19  ;;  %v271_v22 = vrot.slane %v263_v10, 1  ;;  %v273_v23 = vrot.slane %v262_v9, 1 }
  0xa0   : > { %v481_v56 = vsel %vm392_vm3, %v479_v54, %v480_v55  ;;  %v181_v17 = vmul.f32 %v177_v7, %v679_v28  ;;  %v270_v30 = vrot.slane %v261_v13, 1  ;;  %v381_v31 = vperm.slane %v577_v14, 1 }
  0xa2   : > { %v272_v38 = vsel %vm269_vm2, %v270_v30, %v271_v22  ;;  %v385_v39 = vmul.f32 %v381_v31, %v722_v21  ;;  %v387_v40 = vmul.f32 %v381_v31, %v692_v42 }
  0xa3   : > { %366 = vrot.lane.b32.xlu2 %v361_v24, %s603_s18  ;;  %439 = vrot.lane.b32.xlu0 %v432_v25, %s605_s5  ;;  %v274_v24 = vrot.slane %v264_v11, 1  ;;  %v380_v25 = vperm.slane %v577_v14, 0 }
  0xa4   : > { %364 = vrot.lane.b32.xlu1 %v358_v32, %s603_s18  ;;  %v396_v51 = vrot.slane %v385_v39, 2  ;;  %v397_v52 = vrot.slane %v387_v40, 2 }
  0xa5   : > { %v384_v28 = vmul.f32 %v380_v25, %v706_v57  ;;  %v386_v36 = vmul.f32 %v380_v25, %v677_v26  ;;  %v275_v37 = vsel %vm269_vm2, %v273_v23, %v274_v24 }
  0xa7   : > { %v394_v57 = vrot.slane %v386_v36, 2 }
  0xab   : > { %443 = vrot.lane.b32.xlu2 %v438_v45, %s605_s5  ;;  %485 = vrot.lane.b32.xlu0 %v478_v48, %s603_s18 }
  0xac   : > { %441 = vrot.lane.b32.xlu1 %v435_v49, %s605_s5  ;;  %v393_v49 = vrot.slane %v384_v28, 2 }
  0xb3   : > { %489 = vrot.lane.b32.xlu2 %v484_v41, %s603_s18  ;;  %v395_v41 = vsel %vm392_vm3, %v393_v49, %v394_v57 }
  0xb4   : > { %487 = vrot.lane.b32.xlu1 %v481_v56, %s603_s18  ;;  %v398_v56 = vsel %vm392_vm3, %v396_v51, %v397_v52 }
  0xe5   : > { %v211_v58 = vpop.permute.xlu2 %210 }
  0xed   : > { %v244_v60 = vpop.permute.xlu2 %243 }
  0xf5   : > { %v207_v59 = vpop.permute.xlu0 %206  ;;  %v321_v0 = vpop.permute.xlu2 %320 }
  0xfd   : > { %v240_v61 = vpop.permute.xlu0 %239  ;;  %v367_v15 = vpop.permute.xlu2 %366 }
  0xfe   : > { %v209_v62 = vpop.permute.xlu1 %208 }
  0xff   : > { %v213_v18 = vsel %vm212_vm4, %v207_v59, %v209_v62  ;;  %v214_v20 = vsel %vm212_vm4, %v209_v62, %v211_v58 }
 0x100   : > { %v217_v32 = vadd.f32 %v213_v18, %v180_v16  ;;  %v218_v33 = vadd.f32 %v214_v20, %v181_v17 }
 0x105   : > { %v317_v1 = vpop.permute.xlu0 %316  ;;  %v444_v46 = vpop.permute.xlu2 %443 }
 0x106   : > { %v242_v63 = vpop.permute.xlu1 %241 }
 0x107   : > { %v245_v27 = vsel %vm228_vm1, %v240_v61, %v242_v63  ;;  %v246_v29 = vsel %vm228_vm1, %v242_v63, %v244_v60  ;;  %v497_v60 = vld [vmem:[%s797_s2] sm:$0x3] }
 0x108   : > { %v249_v19 = vadd.f32 %v245_v27, %v217_v32  ;;  %v250_v35 = vadd.f32 %v246_v29, %v218_v33  ;;  %v499_v3 = vperm.slane %v497_v60, 0  ;;  %v500_v4 = vperm.slane %v497_v60, 1 }
 0x10a   : > { %v278_v47 = vadd.f32 %v272_v38, %v249_v19  ;;  %v279_v48 = vadd.f32 %v275_v37, %v250_v35 }
 0x10d   : > { %v363_v12 = vpop.permute.xlu0 %362 }
 0x10e   : > { %v319_v8 = vpop.permute.xlu1 %318 }
 0x10f   : > { %v322_v44 = vsel %vm212_vm4, %v317_v1, %v319_v8  ;;  %v323_v45 = vsel %vm212_vm4, %v319_v8, %v321_v0  ;;  %v490_v0 = vpop.permute.xlu2 %489 }
 0x110   : > { %v326_v53 = vadd.f32 %v322_v44, %v278_v47  ;;  %v327_v21 = vadd.f32 %v323_v45, %v279_v48 }
 0x115   : > { %v440_v43 = vpop.permute.xlu0 %439 }
 0x116   : > { %v365_v34 = vpop.permute.xlu1 %364 }
 0x117   : > { %v368_v26 = vsel %vm228_vm1, %v363_v12, %v365_v34  ;;  %v369_v50 = vsel %vm228_vm1, %v365_v34, %v367_v15 }
 0x118   : > { %v372_v42 = vadd.f32 %v368_v26, %v326_v53  ;;  %v373_v55 = vadd.f32 %v369_v50, %v327_v21 }
 0x11a   : > { %v401_v61 = vadd.f32 %v395_v41, %v372_v42  ;;  %v402_v62 = vadd.f32 %v398_v56, %v373_v55 }
 0x11d   : > { %v486_v63 = vpop.permute.xlu0 %485 }
 0x11e   : > { %v442_v54 = vpop.permute.xlu1 %441 }
 0x11f   : > { %v445_v58 = vsel %vm212_vm4, %v440_v43, %v442_v54  ;;  %v446_v59 = vsel %vm212_vm4, %v442_v54, %v444_v46 }
 0x120   : > { %v449_v1 = vadd.f32 %v445_v58, %v401_v61  ;;  %v450_v2 = vadd.f32 %v446_v59, %v402_v62 }
 0x126   : > { %v488_v5 = vpop.permute.xlu1 %487 }
 0x127   : > { %v491_v6 = vsel %vm228_vm1, %v486_v63, %v488_v5  ;;  %v492_v7 = vsel %vm228_vm1, %v488_v5, %v490_v0 }
 0x128   : > { %v495_v8 = vadd.f32 %v491_v6, %v449_v1  ;;  %v496_v9 = vadd.f32 %v492_v7, %v450_v2 }
 0x12a   : > { %v503_v10 = vadd.f32 %v499_v3, %v495_v8  ;;  %v504_v11 = vadd.f32 %v500_v4, %v496_v9 }
 0x12c   : > { %v505_v12 = vmax.f32 %v503_v10, 0.0  ;;  %v506_v13 = vmax.f32 %v504_v11, 0.0 }
 0x12e   : > { %v507_v14 = vpack.c.bf16 %v506_v13, %v505_v12 }
 0x130   : > { %508 = vst [vmem:[%s170_s19] sm:$0xff] %v507_v14 }
 0x131 PF: > { %s13_s12 = sadd.s32 1, %s601_s12  }
 0x132   : > { %p10_p4 = scmp.ge.s32.totalorder %s13_s12, 4  }
 0x134   :  { %12 = sbr.rel (!%p10_p4) target bundleno = 1 (0x1), region = 70 }

// kernel: forward.9
= control target key start
LH: loop header
LB: loop body
LE: loop exit
PB: predicated region body
PF: predicated region fallthrough
CT: control target
= control target key end

     0   :  { %s515_s12 = smov 0   ;;  %s517_s13 = smov 0   ;;  %s557_s0 = inlined_call_operand.vmem [shape: bf16[2,4,8,32], index: 0, kind: input, shape index: {}]   ;;  %s558_s1 = inlined_call_operand.vmem [shape: bf16[1,32,128], index: 1, kind: input, shape index: {}]   ;;  %s559_s2 = inlined_call_operand.vmem [shape: f32[1,128], index: 2, kind: input, shape index: {}]   ;;  %s560_s3 = inlined_call_operand.vmem [shape: bf16[2,32,128], index: 3, kind: output, shape index: {}]  }
   0x1   :  { %s519_s14 = smov 0  }
   0x2 LB: > { %s25_s15 = sadd.s32 1, %s489_s13  ;;  %p402_p0 = scmp.ge.s32.totalorder %s493_s14, 1  ;;  %s493_s14 = sphi %s519_s14, %s13_s14   ;;  %s489_s13 = sphi %s517_s13, %s562_s13   ;;  %s485_s12 = sphi %s515_s12, %s561_s12  }
   0x3   : > { %p27_p1 = scmp.ge.s32.totalorder %s25_s15, 2  ;;  %p168_p2 = scmp.lt.s32.totalorder %s493_s14, 3 }
   0x5   : > { %s564_s15 = smov (%p27_p1, %s25_s15), 0  ;;  %p169_p3 = pnand %p402_p0, %p168_p2 }
   0x6   : > { %p202_p4 = scmp.lt.s32.totalorder (!%p169_p3), %s485_s12, 1 }
   0x7   : > { %172 = sbr.rel (%p169_p3) target bundleno = 160 (0xa0), region = 32 }
   0xc   : > { %v432_v0 = vld [vmem:[%s558_s1 + $0x8] sm:$0xff]  ;;  %v431_v1 = vld [vmem:[%s558_s1] sm:$0xff]  ;;  %s566_s12 = smov (!%p202_p4, %s485_s12), 1  ;;  %vm257_vm0 = vcmask 261120  }
   0xd   : > { %270 = vmatpush.bf16.msra.mxu0 %v432_v0  ;;  %444 = vmatpush.bf16.msra.mxu1 %v432_v0  ;;  %s427_s20 = sshll.u32 %s566_s12, 4  ;;  %v470_v6 = vld [vmem:[%s559_s2] ss:$0 sm:$0xff] }
   0xe   : > { %s206_s23 = scalar_lea.vmem %s557_s0, %s427_s20  ;;  %s221_s28 = scalar_lea.vmem %s560_s3, %s427_s20 }
   0xf   : > { %v429_v2 = vld [vmem:[%s206_s23] sm:$0xff]  ;;  %v430_v3 = vld [vmem:[%s206_s23 + $0x8] sm:$0xff] }
  0x11   : > { %271 = vmatpush.bf16.msra.mxu0 %v431_v1  ;;  %445 = vmatpush.bf16.msra.mxu1 %v431_v1 }
  0x14   : > { %423 = vmatmul.msk.bf16.vlgmr.msra.gmra.mxu0 %vm257_vm0, %v429_v2  ;;  %424 = vmatmul.msk.bf16.vlgmr.msra.gmra.mxu1 %vm257_vm0, %v430_v3 }
  0x91   : > { %v273_v4 = vpop.f32.mrf.mxu0  ;;  %v278_v5 = vpop.f32.mrf.mxu1 }
  0x92   : > { %v274_v9 = vadd.f32 %v470_v6, %v273_v4  ;;  %v279_v10 = vadd.f32 %v470_v6, %v278_v5 }
  0x99   : > { %v275_v7 = vpop.f32.mrf.mxu0  ;;  %v280_v8 = vpop.f32.mrf.mxu1 }
  0x9a   : > { %v276_v11 = vadd.f32 %v470_v6, %v275_v7  ;;  %v281_v12 = vadd.f32 %v470_v6, %v280_v8 }
  0x9c   : > { %v436_v13 = vpack.c.bf16 %v276_v11, %v274_v9  ;;  %v441_v14 = vpack.c.bf16 %v281_v12, %v279_v10 }
  0x9e   : > { %437 = vst [vmem:[%s221_s28] sm:$0xff] %v436_v13  }
  0x9f   : > { %443 = vst [vmem:[%s221_s28 + $0x8] sm:$0xff] %v441_v14  }
  0xa0 PF: > { %s13_s14 = sadd.s32 1, %s493_s14   ;;  %s561_s12 = smov %s489_s13 }
  0xa1   : > { %p10_p5 = scmp.ge.s32.totalorder %s13_s14, 4   ;;  %s562_s13 = smov %s564_s15 }
  0xa3   :  { %12 = sbr.rel (!%p10_p5) target bundleno = 2 (0x2), region = 68 }

// kernel: forward.10
= control target key start
LH: loop header
LB: loop body
LE: loop exit
PB: predicated region body
PF: predicated region fallthrough
CT: control target
= control target key end

     0   :  { %s459_s18 = smov 0   ;;  %s507_s0 = inlined_call_operand.vmem [shape: bf16[2,16,32], index: 0, kind: input, shape index: {}]   ;;  %s508_s1 = inlined_call_operand.vmem [shape: f32[32,8], index: 1, kind: input, shape index: {}]   ;;  %s509_s2 = inlined_call_operand.vmem [shape: f32[1,8], index: 2, kind: input, shape index: {}]   ;;  %s510_s3 = inlined_call_operand.vmem [shape: f32[8,32], index: 3, kind: input, shape index: {}]   ;;  %s511_s4 = inlined_call_operand.vmem [shape: f32[1,32], index: 4, kind: input, shape index: {}]   ;;  %s512_s5 = inlined_call_operand.vmem [shape: bf16[2,16,32], index: 5, kind: output, shape index: {}]  }
   0x1 LB: > { %s386_s19 = sadd.s32 4294967295, %s426_s18   ;;  %p390_p0 = scmp.ge.s32.totalorder %s426_s18, 1  ;;  %s426_s18 = sphi %s459_s18, %s15_s18  }
   0x2   : > { %p187_p1 = scmp.lt.s32.totalorder %s426_s18, 3 }
   0x4   : > { %p188_p2 = pnand %p390_p0, %p187_p1 }
   0x5   : > { %p215_p3 = scmp.lt.s32.totalorder (!%p188_p2), %s386_s19, 1 }
   0x6   : > { %191 = sbr.rel (%p188_p2) target bundleno = 332 (0x14c), region = 40 }
   0xb   : > { %v250_v0 = vld [vmem:[%s508_s1 + $0x18] sm:$0xff]  ;;  %v249_v1 = vld [vmem:[%s508_s1 + $0x10] sm:$0xff]  ;;  %v428_v2 = vmov 16.0   ;;  %v248_v3 = vld [vmem:[%s508_s1 + $0x8] sm:$0xff]  ;;  %s514_s19 = smov (!%p215_p3, %s386_s19), 1  ;;  %vm229_vm0 = vcmask 261120  }
   0xc   : > { %267 = vmatpush.msra.mxu0 %v250_v0  ;;  %414 = vrcp.f32 %v428_v2  ;;  %v247_v4 = vld [vmem:[%s508_s1] sm:$0xff]  ;;  %s399_s28 = sshll.u32 %s514_s19, 3  ;;  %vm278_vm2 = vcmask 64512   ;;  %vm328_vm7 = vcmask 257024  }
   0xd   : > { %s219_s6 = scalar_lea.vmem %s507_s0, %s399_s28  ;;  %v276_v24 = vld [vmem:[%s510_s3] sm:$0xff]  ;;  %s224_s15 = scalar_lea.vmem %s512_s5, %s399_s28 }
   0xe   : > { %268 = vmatpush.msra.mxu0 %v249_v1  ;;  %v402_v5 = vld [vmem:[%s219_s6] sm:$0xff]   ;;  %297 = vmatpush.msra.mxu1 %v276_v24 }
   0xf   : > { %v403_v7 = vunpack.c.l.bf16 %v402_v5  ;;  %v404_v8 = vunpack.c.h.bf16 %v402_v5  ;;  %v251_v25 = vld [vmem:[%s509_s2] sm:$0x1] }
  0x10   : > { %269 = vmatpush.msra.mxu0 %v248_v3  ;;  %v277_v29 = vld [vmem:[%s511_s4] sm:$0x1] }
  0x11   : > { %v230_v10 = vsel %vm229_vm0, %v403_v7, 0.0  ;;  %v231_v11 = vsel %vm229_vm0, %v404_v8, 0.0 }
  0x12   : > { %v415_v6 = vpop.eup %414  ;;  %270 = vmatpush.msra.mxu0 %v247_v4  ;;  %v232_v12 = vadd.f32 %v231_v11, %v230_v10 }
  0x13   : > { %v240_v9 = vmul.f32 16.0, %v415_v6  ;;  %vm244_vm1 = vweird.f32 %v415_v6 }
  0x14   : > { %v233_v14 = vrot.slane %v232_v12, 4 }
  0x15   : > { %v241_v13 = vsub.f32 1.0, %v240_v9 }
  0x16   : > { %v234_v16 = vadd.f32 %v233_v14, %v232_v12 }
  0x17   : > { %v242_v15 = vmul.f32 %v415_v6, %v241_v13 }
  0x18   : > { %v235_v17 = vrot.slane %v234_v16, 2 }
  0x19   : > { %v243_v18 = vadd.f32 %v415_v6, %v242_v15 }
  0x1a   : > { %v236_v19 = vadd.f32 %v235_v17, %v234_v16 }
  0x1b   : > { %v245_v21 = vsel %vm244_vm1, %v415_v6, %v243_v18 }
  0x1c   : > { %v237_v20 = vrot.slane %v236_v19, 1 }
  0x1e   : > { %v238_v22 = vadd.f32 %v237_v20, %v236_v19 }
  0x20   : > { %v246_v23 = vmul.f32 %v245_v21, %v238_v22 }
  0x22   : > { %395 = vmatmul.msk.f32.vlgmr.msra.gmra.mxu0 %vm229_vm0, %v246_v23 }
  0x9f   : > { %v272_v26 = vpop.f32.mrf.mxu0 }
  0xa0   : > { %v273_v27 = vadd.f32 %v272_v26, %v251_v25 }
  0xa2   : > { %v275_v28 = vmax.f32 %v273_v27, 0.0 }
  0xa4   : > { %396 = vmatmul.msk.f32.vlgmr.msra.gmra.mxu1 %vm278_vm2, %v275_v28 }
 0x121   : > { %v299_v30 = vpop.f32.mrf.mxu1 }
 0x122   : > { %v300_v31 = vadd.f32 %v299_v30, %v277_v29 }
 0x124   : > { %v302_v32 = vsub.f32 0.0, %v300_v31 }
 0x126   : > { %v303_v33 = vmul.f32 1.442695, %v302_v32 }
 0x128   : > { %416 = vpow2.f32 %v303_v33 }
 0x12e   : > { %v417_v34 = vpop.eup %416 }
 0x12f   : > { %v305_v35 = vadd.f32 1.0, %v417_v34 }
 0x131   : > { %418 = vrcp.f32 %v305_v35  ;;  %v317_v39 = vand.u32 2147483648, %v305_v35  ;;  %v315_v41 = vand.u32 2147483647, %v305_v35  ;;  %vm311_vm4 = vweird.f32 %v305_v35 }
 0x133   : > { %v318_v43 = vor.u32 1.1754944e-38, %v317_v39  ;;  %vm316_vm6 = vcmp.eq.f32.partialorder %v315_v41, 8.507059e+37 }
 0x137   : > { %v419_v36 = vpop.eup %418 }
 0x138   : > { %v307_v37 = vmul.f32 %v419_v36, %v305_v35  ;;  %vm312_vm3 = vweird.f32 %v419_v36 }
 0x139   : > { %vm313_vm5 = vmor %vm311_vm4, %vm312_vm3 }
 0x13a   : > { %v308_v38 = vsub.f32 1.0, %v307_v37 }
 0x13c   : > { %v309_v40 = vmul.f32 %v419_v36, %v308_v38 }
 0x13e   : > { %v310_v42 = vadd.f32 %v419_v36, %v309_v40 }
 0x140   : > { %v314_v44 = vsel %vm313_vm5, %v419_v36, %v310_v42 }
 0x141   : > { %v319_v45 = vsel %vm316_vm6, %v318_v43, %v314_v44 }
 0x142   : > { %v321_v46 = vperm.slane %v319_v45, 0 }
 0x144   : > { %v322_v47 = vmul.f32 %v403_v7, %v321_v46  ;;  %v323_v48 = vmul.f32 %v404_v8, %v321_v46 }
 0x146   : > { %v324_v49 = vmax.f32 %v322_v47, 0.0  ;;  %v325_v50 = vmax.f32 %v323_v48, 0.0 }
 0x148   : > { %v326_v51 = vpack.c.bf16 %v324_v49, %v324_v49  ;;  %v327_v52 = vpack.c.bf16 %v325_v50, %v325_v50 }
 0x14a   : > { %329 = vst.msk [vmem:[%s224_s15] sm:$0xf] %vm328_vm7, %v326_v51 }
 0x14b   : > { %330 = vst.msk [vmem:[%s224_s15 + $0x4] sm:$0xf] %vm328_vm7, %v327_v52 }
 0x14c PF: > { %s15_s18 = sadd.s32 1, %s426_s18  }
 0x14d   : > { %p12_p4 = scmp.ge.s32.totalorder %s15_s18, 4  }
 0x14f   :  { %14 = sbr.rel (!%p12_p4) target bundleno = 1 (0x1), region = 70 }

// kernel: forward.8
= control target key start
LH: loop header
LB: loop body
LE: loop exit
PB: predicated region body
PF: predicated region fallthrough
CT: control target
= control target key end

     0   :  { %s410_s12 = smov 0   ;;  %s476_s0 = inlined_call_operand.vmem [shape: bf16[8,5,160], index: 0, kind: input, shape index: {}]   ;;  %s477_s1 = inlined_call_operand.vmem [shape: f32[9,128], index: 1, kind: input, shape index: {}]   ;;  %s478_s2 = inlined_call_operand.vmem [shape: f32[1,128], index: 2, kind: input, shape index: {}]   ;;  %s479_s3 = inlined_call_operand.vmem [shape: bf16[2,4,128], index: 3, kind: output, shape index: {}]  }
   0x1 LB: > { %s416_s13 = sadd.s32 4294967295, %s386_s12   ;;  %p347_p0 = scmp.ge.s32.totalorder %s386_s12, 1  ;;  %s386_s12 = sphi %s410_s12, %s13_s12  }
   0x2   : > { %p139_p1 = scmp.lt.s32.totalorder %s386_s12, 3 }
   0x4   : > { %p140_p2 = pnand %p347_p0, %p139_p1 }
   0x5   : > { %s388_s18 = smov (!%p140_p2), 32   ;;  %s348_s21 = sshll.u32 (!%p140_p2), %s416_s13, 2 }
   0x6   : > { %143 = sbr.rel (%p140_p2) target bundleno = 268 (0x10c), region = 32  ;;  %p164_p3 = scmp.lt.s32.totalorder (!%p140_p2), %s348_s21, 7 }
   0x7   : > { %s389_s26 = smov (!%p140_p2), 96   ;;  %p170_p4 = scmp.lt.s32.totalorder (!%p140_p2), %s416_s13, 1 }
   0xb   : > { %v370_v0 = vld [vmem:[%s477_s1 + $0x2] ss:$0 sm:$0xff]  ;;  %v371_v1 = vld [vmem:[%s477_s1 + $0x8] ss:$0 sm:$0xff]  ;;  %v372_v2 = vld [vmem:[%s477_s1 + $0x5] ss:$0 sm:$0xff] }
   0xc   : > { %193 = vrot.lane.b32.xlu0 %v370_v0, %s388_s18  ;;  %266 = vrot.lane.b32.xlu1 %v371_v1, %s388_s18  ;;  %s481_s21 = smov (!%p164_p3, %s348_s21), 7  ;;  %v373_v25 = vld [vmem:[%s477_s1] ss:$0 sm:$0xff]  ;;  %v374_v26 = vld [vmem:[%s477_s1 + $0x1] ss:$0 sm:$0xff]  ;;  %vm204_vm0 = vcmask 785408  }
   0xd   : > { %s359_s22 = sshll.u32 %s481_s21, 3  ;;  %v375_v34 = vld [vmem:[%s477_s1 + $0x3] ss:$0 sm:$0xff]  ;;  %v376_v41 = vld [vmem:[%s477_s1 + $0x4] ss:$0 sm:$0xff]  ;;  %s483_s13 = smov (!%p170_p4, %s416_s13), 1 }
   0xe   : > { %s433_s25 = scalar_lea.vmem %s476_s0, %s359_s22  ;;  %v377_v43 = vld [vmem:[%s477_s1 + $0x6] ss:$0 sm:$0xff]  ;;  %v378_v48 = vld [vmem:[%s477_s1 + $0x7] ss:$0 sm:$0xff]  ;;  %v379_v63 = vld [vmem:[%s478_s2] ss:$0 sm:$0xff] }
   0xf   : > { %v187_v3 = vld [vmem:[%s433_s25] sm:$0x33]  ;;  %v355_v12 = vld [vmem:[%s433_s25 + $0x10] sm:$0x33]  ;;  %v352_v24 = vld [vmem:[%s433_s25 + $0x8] sm:$0x3] }
  0x10   : > { %v189_v4 = vunpack.c.l.bf16 %v187_v3  ;;  %v190_v5 = vunpack.c.h.bf16 %v187_v3  ;;  %v260_v6 = vld [vmem:[%s433_s25] sm:$0x77]  ;;  %v224_v14 = vunpack.c.l.bf16 %v355_v12  ;;  %v225_v15 = vunpack.c.h.bf16 %v355_v12  ;;  %v353_v29 = vld [vmem:[%s433_s25 + $0x10] sm:$0x3]  ;;  %v354_v36 = vld [vmem:[%s433_s25 + $0x18] sm:$0x3] }
  0x11   : > { %v262_v8 = vunpack.c.l.bf16 %v260_v6  ;;  %v263_v18 = vunpack.c.h.bf16 %v260_v6  ;;  %v174_v23 = vld [vmem:[%s433_s25] sm:$0x3]  ;;  %v183_v28 = vunpack.c.l.bf16 %v352_v24  ;;  %v211_v33 = vunpack.c.l.bf16 %v353_v29  ;;  %v356_v38 = vld [vmem:[%s433_s25 + $0x8] sm:$0x7]  ;;  %s351_s16 = sshll.u32 %s483_s13, 1 }
  0x12   : > { %v176_v27 = vunpack.c.l.bf16 %v174_v23  ;;  %v242_v35 = vld [vmem:[%s433_s25] sm:$0x7]  ;;  %v218_v44 = vunpack.c.l.bf16 %v354_v36  ;;  %v253_v47 = vunpack.c.l.bf16 %v356_v38  ;;  %s173_s19 = scalar_lea.vmem %s479_s3, %s351_s16 }
  0x13   : > { %v185_v32 = vmul.f32 %v374_v26, %v183_v28  ;;  %v213_v39 = vmul.f32 %v375_v34, %v211_v33  ;;  %v244_v42 = vunpack.c.l.bf16 %v242_v35 }
  0x14   : > { %228 = vrot.lane.b32.xlu0 %v372_v2, %s388_s18  ;;  %v178_v31 = vmul.f32 %v373_v25, %v176_v27  ;;  %v220_v52 = vmul.f32 %v376_v41, %v218_v44  ;;  %v255_v53 = vmul.f32 %v378_v48, %v253_v47 }
  0x15   : > { %v246_v51 = vmul.f32 %v377_v43, %v244_v42 }
  0x16   : > { %v186_v37 = vadd.f32 %v185_v32, %v178_v31  ;;  %v257_v59 = vrot.slane %v255_v53, 1 }
  0x17   : > { %v248_v54 = vrot.slane %v246_v51, 1 }
  0x7e   : > { %v194_v7 = vpop.permute.xlu0 %193  ;;  %v267_v11 = vpop.permute.xlu1 %266 }
  0x7f   : > { %v196_v9 = vmul.f32 %v194_v7, %v189_v4  ;;  %v197_v10 = vmul.f32 %v194_v7, %v190_v5  ;;  %v269_v13 = vmul.f32 %v267_v11, %v262_v8  ;;  %v270_v21 = vmul.f32 %v267_v11, %v263_v18 }
  0x81   : > { %202 = vrot.lane.b32.xlu2 %v197_v10, %s389_s26  ;;  %200 = vrot.lane.b32.xlu1 %v196_v9, %s389_s26  ;;  %v273_v16 = vrot.slane %v269_v13, 1  ;;  %v274_v22 = vrot.slane %v270_v21, 1 }
  0x86   : > { %v229_v17 = vpop.permute.xlu0 %228 }
  0x87   : > { %v231_v19 = vmul.f32 %v229_v17, %v224_v14  ;;  %v232_v20 = vmul.f32 %v229_v17, %v225_v15 }
  0x89   : > { %237 = vrot.lane.b32.xlu0 %v232_v20, %s389_s26  ;;  %235 = vrot.lane.b32.xlu2 %v231_v19, %s389_s26 }
  0x8a   : > { %275 = vrot.lane.b32.xlu1 %v273_v16, %s389_s26 }
  0x91   : > { %277 = vrot.lane.b32.xlu2 %v274_v22, %s389_s26 }
  0xdb   : > { %v203_v30 = vpop.permute.xlu2 %202 }
  0xe3   : > { %v236_v49 = vpop.permute.xlu2 %235 }
  0xeb   : > { %v278_v62 = vpop.permute.xlu2 %277 }
  0xf3   : > { %v201_v40 = vpop.permute.xlu1 %200 }
  0xf4   : > { %v205_v45 = vsel %vm204_vm0, %v201_v40, %v203_v30 }
  0xf5   : > { %v207_v46 = vadd.f32 %v205_v45, %v186_v37 }
  0xf7   : > { %v214_v50 = vadd.f32 %v213_v39, %v207_v46 }
  0xf9   : > { %v221_v56 = vadd.f32 %v220_v52, %v214_v50 }
  0xfb   : > { %v238_v55 = vpop.permute.xlu0 %237 }
  0xfc   : > { %v239_v57 = vsel %vm204_vm0, %v236_v49, %v238_v55  ;;  %v276_v61 = vpop.permute.xlu1 %275 }
  0xfd   : > { %v241_v58 = vadd.f32 %v239_v57, %v221_v56  ;;  %v279_v1 = vsel %vm204_vm0, %v276_v61, %v278_v62 }
  0xff   : > { %v250_v60 = vadd.f32 %v248_v54, %v241_v58 }
 0x101   : > { %v259_v0 = vadd.f32 %v257_v59, %v250_v60 }
 0x103   : > { %v281_v2 = vadd.f32 %v279_v1, %v259_v0 }
 0x105   : > { %v286_v3 = vadd.f32 %v379_v63, %v281_v2 }
 0x107   : > { %v287_v4 = vmax.f32 %v286_v3, 0.0 }
 0x109   : > { %v288_v5 = vpack.c.bf16 %v287_v4, %v287_v4 }
 0x10b   : > { %289 = vst [vmem:[%s173_s19] sm:$0x3] %v288_v5 }
 0x10c PF: > { %s13_s12 = sadd.s32 1, %s386_s12  }
 0x10d   : > { %p10_p5 = scmp.ge.s32.totalorder %s13_s12, 4  }
 0x10f   :  { %12 = sbr.rel (!%p10_p5) target bundleno = 1 (0x1), region = 65 }

// kernel: forward.11
= control target key start
LH: loop header
LB: loop body
LE: loop exit
PB: predicated region body
PF: predicated region fallthrough
CT: control target
= control target key end

     0   :  { %s1422_s12 = smov 0   ;;  %s1424_s13 = smov 0   ;;  %s1692_s0 = inlined_call_operand.vmem [shape: bf16[2,6,10,32], index: 0, kind: input, shape index: {}]   ;;  %s1693_s1 = inlined_call_operand.vmem [shape: bf16[9,32,128], index: 1, kind: input, shape index: {}]   ;;  %s1694_s2 = inlined_call_operand.vmem [shape: f32[1,128], index: 2, kind: input, shape index: {}]   ;;  %s1695_s3 = inlined_call_operand.vmem [shape: bf16[2,32,128], index: 3, kind: output, shape index: {}]  }
   0x1   :  { %s1426_s14 = smov 0  }
   0x2 LB: > { %s25_s15 = sadd.s32 1, %s1396_s13  ;;  %p1118_p0 = scmp.ge.s32.totalorder %s1400_s14, 1  ;;  %s1400_s14 = sphi %s1426_s14, %s13_s14   ;;  %s1396_s13 = sphi %s1424_s13, %s1701_s13   ;;  %s1392_s12 = sphi %s1422_s12, %s1700_s12  }
   0x3   : > { %p27_p1 = scmp.ge.s32.totalorder %s25_s15, 2  ;;  %p168_p2 = scmp.lt.s32.totalorder %s1400_s14, 3 }
   0x5   : > { %s1703_s15 = smov (%p27_p1, %s25_s15), 0  ;;  %p169_p3 = pnand %p1118_p0, %p168_p2 }
   0x6   : > { %p202_p4 = scmp.lt.s32.totalorder (!%p169_p3), %s1392_s12, 1 }
   0x7   : > { %172 = sbr.rel (%p169_p3) target bundleno = 248 (0xf8), region = 32 }
   0xc   : > { %v1320_v0 = vld [vmem:[%s1693_s1 + $0x18] sm:$0xff]  ;;  %v1322_v1 = vld [vmem:[%s1693_s1 + $0x28] sm:$0xff]  ;;  %v1319_v3 = vld [vmem:[%s1693_s1 + $0x10] sm:$0xff]  ;;  %s1705_s12 = smov (!%p202_p4, %s1392_s12), 1  ;;  %vm235_vm0 = vsmask.f32 3328 }
   0xd   : > { %v1326_v2 = vld [vmem:[%s1693_s1 + $0x38] sm:$0xff]  ;;  %330 = vmatpush.bf16.msra.mxu0 %v1320_v0  ;;  %1350 = vmatpush.bf16.msra.mxu1 %v1320_v0  ;;  %v1318_v4 = vld [vmem:[%s1693_s1 + $0x8] sm:$0xff]  ;;  %v1321_v5 = vld [vmem:[%s1693_s1 + $0x20] sm:$0xff]  ;;  %s1352_s28 = smul.u32 48, %s1705_s12  ;;  %vm236_vm1 = vsmask.f32 7440 }
   0xe   : > { %456 = vmatpush.bf16.msra.mxu2 %v1322_v1  ;;  %517 = vmatpush.bf16.msra.mxu3 %v1326_v2  ;;  %v1325_v6 = vld [vmem:[%s1693_s1 + $0x30] sm:$0xff]  ;;  %v1328_v7 = vld [vmem:[%s1693_s1 + $0x48] sm:$0xff]  ;;  %v1336_v9 = vld [vmem:[%s1693_s1 + $0x78] sm:$0xff]  ;;  %vm402_vm2 = vcmask 1042432   ;;  %vm403_vm3 = vcmask 1046532   ;;  %vm317_vm6 = vcmask 261120  }
   0xf   : > { %v1334_v8 = vld [vmem:[%s1693_s1 + $0x68] sm:$0xff]  ;;  %s1476_s16 = scalar_lea.vmem %s1692_s0, %s1352_s28  ;;  %v1317_v10 = vld [vmem:[%s1693_s1] sm:$0xff]  ;;  %vm1506_vm4 = vmor %vm235_vm0, %vm236_vm1  ;;  %s1314_s8 = sshll.u32 %s1705_s12, 4 }
  0x10   : > { %v1327_v11 = vld [vmem:[%s1693_s1 + $0x40] sm:$0xff]  ;;  %v224_v13 = vld [vmem:[%s1476_s16 + $0x8] sm:$0xf]  ;;  %v1490_v15 = vld [vmem:[%s1476_s16 + $0xc] sm:$0x1]  ;;  %s221_s11 = scalar_lea.vmem %s1695_s3, %s1314_s8 }
  0x11   : > { %331 = vmatpush.bf16.msra.mxu0 %v1319_v3  ;;  %1351 = vmatpush.bf16.msra.mxu1 %v1319_v3  ;;  %v223_v12 = vld [vmem:[%s1476_s16] sm:$0xf]  ;;  %v1487_v14 = vld [vmem:[%s1476_s16 + $0x4] sm:$0x1]  ;;  %v253_v19 = vshrl.u32 %v224_v13, 16  ;;  %v256_v20 = vshll.u32 %v224_v13, 16  ;;  %vm1515_vm5 = vmor %vm402_vm2, %vm403_vm3 }
  0x12   : > { %457 = vmatpush.bf16.msra.mxu2 %v1321_v5  ;;  %v239_v16 = vshrl.u32 %v223_v12, 16  ;;  %v242_v17 = vshll.u32 %v223_v12, 16  ;;  %v248_v18 = vshll.u32 %v1487_v14, 16  ;;  %518 = vmatpush.bf16.msra.mxu3 %v1325_v6  ;;  %v262_v21 = vshll.u32 %v1490_v15, 16  ;;  %v225_v22 = vld [vmem:[%s1476_s16 + $0x10] sm:$0xf] }
  0x13   : > { %v226_v23 = vld [vmem:[%s1476_s16 + $0x18] sm:$0xf]  ;;  %v255_v27 = vrot.slane %v253_v19, 4  ;;  %v1497_v28 = vld [vmem:[%s1476_s16 + $0x14] sm:$0x1]  ;;  %v258_v29 = vrot.slane %v256_v20, 5 }
  0x14   : > { %v241_v24 = vrot.slane %v239_v16, 4  ;;  %v244_v25 = vrot.slane %v242_v17, 5  ;;  %v250_v26 = vrot.slane %v248_v18, 5  ;;  %v264_v30 = vrot.slane %v262_v21, 5  ;;  %v1500_v31 = vld [vmem:[%s1476_s16 + $0x1c] sm:$0x1] }
  0x15   : > { %377 = vmatpush.bf16.msrb.mxu1 %v1318_v4  ;;  %633 = vmatpush.bf16.msrb.mxu0 %v1328_v7  ;;  %v267_v32 = vshrl.u32 %v225_v22, 16  ;;  %v270_v33 = vshll.u32 %v225_v22, 16  ;;  %v276_v35 = vshll.u32 %v1497_v28, 16  ;;  %v281_v36 = vshrl.u32 %v226_v23, 16  ;;  %v390_v38 = vld [vmem:[%s1476_s16] sm:$0xe] }
  0x16   : > { %774 = vmatpush.bf16.msrb.mxu2 %v1334_v8  ;;  %890 = vmatpush.bf16.msrb.mxu3 %v1336_v9  ;;  %v245_v34 = vor.u32 %v244_v25, %v241_v24  ;;  %v284_v37 = vshll.u32 %v226_v23, 16  ;;  %v259_v40 = vor.u32 %v258_v29, %v255_v27  ;;  %v290_v43 = vshll.u32 %v1500_v31, 16  ;;  %v391_v44 = vld [vmem:[%s1476_s16 + $0x8] sm:$0xe]  ;;  %v1323_v55 = vld [vmem:[%s1476_s16 + $0xc] sm:$0xf0] }
  0x17   : > { %v269_v41 = vrot.slane %v267_v32, 4  ;;  %v272_v42 = vrot.slane %v270_v33, 5  ;;  %v278_v46 = vrot.slane %v276_v35, 5  ;;  %v283_v47 = vrot.slane %v281_v36, 4  ;;  %v1182_v49 = vld [vmem:[%s1476_s16 + $0x8] sm:$0xf] }
  0x18   : > { %v246_v45 = vrot.slane %v245_v34, 4  ;;  %v286_v48 = vrot.slane %v284_v37, 5  ;;  %v260_v50 = vrot.slane %v259_v40, 4  ;;  %v292_v52 = vrot.slane %v290_v43, 5  ;;  %v1333_v56 = vld [vmem:[%s1693_s1 + $0x60] sm:$0xff]  ;;  %v1335_v7 = vld [vmem:[%s1693_s1 + $0x70] sm:$0xff] }
  0x19   : > { %378 = vmatpush.bf16.msrb.mxu1 %v1317_v10  ;;  %634 = vmatpush.bf16.msrb.mxu0 %v1327_v11  ;;  %v273_v51 = vor.u32 %v272_v42, %v269_v41  ;;  %v1154_v54 = vrot.slane %v390_v38, 9  ;;  %v407_v59 = vrot.slane %v1487_v14, 5  ;;  %v1155_v60 = vrot.slane %v391_v44, 9  ;;  %v1198_v5 = vld [vmem:[%s1476_s16 + $0x8] sm:$0xf] }
  0x1a   : > { %v251_v57 = vsel %vm1506_vm4, %v246_v45, %v250_v26  ;;  %v287_v58 = vor.u32 %v286_v48, %v283_v47  ;;  %v265_v61 = vsel %vm1506_vm4, %v260_v50, %v264_v30  ;;  %v411_v0 = vrot.slane %v1490_v15, 5  ;;  %775 = vmatpush.bf16.msrb.mxu2 %v1333_v56  ;;  %v1533_v6 = vld [vmem:[%s1476_s16 + $0xc] sm:$0x1]  ;;  %v1200_v11 = vld [vmem:[%s1476_s16 + $0x10] sm:$0xf]  ;;  %891 = vmatpush.bf16.msrb.mxu3 %v1335_v7  ;;  %v1330_v26 = vld [vmem:[%s1693_s1 + $0x58] sm:$0xff] }
  0x1b   : > { %v299_v62 = vunpack.c.l.b16 %v251_v57  ;;  %v274_v63 = vrot.slane %v273_v51, 4  ;;  %v300_v1 = vunpack.c.l.b16 %v265_v61  ;;  %v408_v3 = vsel %vm1515_vm5, %v1154_v54, %v407_v59  ;;  %v1544_v12 = vld [vmem:[%s1476_s16 + $0x14] sm:$0x1]  ;;  %v1338_v13 = vld [vmem:[%s1693_s1 + $0x88] sm:$0xff]  ;;  %v392_v27 = vld [vmem:[%s1476_s16 + $0x10] sm:$0xe] }
  0x1c   : > { %v288_v2 = vrot.slane %v287_v58, 4  ;;  %v1183_v4 = vor.u32 %v1323_v55, %v1182_v49  ;;  %v412_v9 = vsel %vm1515_vm5, %v1155_v60, %v411_v0  ;;  %v426_v10 = vunpack.c.l.b16 %v408_v3  ;;  %v393_v33 = vld [vmem:[%s1476_s16 + $0x18] sm:$0xe]  ;;  %v1204_v49 = vld [vmem:[%s1476_s16 + $0x20] sm:$0xf] }
  0x1d   : > { %v279_v8 = vsel %vm1506_vm4, %v274_v63, %v278_v46  ;;  %v303_v14 = vpack.c.b16 %v300_v1, %v299_v62  ;;  %v427_v17 = vunpack.c.l.b16 %v412_v9  ;;  %v543_v19 = vshrl.u32 %v1198_v5, 16  ;;  %v1202_v36 = vld [vmem:[%s1476_s16 + $0x18] sm:$0xf]  ;;  %v1329_v46 = vld [vmem:[%s1693_s1 + $0x50] sm:$0xff]  ;;  %v1337_v54 = vld [vmem:[%s1693_s1 + $0x80] sm:$0xff] }
  0x1e   : > { %v293_v15 = vsel %vm1506_vm4, %v288_v2, %v292_v52  ;;  %v301_v16 = vunpack.c.l.b16 %v279_v8  ;;  %1196 = vmatmul.msk.bf16.vlgmr.msra.gmra.mxu3 %vm317_vm6, %v1183_v4  ;;  %v546_v20 = vshll.u32 %v1198_v5, 16  ;;  %v552_v21 = vshll.u32 %v1533_v6, 16  ;;  %v1186_v48 = vld [vmem:[%s1476_s16 + $0x18] sm:$0xf]  ;;  %v1324_v52 = vld [vmem:[%s1476_s16 + $0x1c] sm:$0xf0] }
  0x1f   : > { %v302_v18 = vunpack.c.l.b16 %v293_v15  ;;  %1134 = vmatmul.msk.bf16.vlgmr.msra.gmra.mxu0 %vm317_vm6, %v303_v14  ;;  %v430_v22 = vpack.c.b16 %v427_v17, %v426_v10  ;;  %v557_v23 = vshrl.u32 %v1200_v11, 16  ;;  %v560_v24 = vshll.u32 %v1200_v11, 16  ;;  %v1581_v57 = vld [vmem:[%s1476_s16 + $0x1c] sm:$0x1]  ;;  %v1586_v61 = vld [vmem:[%s1476_s16 + $0x24] sm:$0x1] }
  0x20   : > { %v566_v25 = vshll.u32 %v1544_v12, 16  ;;  %v545_v30 = vrot.slane %v543_v19, 4  ;;  %v548_v32 = vrot.slane %v546_v20, 5  ;;  %970 = vmatpush.bf16.msra.mxu0 %v1338_v13  ;;  %v554_v38 = vrot.slane %v552_v21, 5  ;;  %v1268_v0 = vld [vmem:[%s1476_s16 + $0x10] sm:$0xf] }
  0x21   : > { %v304_v29 = vpack.c.b16 %v302_v18, %v301_v16  ;;  %1170 = vmatmul.msk.bf16.vlgmr.msra.gmra.mxu2 %vm317_vm6, %v430_v22  ;;  %v559_v34 = vrot.slane %v557_v23, 4  ;;  %v562_v35 = vrot.slane %v560_v24, 5  ;;  %v1156_v40 = vrot.slane %v392_v27, 9  ;;  %v1590_v4 = vld [vmem:[%s1476_s16 + $0x14] sm:$0x1] }
  0x22   : > { %v549_v37 = vor.u32 %v548_v32, %v545_v30  ;;  %v415_v41 = vrot.slane %v1497_v28, 5  ;;  %v568_v43 = vrot.slane %v566_v25, 5  ;;  %v1157_v44 = vrot.slane %v393_v33, 9  ;;  %v1270_v5 = vld [vmem:[%s1476_s16 + $0x18] sm:$0xf] }
  0x23   : > { %1135 = vmatmul.msk.bf16.vlgmr.msra.gmra.mxu1 %vm317_vm6, %v304_v29  ;;  %v563_v42 = vor.u32 %v562_v35, %v559_v34  ;;  %v419_v45 = vrot.slane %v1500_v31, 5  ;;  %v571_v50 = vshrl.u32 %v1202_v36, 16  ;;  %v574_v28 = vshll.u32 %v1202_v36, 16  ;;  %v1138_v7 = vld [vmem:[%s1476_s16] sm:$0xf] }
  0x24   : > { %713 = vmatpush.bf16.msra.mxu1 %v1330_v26  ;;  %v550_v47 = vrot.slane %v549_v37, 4  ;;  %v416_v55 = vsel %vm1515_vm5, %v1156_v40, %v415_v41  ;;  %v585_v63 = vshrl.u32 %v1204_v49, 16  ;;  %971 = vmatpush.bf16.msra.mxu0 %v1337_v54  ;;  %v1187_v2 = vor.u32 %v1324_v52, %v1186_v48  ;;  %v1596_v15 = vld [vmem:[%s1476_s16 + $0x1c] sm:$0x1]  ;;  %v1315_v18 = vld [vmem:[%s1476_s16 + $0x4] sm:$0xf0] }
  0x25   : > { %v564_v51 = vrot.slane %v563_v42, 4  ;;  %v420_v56 = vsel %vm1515_vm5, %v1157_v44, %v419_v45  ;;  %v573_v58 = vrot.slane %v571_v50, 4  ;;  %v576_v62 = vrot.slane %v574_v28, 5  ;;  %v1617_v28 = vld [vmem:[%s1476_s16 + $0x24] sm:$0x1] }
  0x26   : > { %v555_v31 = vsel %vm1506_vm4, %v550_v47, %v554_v38  ;;  %v588_v3 = vshll.u32 %v1204_v49, 16  ;;  %v428_v8 = vunpack.c.l.b16 %v416_v55  ;;  %v429_v9 = vunpack.c.l.b16 %v420_v56  ;;  %v1274_v47 = vld [vmem:[%s1476_s16 + $0x28] sm:$0xf] }
  0x27   : > { %v569_v59 = vsel %vm1506_vm4, %v564_v51, %v568_v43  ;;  %v603_v60 = vunpack.c.l.b16 %v555_v31  ;;  %v580_v10 = vshll.u32 %v1581_v57, 16  ;;  %v587_v11 = vrot.slane %v585_v63, 4  ;;  %v1222_v31 = vld [vmem:[%s1476_s16 + $0x18] sm:$0xe]  ;;  %v1622_v63 = vld [vmem:[%s1476_s16 + $0x2c] sm:$0x1] }
  0x28   : > { %714 = vmatpush.bf16.msra.mxu1 %v1329_v46  ;;  %v604_v1 = vunpack.c.l.b16 %v569_v59  ;;  %v577_v13 = vor.u32 %v576_v62, %v573_v58  ;;  %v590_v14 = vrot.slane %v588_v3, 5  ;;  %v800_v16 = vshrl.u32 %v1268_v0, 16  ;;  %v1272_v46 = vld [vmem:[%s1476_s16 + $0x20] sm:$0xf] }
  0x29   : > { %v803_v17 = vshll.u32 %v1268_v0, 16  ;;  %v594_v20 = vshll.u32 %v1586_v61, 16  ;;  %v809_v21 = vshll.u32 %v1590_v4, 16  ;;  %v814_v22 = vshrl.u32 %v1270_v5, 16  ;;  %v1223_v59 = vld [vmem:[%s1476_s16 + $0x20] sm:$0xe] }
  0x2a   : > { %v607_v19 = vpack.c.b16 %v604_v1, %v603_v60  ;;  %v591_v23 = vor.u32 %v590_v14, %v587_v11  ;;  %v802_v24 = vrot.slane %v800_v16, 4  ;;  %v817_v26 = vshll.u32 %v1270_v5, 16  ;;  %v1142_v1 = vld [vmem:[%s1476_s16 + $0x10] sm:$0xf]  ;;  %v1331_v16 = vld [vmem:[%s1476_s16 + $0x14] sm:$0xf0] }
  0x2b   : > { %v805_v25 = vrot.slane %v803_v17, 5  ;;  %v431_v27 = vpack.c.b16 %v429_v9, %v428_v8  ;;  %v816_v29 = vrot.slane %v814_v22, 4  ;;  %v823_v30 = vshll.u32 %v1596_v15, 16  ;;  %v1316_v8 = vld [vmem:[%s1476_s16 + $0x14] sm:$0xf0] }
  0x2c   : > { %v1139_v32 = vor.u32 %v1315_v18, %v1138_v7  ;;  %v811_v34 = vrot.slane %v809_v21, 5  ;;  %v819_v35 = vrot.slane %v817_v26, 5  ;;  %v578_v36 = vrot.slane %v577_v13, 4  ;;  %v1252_v14 = vld [vmem:[%s1476_s16 + $0x10] sm:$0xf] }
  0x2d   : > { %v806_v33 = vor.u32 %v805_v25, %v802_v24  ;;  %v582_v37 = vrot.slane %v580_v10, 5  ;;  %v596_v38 = vrot.slane %v594_v20, 5  ;;  %v592_v40 = vrot.slane %v591_v23, 4  ;;  %v1290_v26 = vld [vmem:[%s1476_s16 + $0x10] sm:$0xe] }
  0x2e   : > { %1197 = vmatmul.msk.bf16.gmra.mxu3 %vm317_vm6, %v1187_v2  ;;  %v820_v42 = vor.u32 %v819_v35, %v816_v29  ;;  %v825_v43 = vrot.slane %v823_v30, 5  ;;  %v828_v54 = vshrl.u32 %v1272_v46, 16  ;;  %v831_v55 = vshll.u32 %v1272_v46, 16 }
  0x2f   : > { %1218 = vmatmul.msk.bf16.vlgmr.msrb.gmra.mxu0 %vm317_vm6, %v607_v19  ;;  %v807_v41 = vrot.slane %v806_v33, 4  ;;  %v583_v48 = vsel %vm1506_vm4, %v578_v36, %v582_v37  ;;  %v597_v49 = vsel %vm1506_vm4, %v592_v40, %v596_v38  ;;  %v842_v56 = vshrl.u32 %v1274_v47, 16  ;;  %v1221_v38 = vld [vmem:[%s1476_s16 + $0x10] sm:$0xe] }
  0x30   : > { %v821_v45 = vrot.slane %v820_v42, 4  ;;  %v845_v58 = vshll.u32 %v1274_v47, 16  ;;  %v605_v60 = vunpack.c.l.b16 %v583_v48  ;;  %v606_v62 = vunpack.c.l.b16 %v597_v49 }
  0x31   : > { %1171 = vmatmul.msk.bf16.gmra.mxu2 %vm317_vm6, %v431_v27  ;;  %v812_v44 = vsel %vm1506_vm4, %v807_v41, %v811_v34  ;;  %v830_v0 = vrot.slane %v828_v54, 4  ;;  %v833_v2 = vrot.slane %v831_v55, 5  ;;  %v837_v3 = vshll.u32 %v1617_v28, 16  ;;  %v1291_v27 = vld [vmem:[%s1476_s16 + $0x18] sm:$0xe] }
  0x32   : > { %v826_v50 = vsel %vm1506_vm4, %v821_v45, %v825_v43  ;;  %v860_v51 = vunpack.c.l.b16 %v812_v44  ;;  %v844_v5 = vrot.slane %v842_v56, 4  ;;  %v847_v7 = vrot.slane %v845_v58, 5  ;;  %v1220_v34 = vld [vmem:[%s1476_s16 + $0x8] sm:$0xe] }
  0x33   : > { %1152 = vmatmul.msk.bf16.vlgmr.msrb.gmra.mxu1 %vm317_vm6, %v1139_v32  ;;  %v861_v52 = vunpack.c.l.b16 %v826_v50  ;;  %v1226_v10 = vrot.slane %v1222_v31, 9  ;;  %v672_v11 = vrot.slane %v1581_v57, 5  ;;  %v1227_v13 = vrot.slane %v1223_v59, 9  ;;  %v1256_v31 = vld [vmem:[%s1476_s16 + $0x20] sm:$0xf] }
  0x34   : > { %v834_v17 = vor.u32 %v833_v2, %v830_v0  ;;  %v848_v18 = vor.u32 %v847_v7, %v844_v5  ;;  %v851_v19 = vshll.u32 %v1622_v63, 16  ;;  %v676_v20 = vrot.slane %v1586_v61, 5  ;;  %v1332_v55 = vld [vmem:[%s1476_s16 + $0x24] sm:$0xf0]  ;;  %v1292_v59 = vld [vmem:[%s1476_s16 + $0x20] sm:$0xe] }
  0x35   : > { %v864_v9 = vpack.c.b16 %v861_v52, %v860_v51  ;;  %v608_v21 = vpack.c.b16 %v606_v62, %v605_v60  ;;  %v673_v22 = vsel %vm1515_vm5, %v1226_v10, %v672_v11  ;;  %v1143_v57 = vor.u32 %v1316_v8, %v1142_v1  ;;  %v1293_v60 = vld [vmem:[%s1476_s16 + $0x28] sm:$0xe] }
  0x36   : > { %v677_v23 = vsel %vm1515_vm5, %v1227_v13, %v676_v20  ;;  %v685_v24 = vunpack.c.l.b16 %v673_v22  ;;  %v1253_v25 = vor.u32 %v1331_v16, %v1252_v14  ;;  %v835_v30 = vrot.slane %v834_v17, 4 }
  0x37   : > { %v686_v29 = vunpack.c.l.b16 %v677_v23  ;;  %v839_v32 = vrot.slane %v837_v3, 5  ;;  %v849_v61 = vrot.slane %v848_v18, 4  ;;  %v853_v33 = vrot.slane %v851_v19, 5 }
  0x38   : > { %v921_v36 = vrot.slane %v1590_v4, 5  ;;  %v925_v37 = vrot.slane %v1596_v15, 5  ;;  %v1294_v40 = vrot.slane %v1290_v26, 9  ;;  %v1295_v41 = vrot.slane %v1291_v27, 9 }
  0x39   : > { %v688_v35 = vpack.c.b16 %v686_v29, %v685_v24  ;;  %v840_v42 = vsel %vm1506_vm4, %v835_v30, %v839_v32  ;;  %v854_v43 = vsel %vm1506_vm4, %v849_v61, %v853_v33  ;;  %v664_v44 = vrot.slane %v1533_v6, 5 }
  0x3a   : > { %v668_v4 = vrot.slane %v1544_v12, 5  ;;  %v1224_v15 = vrot.slane %v1220_v34, 9  ;;  %v1225_v45 = vrot.slane %v1221_v38, 9  ;;  %v922_v46 = vsel %vm1515_vm5, %v1294_v40, %v921_v36 }
  0x3b   : > { %v926_v47 = vsel %vm1515_vm5, %v1295_v41, %v925_v37  ;;  %v862_v48 = vunpack.c.l.b16 %v840_v42  ;;  %v863_v49 = vunpack.c.l.b16 %v854_v43  ;;  %v940_v50 = vunpack.c.l.b16 %v922_v46 }
  0x3c   : > { %v665_v39 = vsel %vm1515_vm5, %v1224_v15, %v664_v44  ;;  %v669_v6 = vsel %vm1515_vm5, %v1225_v45, %v668_v4  ;;  %v941_v12 = vunpack.c.l.b16 %v926_v47  ;;  %v1257_v58 = vor.u32 %v1332_v55, %v1256_v31 }
  0x3d   : > { %v865_v51 = vpack.c.b16 %v863_v49, %v862_v48  ;;  %v683_v52 = vunpack.c.l.b16 %v665_v39  ;;  %v684_v54 = vunpack.c.l.b16 %v669_v6  ;;  %v1296_v0 = vrot.slane %v1292_v59, 9 }
  0x3e   : > { %1288 = vmatmul.msk.bf16.vlgmr.msrb.gmra.mxu3 %vm317_vm6, %v864_v9  ;;  %v944_v56 = vpack.c.b16 %v941_v12, %v940_v50  ;;  %v929_v1 = vrot.slane %v1617_v28, 5  ;;  %v1297_v2 = vrot.slane %v1293_v60, 9  ;;  %v933_v3 = vrot.slane %v1622_v63, 5 }
  0x3f   : > { %1219 = vmatmul.msk.bf16.gmra.mxu0 %vm317_vm6, %v608_v21  ;;  %v687_v62 = vpack.c.b16 %v684_v54, %v683_v52 }
  0x40   : > { %v930_v5 = vsel %vm1515_vm5, %v1296_v0, %v929_v1  ;;  %v934_v7 = vsel %vm1515_vm5, %v1297_v2, %v933_v3 }
  0x41   : > { %1266 = vmatmul.msk.bf16.vlgmr.msrb.gmra.mxu2 %vm317_vm6, %v1253_v25  ;;  %v942_v8 = vunpack.c.l.b16 %v930_v5  ;;  %v943_v9 = vunpack.c.l.b16 %v934_v7 }
  0x43   : > { %1153 = vmatmul.msk.bf16.gmra.mxu1 %vm317_vm6, %v1143_v57  ;;  %v945_v10 = vpack.c.b16 %v943_v9, %v942_v8 }
  0x4e   : > { %1289 = vmatmul.msk.bf16.gmra.mxu3 %vm317_vm6, %v865_v51  ;;  %v1377_v51 = vld [vmem:[%s1694_s2] ss:$0 sm:$0xff] }
  0x4f   : > { %1310 = vmatmul.msk.bf16.vlgmr.msra.gmra.mxu0 %vm317_vm6, %v944_v56 }
  0x51   : > { %1267 = vmatmul.msk.bf16.gmra.mxu2 %vm317_vm6, %v1257_v58 }
  0x53   : > { %1240 = vmatmul.msk.bf16.vlgmr.msra.gmra.mxu1 %vm317_vm6, %v687_v62 }
  0x5f   : > { %1311 = vmatmul.msk.bf16.gmra.mxu0 %vm317_vm6, %v945_v10 }
  0x63   : > { %1241 = vmatmul.msk.bf16.gmra.mxu1 %vm317_vm6, %v688_v35 }
  0x9c   : > { %v333_v28 = vpop.f32.mrf.mxu0 }
  0xa0   : > { %v338_v11 = vpop.f32.mrf.mxu1 }
  0xa1   : > { %v520_v14 = vpop.f32.mrf.mxu3 }
  0xa4   : > { %v335_v63 = vpop.f32.mrf.mxu0  ;;  %v459_v13 = vpop.f32.mrf.mxu2 }
  0xa8   : > { %v340_v16 = vpop.f32.mrf.mxu1 }
  0xa9   : > { %v522_v20 = vpop.f32.mrf.mxu3 }
  0xac   : > { %v636_v17 = vpop.f32.mrf.mxu0  ;;  %v461_v18 = vpop.f32.mrf.mxu2 }
  0xb0   : > { %v380_v19 = vpop.f32.mrf.mxu1 }
  0xb1   : > { %v525_v23 = vpop.f32.mrf.mxu3  ;;  %v381_v26 = vadd.f32 %v380_v19, %v333_v28 }
  0xb3   : > { %v469_v30 = vadd.f32 %v459_v13, %v381_v26 }
  0xb4   : > { %v638_v21 = vpop.f32.mrf.mxu0  ;;  %v464_v22 = vpop.f32.mrf.mxu2 }
  0xb5   : > { %v530_v61 = vadd.f32 %v520_v14, %v469_v30 }
  0xb7   : > { %v646_v36 = vadd.f32 %v636_v17, %v530_v61 }
  0xb8   : > { %v382_v53 = vpop.f32.mrf.mxu1 }
  0xb9   : > { %v527_v27 = vpop.f32.mrf.mxu3  ;;  %v383_v33 = vadd.f32 %v382_v53, %v335_v63 }
  0xbb   : > { %v470_v37 = vadd.f32 %v461_v18, %v383_v33 }
  0xbc   : > { %v641_v24 = vpop.f32.mrf.mxu0  ;;  %v466_v25 = vpop.f32.mrf.mxu2 }
  0xbd   : > { %v531_v42 = vadd.f32 %v522_v20, %v470_v37 }
  0xbf   : > { %v647_v15 = vadd.f32 %v638_v21, %v531_v42 }
  0xc0   : > { %v385_v57 = vpop.f32.mrf.mxu1 }
  0xc1   : > { %v893_v35 = vpop.f32.mrf.mxu3  ;;  %v386_v43 = vadd.f32 %v385_v57, %v338_v11 }
  0xc3   : > { %v471_v45 = vadd.f32 %v464_v22, %v386_v43 }
  0xc4   : > { %v643_v29 = vpop.f32.mrf.mxu0  ;;  %v777_v34 = vpop.f32.mrf.mxu2 }
  0xc5   : > { %v532_v6 = vadd.f32 %v525_v23, %v471_v45 }
  0xc7   : > { %v648_v31 = vadd.f32 %v641_v24, %v532_v6 }
  0xc8   : > { %v387_v32 = vpop.f32.mrf.mxu1 }
  0xc9   : > { %v895_v47 = vpop.f32.mrf.mxu3  ;;  %v388_v50 = vadd.f32 %v387_v32, %v340_v16 }
  0xcb   : > { %v472_v55 = vadd.f32 %v466_v25, %v388_v50 }
  0xcc   : > { %v973_v40 = vpop.f32.mrf.mxu0  ;;  %v779_v4 = vpop.f32.mrf.mxu2 }
  0xcd   : > { %v533_v2 = vadd.f32 %v527_v27, %v472_v55 }
  0xcf   : > { %v649_v10 = vadd.f32 %v643_v29, %v533_v2 }
  0xd0   : > { %v716_v38 = vpop.f32.mrf.mxu1 }
  0xd1   : > { %v726_v41 = vadd.f32 %v716_v38, %v646_v36  ;;  %v898_v1 = vpop.f32.mrf.mxu3 }
  0xd3   : > { %v787_v44 = vadd.f32 %v777_v34, %v726_v41 }
  0xd4   : > { %v975_v39 = vpop.f32.mrf.mxu0  ;;  %v782_v59 = vpop.f32.mrf.mxu2 }
  0xd5   : > { %v903_v46 = vadd.f32 %v893_v35, %v787_v44 }
  0xd7   : > { %v983_v12 = vadd.f32 %v973_v40, %v903_v46 }
  0xd8   : > { %v718_v48 = vpop.f32.mrf.mxu1 }
  0xd9   : > { %v727_v49 = vadd.f32 %v718_v48, %v647_v15  ;;  %v991_v56 = vadd.f32 %v1377_v51, %v983_v12  ;;  %v900_v17 = vpop.f32.mrf.mxu3 }
  0xdb   : > { %v788_v52 = vadd.f32 %v779_v4, %v727_v49  ;;  %v995_v3 = vmax.f32 %v991_v56, 0.0 }
  0xdc   : > { %v978_v8 = vpop.f32.mrf.mxu0  ;;  %v784_v13 = vpop.f32.mrf.mxu2 }
  0xdd   : > { %v904_v54 = vadd.f32 %v895_v47, %v788_v52 }
  0xdf   : > { %v984_v58 = vadd.f32 %v975_v39, %v904_v54 }
  0xe0   : > { %v721_v60 = vpop.f32.mrf.mxu1 }
  0xe1   : > { %v992_v62 = vadd.f32 %v1377_v51, %v984_v58  ;;  %v728_v0 = vadd.f32 %v721_v60, %v648_v31 }
  0xe3   : > { %v996_v5 = vmax.f32 %v992_v62, 0.0  ;;  %v789_v7 = vadd.f32 %v782_v59, %v728_v0 }
  0xe4   : > { %v980_v19 = vpop.f32.mrf.mxu0 }
  0xe5   : > { %v1342_v9 = vpack.c.bf16 %v996_v5, %v995_v3  ;;  %v905_v28 = vadd.f32 %v898_v1, %v789_v7 }
  0xe7   : > { %1343 = vst [vmem:[%s221_s11] sm:$0xff] %v1342_v9   ;;  %v985_v14 = vadd.f32 %v978_v8, %v905_v28 }
  0xe8   : > { %v723_v11 = vpop.f32.mrf.mxu1 }
  0xe9   : > { %v729_v63 = vadd.f32 %v723_v11, %v649_v10  ;;  %v993_v20 = vadd.f32 %v1377_v51, %v985_v14 }
  0xeb   : > { %v790_v16 = vadd.f32 %v784_v13, %v729_v63  ;;  %v997_v22 = vmax.f32 %v993_v20, 0.0 }
  0xed   : > { %v906_v18 = vadd.f32 %v900_v17, %v790_v16 }
  0xef   : > { %v986_v21 = vadd.f32 %v980_v19, %v906_v18 }
  0xf1   : > { %v994_v53 = vadd.f32 %v1377_v51, %v986_v21 }
  0xf3   : > { %v998_v23 = vmax.f32 %v994_v53, 0.0 }
  0xf5   : > { %v1347_v24 = vpack.c.bf16 %v998_v23, %v997_v22 }
  0xf7   : > { %1349 = vst [vmem:[%s221_s11 + $0x8] sm:$0xff] %v1347_v24  }
  0xf8 PF: > { %s13_s14 = sadd.s32 1, %s1400_s14   ;;  %s1700_s12 = smov %s1396_s13 }
  0xf9   : > { %p10_p5 = scmp.ge.s32.totalorder %s13_s14, 4   ;;  %s1701_s13 = smov %s1703_s15 }
  0xfb   :  { %12 = sbr.rel (!%p10_p5) target bundleno = 2 (0x2), region = 78 }

</bundles_post_ra>
